<compile_context>
chip_gen: v7x
topology: tpu7x:2x2x1
jax: 0.10.0
libtpu: 0.0.40
codegen_flags: <defaults>
</compile_context>

<pallas_src>
import jax
import jax.numpy as jnp
from jax.experimental import pallas as pl
from jax.experimental.pallas import tpu as pltpu

NUM_FREQS = 6                         # get_embedder(6): freqs 2^0 .. 2^5
IN_DIM = 3
EMB_BLOCKS = 1 + 2 * NUM_FREQS        # identity + sin/cos per freq = 13 blocks
EMB_CH = IN_DIM * EMB_BLOCKS          # 39
BLOCK_PAD = 8                         # each 3-row block padded to 8 sublanes
EMB_PAD_CH = EMB_BLOCKS * BLOCK_PAD   # 104
WIDTH = 256
HALF = WIDTH // 2                     # 128


def _residual_sdf_kernel(x_ref, w1_ref, b1_ref, w2_ref, b2_ref, w3_ref, b3_ref,
                         w45_ref, b45_ref, o_ref):
    x8 = x_ref[...]                                           # (8, tn) f32, rows 3..7 are zero

    # Positional embedding, feature-major, block-padded to 8 sublanes per
    # 3-wide block: [x | sin(2^j x), j=0..5 | cos(2^j x), j=0..5] -> (104, tn).
    # All concat offsets are multiples of 8 sublanes (aligned, cheap).
    feats = [x8]
    for j in range(NUM_FREQS):
        feats.append(jnp.sin(x8 * jnp.float32(2.0 ** j)))
    for j in range(NUM_FREQS):
        feats.append(jnp.cos(x8 * jnp.float32(2.0 ** j)))
    emb = jnp.concatenate(feats, axis=0).astype(jnp.bfloat16)  # (104, tn)

    # Layer 1: single K=104 matmul; padded rows hit zero weight columns.
    h = jnp.dot(w1_ref[...], emb, preferred_element_type=jnp.float32)
    h = jnp.maximum(h + b1_ref[...], 0.0)                     # (256, tn)

    # Layers 2, 3: Linear + ReLU.
    h = jnp.dot(w2_ref[...], h.astype(jnp.bfloat16),
                preferred_element_type=jnp.float32)
    h = jnp.maximum(h + b2_ref[...], 0.0)
    h = jnp.dot(w3_ref[...], h.astype(jnp.bfloat16),
                preferred_element_type=jnp.float32)
    h = jnp.maximum(h + b3_ref[...], 0.0)

    # Final projection: Linear(256,128) -> Linear(128,1) folded offline into a
    # single (256, 1) vector; done as VPU multiply + sublane reduction so the
    # MXU is not burned on a width-1 output.
    out = jnp.sum(h * w45_ref[...], axis=0, keepdims=True) + b45_ref[...]
    o_ref[...] = out.astype(o_ref.dtype)                      # (1, tn), lane-dense


def residual_sdf(x, params, *, tn=512):
    """x: (N, 3) float32 points. Returns (N,) float32 SDF residuals."""
    w1, b1, w2, b2, w3, b3, w4, b4, w5, b5 = params
    N = x.shape[0]
    n_tiles = -(-N // tn)
    npad = n_tiles * tn

    # ---- layout plumbing: feature-major points, zero-padded to 8 rows ------
    xt = jnp.zeros((BLOCK_PAD, npad), jnp.float32)
    xt = xt.at[:IN_DIM, :N].set(x.T.astype(jnp.float32))

    # ---- offline weight prep ------------------------------------------------
    # Permute W1 rows to [x, sin f0..f5, cos f0..f5] block order and pad each
    # 3-row block to 8 rows with zeros, then transpose -> (256, 104) bf16.
    zpad = jnp.zeros((BLOCK_PAD - IN_DIM, WIDTH), w1.dtype)
    blocks = [w1[0:IN_DIM]]
    for j in range(NUM_FREQS):                                # sin(2^j x) rows
        blocks.append(w1[IN_DIM * (1 + 2 * j): IN_DIM * (2 + 2 * j)])
    for j in range(NUM_FREQS):                                # cos(2^j x) rows
        blocks.append(w1[IN_DIM * (2 + 2 * j): IN_DIM * (3 + 2 * j)])
    w1_pad = jnp.concatenate(
        [jnp.concatenate([blk, zpad], axis=0) for blk in blocks], axis=0)  # (104, 256)

    w1t = w1_pad.T.astype(jnp.bfloat16)                       # (256, 104)
    w2t = w2.T.astype(jnp.bfloat16)                           # (256, 256)
    w3t = w3.T.astype(jnp.bfloat16)                           # (256, 256)
    b1t = b1.reshape(WIDTH, 1).astype(jnp.float32)
    b2t = b2.reshape(WIDTH, 1).astype(jnp.float32)
    b3t = b3.reshape(WIDTH, 1).astype(jnp.float32)
    w45 = (w4 @ w5).astype(jnp.float32)                       # (256, 1)
    b45 = (b4 @ w5 + b5).astype(jnp.float32)                  # (1, 1)

    def _const(shape):
        return pl.BlockSpec(shape, lambda i: (0,) * len(shape))

    out = pl.pallas_call(
        _residual_sdf_kernel,
        out_shape=jax.ShapeDtypeStruct((1, npad), jnp.float32),
        grid_spec=pltpu.PrefetchScalarGridSpec(
            num_scalar_prefetch=0,
            grid=(n_tiles,),
            in_specs=[
                pl.BlockSpec((BLOCK_PAD, tn), lambda i: (0, i)),   # points tile
                _const((WIDTH, EMB_PAD_CH)),                       # W1^T (padded)
                _const((WIDTH, 1)),                                # b1
                _const((WIDTH, WIDTH)),                            # W2^T
                _const((WIDTH, 1)),                                # b2
                _const((WIDTH, WIDTH)),                            # W3^T
                _const((WIDTH, 1)),                                # b3
                _const((WIDTH, 1)),                                # W4 @ W5 folded
                _const((1, 1)),                                    # b4 @ W5 + b5
            ],
            out_specs=pl.BlockSpec((1, tn), lambda i: (0, i)),
        ),
        compiler_params=pltpu.CompilerParams(
            dimension_semantics=("parallel",)),
    )(xt, w1t, b1t, w2t, b2t, w3t, b3t, w45, b45)
    return out.reshape(-1)[:N]


# ---------------------------------------------------------------------------
# Deterministic parameter construction (mimics torch.nn.Linear default init:
# U(-1/sqrt(fan_in), 1/sqrt(fan_in)) for weights and biases).
# ---------------------------------------------------------------------------
def init_params(key):
    dims = [(EMB_CH, WIDTH), (WIDTH, WIDTH), (WIDTH, WIDTH),
            (WIDTH, HALF), (HALF, 1)]
    params = []
    for (din, dout) in dims:
        key, kw, kb = jax.random.split(key, 3)
        bound = 1.0 / jnp.sqrt(jnp.float32(din))
        w = jax.random.uniform(kw, (din, dout), jnp.float32, -bound, bound)
        b = jax.random.uniform(kb, (1, dout), jnp.float32, -bound, bound)
        params += [w, b]
    return tuple(params)


def residual_sdf_reference(x, params):
    """Pure-JAX reference for validation."""
    w1, b1, w2, b2, w3, b3, w4, b4, w5, b5 = params
    feats = [x]
    for j in range(NUM_FREQS):
        f = 2.0 ** j
        feats.append(jnp.sin(x * f))
        feats.append(jnp.cos(x * f))
    emb = jnp.concatenate(feats, axis=-1)                     # (N, 39)
    hp = jax.lax.Precision.HIGHEST
    h = jax.nn.relu(jnp.dot(emb, w1, precision=hp) + b1)
    h = jax.nn.relu(jnp.dot(h, w2, precision=hp) + b2)
    h = jax.nn.relu(jnp.dot(h, w3, precision=hp) + b3)
    h = jnp.dot(h, w4, precision=hp) + b4
    h = jnp.dot(h, w5, precision=hp) + b5
    return jnp.squeeze(h, axis=-1)


if __name__ == "__main__":
    key = jax.random.PRNGKey(0)
    kx, kp = jax.random.split(key)

    N = 512                                                   # small point batch
    x = jax.random.uniform(kx, (N, IN_DIM), jnp.float32, -1.0, 1.0)
    params = init_params(kp)

    out = residual_sdf(x, params, tn=256)                     # grid of 2 tiles
    out = jax.block_until_ready(out)

    ref = residual_sdf_reference(x, params)
    assert out.shape == (N,)
    assert jnp.allclose(out, ref, atol=1e-2, rtol=1e-2), "mismatch vs reference"

    print("KERNEL_OK")
</pallas_src>

<mosaic_0001>
module attributes {stable_mosaic.version = 11 : i64} {
  func.func @_residual_sdf_kernel(%arg0: i32, %arg1: memref<8x256xf32, #tpu.memory_space<vmem>>, %arg2: memref<256x104xbf16, #tpu.memory_space<vmem>>, %arg3: memref<256x1xf32, #tpu.memory_space<vmem>>, %arg4: memref<256x256xbf16, #tpu.memory_space<vmem>>, %arg5: memref<256x1xf32, #tpu.memory_space<vmem>>, %arg6: memref<256x256xbf16, #tpu.memory_space<vmem>>, %arg7: memref<256x1xf32, #tpu.memory_space<vmem>>, %arg8: memref<256x1xf32, #tpu.memory_space<vmem>>, %arg9: memref<1x1xf32, #tpu.memory_space<vmem>>, %arg10: memref<1x256xf32, #tpu.memory_space<vmem>>) attributes {dimension_semantics = [#tpu.dimension_semantics<parallel>], iteration_bounds = array<i64: 2>, scalar_prefetch = 0 : i64, scratch_operands = 0 : i64, tpu.core_type = #tpu.core_type<tc>, window_params = [{transform_indices = @transform_0, window_bounds = array<i64: 8, 256>}, {pipeline_mode = #tpu.pipeline_mode<synchronous>, transform_indices = @transform_1, window_bounds = array<i64: 256, 104>}, {pipeline_mode = #tpu.pipeline_mode<synchronous>, transform_indices = @transform_2, window_bounds = array<i64: 256, 1>}, {pipeline_mode = #tpu.pipeline_mode<synchronous>, transform_indices = @transform_3, window_bounds = array<i64: 256, 256>}, {pipeline_mode = #tpu.pipeline_mode<synchronous>, transform_indices = @transform_4, window_bounds = array<i64: 256, 1>}, {pipeline_mode = #tpu.pipeline_mode<synchronous>, transform_indices = @transform_5, window_bounds = array<i64: 256, 256>}, {pipeline_mode = #tpu.pipeline_mode<synchronous>, transform_indices = @transform_6, window_bounds = array<i64: 256, 1>}, {pipeline_mode = #tpu.pipeline_mode<synchronous>, transform_indices = @transform_7, window_bounds = array<i64: 256, 1>}, {pipeline_mode = #tpu.pipeline_mode<synchronous>, transform_indices = @transform_8, window_bounds = array<i64: 1, 1>}, {transform_indices = @transform_9, window_bounds = array<i64: 1, 256>}]} {
    %c0 = arith.constant 0 : index
    %c0_0 = arith.constant 0 : index
    %0 = vector.load %arg1[%c0, %c0_0] : memref<8x256xf32, #tpu.memory_space<vmem>>, vector<8x256xf32>
    %cst = arith.constant 1.000000e+00 : f32
    %1 = vector.broadcast %cst : f32 to vector<8x256xf32>
    %2 = arith.mulf %0, %1 : vector<8x256xf32>
    %3 = math.sin %2 : vector<8x256xf32>
    %cst_1 = arith.constant 2.000000e+00 : f32
    %4 = vector.broadcast %cst_1 : f32 to vector<8x256xf32>
    %5 = arith.mulf %0, %4 : vector<8x256xf32>
    %6 = math.sin %5 : vector<8x256xf32>
    %cst_2 = arith.constant 4.000000e+00 : f32
    %7 = vector.broadcast %cst_2 : f32 to vector<8x256xf32>
    %8 = arith.mulf %0, %7 : vector<8x256xf32>
    %9 = math.sin %8 : vector<8x256xf32>
    %cst_3 = arith.constant 8.000000e+00 : f32
    %10 = vector.broadcast %cst_3 : f32 to vector<8x256xf32>
    %11 = arith.mulf %0, %10 : vector<8x256xf32>
    %12 = math.sin %11 : vector<8x256xf32>
    %cst_4 = arith.constant 1.600000e+01 : f32
    %13 = vector.broadcast %cst_4 : f32 to vector<8x256xf32>
    %14 = arith.mulf %0, %13 : vector<8x256xf32>
    %15 = math.sin %14 : vector<8x256xf32>
    %cst_5 = arith.constant 3.200000e+01 : f32
    %16 = vector.broadcast %cst_5 : f32 to vector<8x256xf32>
    %17 = arith.mulf %0, %16 : vector<8x256xf32>
    %18 = math.sin %17 : vector<8x256xf32>
    %cst_6 = arith.constant 1.000000e+00 : f32
    %19 = vector.broadcast %cst_6 : f32 to vector<8x256xf32>
    %20 = arith.mulf %0, %19 : vector<8x256xf32>
    %21 = math.cos %20 : vector<8x256xf32>
    %cst_7 = arith.constant 2.000000e+00 : f32
    %22 = vector.broadcast %cst_7 : f32 to vector<8x256xf32>
    %23 = arith.mulf %0, %22 : vector<8x256xf32>
    %24 = math.cos %23 : vector<8x256xf32>
    %cst_8 = arith.constant 4.000000e+00 : f32
    %25 = vector.broadcast %cst_8 : f32 to vector<8x256xf32>
    %26 = arith.mulf %0, %25 : vector<8x256xf32>
    %27 = math.cos %26 : vector<8x256xf32>
    %cst_9 = arith.constant 8.000000e+00 : f32
    %28 = vector.broadcast %cst_9 : f32 to vector<8x256xf32>
    %29 = arith.mulf %0, %28 : vector<8x256xf32>
    %30 = math.cos %29 : vector<8x256xf32>
    %cst_10 = arith.constant 1.600000e+01 : f32
    %31 = vector.broadcast %cst_10 : f32 to vector<8x256xf32>
    %32 = arith.mulf %0, %31 : vector<8x256xf32>
    %33 = math.cos %32 : vector<8x256xf32>
    %cst_11 = arith.constant 3.200000e+01 : f32
    %34 = vector.broadcast %cst_11 : f32 to vector<8x256xf32>
    %35 = arith.mulf %0, %34 : vector<8x256xf32>
    %36 = math.cos %35 : vector<8x256xf32>
    %37 = tpu.concatenate %0, %3, %6, %9, %12, %15, %18, %21, %24, %27, %30, %33, %36 in 0 : vector<8x256xf32>, vector<8x256xf32>, vector<8x256xf32>, vector<8x256xf32>, vector<8x256xf32>, vector<8x256xf32>, vector<8x256xf32>, vector<8x256xf32>, vector<8x256xf32>, vector<8x256xf32>, vector<8x256xf32>, vector<8x256xf32>, vector<8x256xf32> -> vector<104x256xf32>
    %38 = arith.truncf %37 : vector<104x256xf32> to vector<104x256xbf16>
    %c0_12 = arith.constant 0 : index
    %c0_13 = arith.constant 0 : index
    %39 = vector.load %arg2[%c0_12, %c0_13] : memref<256x104xbf16, #tpu.memory_space<vmem>>, vector<256x104xbf16>
    %cst_14 = arith.constant dense<0.000000e+00> : vector<256x256xf32>
    %40 = tpu.matmul %39, %38, %cst_14 {dimension_numbers = #tpu.dot_dimension_numbers<[1], [0], [0], [1], [0, 0, 1, 1], [], []>} : vector<256x104xbf16>, vector<104x256xbf16>, vector<256x256xf32> -> vector<256x256xf32>
    %c0_15 = arith.constant 0 : index
    %c0_16 = arith.constant 0 : index
    %41 = vector.load %arg3[%c0_15, %c0_16] : memref<256x1xf32, #tpu.memory_space<vmem>>, vector<256x1xf32>
    %42 = vector.broadcast %41 : vector<256x1xf32> to vector<256x256xf32>
    %43 = arith.addf %40, %42 : vector<256x256xf32>
    %cst_17 = arith.constant 0.000000e+00 : f32
    %44 = vector.broadcast %cst_17 : f32 to vector<256x256xf32>
    %45 = arith.maximumf %43, %44 : vector<256x256xf32>
    %c0_18 = arith.constant 0 : index
    %c0_19 = arith.constant 0 : index
    %46 = vector.load %arg4[%c0_18, %c0_19] : memref<256x256xbf16, #tpu.memory_space<vmem>>, vector<256x256xbf16>
    %47 = arith.truncf %45 : vector<256x256xf32> to vector<256x256xbf16>
    %cst_20 = arith.constant dense<0.000000e+00> : vector<256x256xf32>
    %48 = tpu.matmul %46, %47, %cst_20 {dimension_numbers = #tpu.dot_dimension_numbers<[1], [0], [0], [1], [0, 0, 1, 1], [], []>} : vector<256x256xbf16>, vector<256x256xbf16>, vector<256x256xf32> -> vector<256x256xf32>
    %c0_21 = arith.constant 0 : index
    %c0_22 = arith.constant 0 : index
    %49 = vector.load %arg5[%c0_21, %c0_22] : memref<256x1xf32, #tpu.memory_space<vmem>>, vector<256x1xf32>
    %50 = vector.broadcast %49 : vector<256x1xf32> to vector<256x256xf32>
    %51 = arith.addf %48, %50 : vector<256x256xf32>
    %cst_23 = arith.constant 0.000000e+00 : f32
    %52 = vector.broadcast %cst_23 : f32 to vector<256x256xf32>
    %53 = arith.maximumf %51, %52 : vector<256x256xf32>
    %c0_24 = arith.constant 0 : index
    %c0_25 = arith.constant 0 : index
    %54 = vector.load %arg6[%c0_24, %c0_25] : memref<256x256xbf16, #tpu.memory_space<vmem>>, vector<256x256xbf16>
    %55 = arith.truncf %53 : vector<256x256xf32> to vector<256x256xbf16>
    %cst_26 = arith.constant dense<0.000000e+00> : vector<256x256xf32>
    %56 = tpu.matmul %54, %55, %cst_26 {dimension_numbers = #tpu.dot_dimension_numbers<[1], [0], [0], [1], [0, 0, 1, 1], [], []>} : vector<256x256xbf16>, vector<256x256xbf16>, vector<256x256xf32> -> vector<256x256xf32>
    %c0_27 = arith.constant 0 : index
    %c0_28 = arith.constant 0 : index
    %57 = vector.load %arg7[%c0_27, %c0_28] : memref<256x1xf32, #tpu.memory_space<vmem>>, vector<256x1xf32>
    %58 = vector.broadcast %57 : vector<256x1xf32> to vector<256x256xf32>
    %59 = arith.addf %56, %58 : vector<256x256xf32>
    %cst_29 = arith.constant 0.000000e+00 : f32
    %60 = vector.broadcast %cst_29 : f32 to vector<256x256xf32>
    %61 = arith.maximumf %59, %60 : vector<256x256xf32>
    %c0_30 = arith.constant 0 : index
    %c0_31 = arith.constant 0 : index
    %62 = vector.load %arg8[%c0_30, %c0_31] : memref<256x1xf32, #tpu.memory_space<vmem>>, vector<256x1xf32>
    %63 = vector.broadcast %62 : vector<256x1xf32> to vector<256x256xf32>
    %64 = arith.mulf %61, %63 : vector<256x256xf32>
    %cst_32 = arith.constant dense<0.000000e+00> : vector<256xf32>
    %65 = vector.multi_reduction <add>, %64, %cst_32 [0] : vector<256x256xf32> to vector<256xf32>
    %66 = vector.shape_cast %65 : vector<256xf32> to vector<1x256xf32>
    %c0_33 = arith.constant 0 : index
    %c0_34 = arith.constant 0 : index
    %67 = vector.load %arg9[%c0_33, %c0_34] : memref<1x1xf32, #tpu.memory_space<vmem>>, vector<1x1xf32>
    %68 = vector.broadcast %67 : vector<1x1xf32> to vector<1x256xf32>
    %69 = arith.addf %66, %68 : vector<1x256xf32>
    %c0_35 = arith.constant 0 : index
    %c0_36 = arith.constant 0 : index
    %70 = vector.load %arg10[%c0_35, %c0_36] : memref<1x256xf32, #tpu.memory_space<vmem>>, vector<1x256xf32>
    tpu.vector_store %arg10[%c0_35, %c0_36], %69 {strides = array<i32>} : memref<1x256xf32, #tpu.memory_space<vmem>>, vector<1x256xf32>,
    return
  }
  func.func @transform_0(%arg0: i32) -> (i32, i32) {
    %c0_i32 = arith.constant 0 : i32
    %c0_i32_0 = arith.constant 0 : i32
    return %c0_i32, %arg0 : i32, i32
  }
  func.func @transform_1(%arg0: i32) -> (i32, i32) {
    %c0_i32 = arith.constant 0 : i32
    %c0_i32_0 = arith.constant 0 : i32
    %c0_i32_1 = arith.constant 0 : i32
    return %c0_i32, %c0_i32_0 : i32, i32
  }
  func.func @transform_2(%arg0: i32) -> (i32, i32) {
    %c0_i32 = arith.constant 0 : i32
    %c0_i32_0 = arith.constant 0 : i32
    %c0_i32_1 = arith.constant 0 : i32
    return %c0_i32, %c0_i32_0 : i32, i32
  }
  func.func @transform_3(%arg0: i32) -> (i32, i32) {
    %c0_i32 = arith.constant 0 : i32
    %c0_i32_0 = arith.constant 0 : i32
    %c0_i32_1 = arith.constant 0 : i32
    return %c0_i32, %c0_i32_0 : i32, i32
  }
  func.func @transform_4(%arg0: i32) -> (i32, i32) {
    %c0_i32 = arith.constant 0 : i32
    %c0_i32_0 = arith.constant 0 : i32
    %c0_i32_1 = arith.constant 0 : i32
    return %c0_i32, %c0_i32_0 : i32, i32
  }
  func.func @transform_5(%arg0: i32) -> (i32, i32) {
    %c0_i32 = arith.constant 0 : i32
    %c0_i32_0 = arith.constant 0 : i32
    %c0_i32_1 = arith.constant 0 : i32
    return %c0_i32, %c0_i32_0 : i32, i32
  }
  func.func @transform_6(%arg0: i32) -> (i32, i32) {
    %c0_i32 = arith.constant 0 : i32
    %c0_i32_0 = arith.constant 0 : i32
    %c0_i32_1 = arith.constant 0 : i32
    return %c0_i32, %c0_i32_0 : i32, i32
  }
  func.func @transform_7(%arg0: i32) -> (i32, i32) {
    %c0_i32 = arith.constant 0 : i32
    %c0_i32_0 = arith.constant 0 : i32
    %c0_i32_1 = arith.constant 0 : i32
    return %c0_i32, %c0_i32_0 : i32, i32
  }
  func.func @transform_8(%arg0: i32) -> (i32, i32) {
    %c0_i32 = arith.constant 0 : i32
    %c0_i32_0 = arith.constant 0 : i32
    %c0_i32_1 = arith.constant 0 : i32
    return %c0_i32, %c0_i32_0 : i32, i32
  }
  func.func @transform_9(%arg0: i32) -> (i32, i32) {
    %c0_i32 = arith.constant 0 : i32
    %c0_i32_0 = arith.constant 0 : i32
    return %c0_i32, %arg0 : i32, i32
  }
}

</mosaic_0001>

<bundles_post_ra>
// kernel: tpu_custom_call.1
= control target key start
LH: loop header
LB: loop body
LE: loop exit
PB: predicated region body
PF: predicated region fallthrough
CT: control target
= control target key end

     0   :  { %s8274_s0 = inlined_call_operand.vmem [shape: f32[8,512], index: 0, kind: input, shape index: {}]   ;;  %s8275_s1 = inlined_call_operand.vmem [shape: bf16[256,104], index: 1, kind: input, shape index: {}]   ;;  %s8276_s2 = inlined_call_operand.vmem [shape: f32[256,1], index: 2, kind: input, shape index: {}]   ;;  %s8277_s3 = inlined_call_operand.vmem [shape: bf16[256,256], index: 3, kind: input, shape index: {}]   ;;  %s8278_s4 = inlined_call_operand.vmem [shape: f32[256,1], index: 4, kind: input, shape index: {}]   ;;  %s8279_s5 = inlined_call_operand.vmem [shape: bf16[256,256], index: 5, kind: input, shape index: {}]   ;;  %s8280_s6 = inlined_call_operand.vmem [shape: f32[256,1], index: 6, kind: input, shape index: {}]   ;;  %s8281_s7 = inlined_call_operand.vmem [shape: f32[256,1], index: 7, kind: input, shape index: {}]   ;;  %s8282_s8 = inlined_call_operand.<no memory space> [shape: f32[1,1], index: 8, kind: input, shape index: {}]   ;;  %s8283_s9 = inlined_call_operand.hbm [shape: f32[1,512], index: 9, kind: output, shape index: {}]  }
   0x1   :  { %v14_v0 = vstv %s8282_s8 }
   0x2   :  { %15 = vst [vmem:[#allocation2] sm:$0x1] %v14_v0 }
   0x3   :  { %16 = vsyncpa [#allocation4], 0 }
   0x4   :  { %18 = vsyncpa [#allocation4 + $0x1], 0  ;;  %s5855_s11 = smov 0   ;;  %s5857_s12 = smov 0  }
   0x5   :  { %s5859_s13 = smov 0   ;;  %s5861_s14 = smov 0  }
   0x6 LB: > { %s5876_s8 = sadd.s32 4294967295, %s5791_s14   ;;  %s5249_s15 = sadd.s32 4294967294, %s5791_s14   ;;  %s5791_s14 = sphi %s5861_s14, %s8375_s14   ;;  %s5787_s13 = sphi %s5859_s13, %s8374_s13   ;;  %s5783_s12 = sphi %s5857_s12, %s8373_s12   ;;  %s5779_s11 = sphi %s5855_s11, %s8372_s11  }
   0x7   : > { %s5880_s16 = sadd.s32 1, %s5791_s14   ;;  %s225_s17 = sadd.s32 1, %s5787_s13 }
   0x8   : > { %s222_s18 = ssub.s32 %s5791_s14, %s5880_s16  ;;  %p235_p0 = scmp.ne.s32.totalorder %s5787_s13, %s5783_s12 }
   0x9   : > { %p223_p1 = scmp.eq.s32.totalorder %s222_s18, 0  ;;  %p236_p2 = scmp.eq.s32.totalorder %s5876_s8, 1 }
   0xa   : > { %p241_p3 = scmp.ne.s32.totalorder %s5783_s12, %s5779_s11  ;;  %p242_p4 = scmp.eq.s32.totalorder %s5249_s15, 1 }
   0xb   : > { %s5891_s19 = scalar_select %p223_p1, %s5787_s13, %s225_s17  }
   0xc   : > { %p5893_p5 = por %p236_p2, %p235_p0  ;;  %p5897_p6 = por %p242_p4, %p241_p3 }
   0xd   : > { %p5252_p7 = scmp.ge.s32.totalorder %s5791_s14, 1  ;;  %p293_p8 = scmp.lt.s32.totalorder %s5791_s14, 3 }
   0xf   : > { %p294_p9 = pnand %p5252_p7, %p293_p8 }
  0x11   : > { %297 = sbr.rel (%p294_p9) target bundleno = 1431 (0x597), region = 56 }
  0x18   : > { %v2881_v1 = vld [vmem:[%s8276_s2 + $0x10] sm:$0xff]  ;;  %v2879_v2 = vld [vmem:[%s8276_s2] sm:$0xff]  ;;  %s5254_s26 = sshll.u32 %s5876_s8, 1  ;;  %v8284_v3 = vmov 0   ;;  %v2882_v4 = vld [vmem:[%s8276_s2 + $0x18] sm:$0xff]  ;;  %s326_s23 = sand.u32 1, %s5783_s12  }
  0x19   : > { %5565 = vset.pattern.permute.xlu1 %v8284_v3  ;;  %5564 = vset.pattern.permute.xlu0 %v8284_v3  ;;  %p330_p10 = scmp.lt.s32.totalorder %s5254_s26, 3  ;;  %v2880_v5 = vld [vmem:[%s8276_s2 + $0x8] sm:$0xff]  ;;  %v2883_v7 = vld [vmem:[%s8276_s2 + $0x20] sm:$0xff]  ;;  %v2886_v8 = vld [vmem:[%s8276_s2 + $0x38] sm:$0xff]  ;;  %v8309_v49 = vmov 683565275  }
  0x1a   : > { %2923 = vperm.xlu1 %5565, %v2881_v1   ;;  %2913 = vperm.xlu0 %5564, %v2879_v2   ;;  %v2884_v6 = vld [vmem:[%s8276_s2 + $0x28] sm:$0xff]  ;;  %v2885_v9 = vld [vmem:[%s8276_s2 + $0x30] sm:$0xff]  ;;  %v2887_v11 = vld [vmem:[%s8276_s2 + $0x40] sm:$0xff]  ;;  %v8307_v51 = vmov 2475754826   ;;  %s5253_s24 = sshll.u32 %s326_s23, 1 }
  0x1b   : > { %3239 = vmatprep.mubr.bf16.mxu0 %v8284_v3  ;;  %3319 = vmatprep.mubr.bf16.mxu1 %v8284_v3  ;;  %s8377_s26 = smov (!%p330_p10, %s5254_s26), 3  ;;  %v2888_v10 = vld [vmem:[%s8276_s2 + $0x48] sm:$0xff]  ;;  %v2890_v21 = vld [vmem:[%s8276_s2 + $0x58] sm:$0xff]  ;;  %v2889_v22 = vld [vmem:[%s8276_s2 + $0x50] sm:$0xff]  ;;  %v8305_v53 = vmov 2131351028  }
  0x1c   : > { %s5255_s22 = sshll.u32 %s8377_s26, 3  ;;  %v2892_v28 = vld [vmem:[%s8276_s2 + $0x68] sm:$0xff]  ;;  %v2891_v29 = vld [vmem:[%s8276_s2 + $0x60] sm:$0xff]  ;;  %v2894_v35 = vld [vmem:[%s8276_s2 + $0x78] sm:$0xff]  ;;  %v8303_v57 = vmov 2102212464  }
  0x1d   : > { %s5935_s30 = scalar_lea.vmem %s8274_s0, %s5255_s22  ;;  %v2893_v36 = vld [vmem:[%s8276_s2 + $0x70] sm:$0xff]  ;;  %v2896_v55 = vld [vmem:[%s8276_s2 + $0x88] sm:$0xff]  ;;  %v2895_v56 = vld [vmem:[%s8276_s2 + $0x80] sm:$0xff]  ;;  %v8296_v59 = vmov 920167782   ;;  %s5454_s25 = sshll.u32 %s5876_s8, 5 }
  0x1e   : > { %2928 = vperm.xlu1 %5565, %v2882_v4   ;;  %2918 = vperm.xlu0 %5564, %v2880_v5   ;;  %v5944_v12 = vld [vmem:[%s5935_s30 + $0x8] sm:$0xff]  ;;  %v5947_v13 = vld [vmem:[%s5935_s30] sm:$0xff]  ;;  %v8312_v2 = vmov 1326507024   ;;  %s328_s27 = scalar_lea.vmem [#allocation3], %s5253_s24  ;;  %s8232_s10 = scalar_lea.hbm %s8283_s9, %s5454_s25 }
  0x1f   : > { %v443_v14 = vand.u32 2147483647, %v5944_v12  ;;  %v446_v15 = vand.u32 2139095040, %v5944_v12  ;;  %v339_v16 = vand.u32 2147483647, %v5947_v13  ;;  %v342_v17 = vand.u32 2139095040, %v5947_v13 }
  0x20   : > { %v5956_v20 = vmul.f32 2.0, %v5944_v12  ;;  %vm445_vm13 = vcmp.lt.s32.totalorder %v5944_v12, 0  ;;  %s5190_s28 = sshll.u32 %s328_s27, 4  ;;  %s5801_s8 = smov [#allocation3]   ;;  %s8234_s28 = int_to_ptr.vmem [resolvable:$true] %s5190_s28 }
  0x21   : > { %v447_v18 = vshrl.u32 %v446_v15, 23  ;;  %v450_v19 = vand.u32 8388607, %v443_v14  ;;  %v343_v23 = vshrl.u32 %v342_v17, 23  ;;  %v346_v24 = vand.u32 8388607, %v339_v16 }
  0x22   : > { %2938 = vperm.xlu1 %5565, %v2884_v6   ;;  %2933 = vperm.xlu0 %5564, %v2883_v7   ;;  %v656_v27 = vand.u32 2139095040, %v5956_v20  ;;  %v653_v38 = vand.u32 2147483647, %v5956_v20  ;;  %vm6174_vm14 = vcmp.le.f32.partialorder %v443_v14, 0.7853982  ;;  %s5729_s15 = scalar_lea.vmem %s8234_s28, 32 }
  0x23   : > { %v5260_v25 = vadd.s32 4294967169, %v447_v18  ;;  %v5256_v26 = vadd.s32 4294967169, %v343_v23  ;;  %v451_v30 = vor.u32 8388608, %v450_v19  ;;  %v347_v32 = vor.u32 8388608, %v346_v24  ;;  %p5730_p11 = scmp.ne.s32.totalorder %s8234_s28, %s5729_s15  ;;  %s5733_s17 = sshll.u32 %s5801_s8, 4  ;;  %s5734_s17 = int_to_ptr.vmem [resolvable:$false] %s5733_s17 }
  0x24   : > { %v657_v34 = vshrl.u32 %v656_v27, 23  ;;  %s5735_s18 = scalar_lea.vmem %s5734_s17, 64  ;;  %p5736_p0 = scmp.lt.s32.totalorder %s8234_s28, %s5734_s17 }
  0x25   : > { %v453_v31 = vadd.s32 1, %v5260_v25  ;;  %v349_v33 = vadd.s32 1, %v5256_v26  ;;  %v5982_v42 = vshll.u32 %v451_v30, 8  ;;  %v5988_v46 = vshll.u32 %v347_v32, 8  ;;  %v2900_v30 = vld [vmem:[%s8276_s2 + $0xa8] sm:$0xff]  ;;  %p5731_p12 = pnand %p5730_p11, %p5893_p5  ;;  %p5737_p1 = scmp.lt.s32.totalorder %s5735_s18, %s5729_s15 }
  0x26   : > { %2948 = vperm.xlu1 %5565, %v2886_v8   ;;  %2943 = vperm.xlu0 %5564, %v2885_v9   ;;  %v5268_v39 = vadd.s32 4294967169, %v657_v34  ;;  %v2898_v8 = vld [vmem:[%s8276_s2 + $0x98] sm:$0xff]  ;;  %v2897_v9 = vld [vmem:[%s8276_s2 + $0x90] sm:$0xff] }
  0x27   : > { %vm454_vm0 = vcmp.gt.s32.totalorder %v453_v31, 0  ;;  %vm350_vm1 = vcmp.gt.s32.totalorder %v349_v33, 0  ;;  %p5732_p13 = pneg %p5731_p12  ;;  %p5738_p2 = por %p5737_p1, %p5736_p0 }
  0x28   : > { %v455_v37 = vsel %vm454_vm0, %v453_v31, 0  ;;  %v351_v43 = vsel %vm350_vm1, %v349_v33, 0  ;;  %v5990_v47 = vadd.s32 1, %v5268_v39  ;;  %v2899_v31 = vld [vmem:[%s8276_s2 + $0xa0] sm:$0xff] }
  0x29   : > { %v5980_v40 = vshrl.u32 %v455_v37, 5  ;;  %v457_v41 = vand.u32 31, %v455_v37  ;;  %v5984_v44 = vshrl.u32 %v351_v43, 5  ;;  %v5986_v45 = vand.u32 31, %v351_v43  ;;  %p5739_p3 = pnand %p5738_p2, %p5732_p13 }
  0x2a   : > { %2958 = vperm.xlu1 %5565, %v2888_v10   ;;  %2953 = vperm.xlu0 %5564, %v2887_v11   ;;  %vm664_vm11 = vcmp.gt.s32.totalorder %v5990_v47, 0 }
  0x2b   : > { %v458_v48 = vsub.s32 32, %v457_v41  ;;  %v460_v50 = vshll.u32 %v8309_v49, %v457_v41  ;;  %v463_v52 = vshll.u32 %v8307_v51, %v457_v41  ;;  %v466_v54 = vshll.u32 %v8305_v53, %v457_v41 }
  0x2c   : > { %v469_v58 = vshll.u32 %v8303_v57, %v457_v41  ;;  %v472_v60 = vshll.u32 %v8296_v59, %v457_v41  ;;  %vm475_vm2 = vcmp.lt.s32.totalorder %v5980_v40, 1  ;;  %vm476_vm3 = vcmp.lt.s32.totalorder %v5980_v40, 2 }
  0x2d   : > { %v459_v61 = vshrl.u32 %v8309_v49, %v458_v48  ;;  %v461_v62 = vshrl.u32 %v8307_v51, %v458_v48  ;;  %v464_v63 = vshrl.u32 %v8305_v53, %v458_v48  ;;  %vm477_vm4 = vcmp.lt.s32.totalorder %v5980_v40, 3 }
  0x2e   : > { %2968 = vperm.xlu1 %5565, %v2890_v21   ;;  %2963 = vperm.xlu0 %5564, %v2889_v22   ;;  %v467_v0 = vshrl.u32 %v8303_v57, %v458_v48  ;;  %v470_v1 = vshrl.u32 %v8296_v59, %v458_v48  ;;  %v473_v4 = vshrl.u32 %v8312_v2, %v458_v48  ;;  %vm478_vm5 = vcmp.lt.s32.totalorder %v5980_v40, 4 }
  0x2f   : > { %v462_v5 = vor.u32 %v461_v62, %v460_v50  ;;  %v465_v6 = vor.u32 %v464_v63, %v463_v52  ;;  %v354_v7 = vsub.s32 32, %v5986_v45  ;;  %v356_v17 = vshll.u32 %v8309_v49, %v5986_v45 }
  0x30   : > { %v468_v10 = vor.u32 %v467_v0, %v466_v54  ;;  %v471_v11 = vor.u32 %v470_v1, %v469_v58  ;;  %v474_v15 = vor.u32 %v473_v4, %v472_v60  ;;  %v359_v21 = vshll.u32 %v8307_v51, %v5986_v45  ;;  %v2902_v58 = vld [vmem:[%s8276_s2 + $0xb8] sm:$0xff]  ;;  %v2901_v60 = vld [vmem:[%s8276_s2 + $0xb0] sm:$0xff] }
  0x31   : > { %v479_v18 = vsel %vm475_vm2, %v459_v61, %v462_v5  ;;  %v483_v19 = vsel %vm475_vm2, %v462_v5, %v465_v6  ;;  %vm371_vm6 = vcmp.lt.s32.totalorder %v5984_v44, 1  ;;  %v355_v43 = vshrl.u32 %v8309_v49, %v354_v7 }
  0x32   : > { %2978 = vperm.xlu1 %5565, %v2892_v28   ;;  %2973 = vperm.xlu0 %5564, %v2891_v29   ;;  %v480_v22 = vsel %vm478_vm5, %v468_v10, 2102212464  ;;  %v484_v23 = vsel %vm478_vm5, %v471_v11, 920167782  ;;  %v487_v24 = vsel %vm475_vm2, %v465_v6, %v468_v10  ;;  %v488_v25 = vsel %vm478_vm5, %v474_v15, 1326507024 }
  0x33   : > { %v481_v26 = vsel %vm477_vm4, %v465_v6, %v480_v22  ;;  %v485_v27 = vsel %vm477_vm4, %v468_v10, %v484_v23  ;;  %v489_v28 = vsel %vm477_vm4, %v471_v11, %v488_v25  ;;  %v357_v29 = vshrl.u32 %v8307_v51, %v354_v7 }
  0x34   : > { %v482_v32 = vsel %vm476_vm3, %v479_v18, %v481_v26  ;;  %v486_v33 = vsel %vm476_vm3, %v483_v19, %v485_v27  ;;  %v490_v34 = vsel %vm476_vm3, %v487_v24, %v489_v28  ;;  %v362_v40 = vshll.u32 %v8305_v53, %v5986_v45 }
  0x35   : > { %v6062_v39 = vmul.u32.u64.low %v5982_v42, %v486_v33  ;;  %v6063_v41 = vmul.u32.u64.high %v5982_v42, %v486_v33, %v6062_v39  ;;  %v358_v48 = vor.u32 %v357_v29, %v356_v17  ;;  %v363_v52 = vshrl.u32 %v8303_v57, %v354_v7 }
  0x36   : > { %2988 = vperm.xlu1 %5565, %v2894_v35   ;;  %2983 = vperm.xlu0 %5564, %v2893_v36   ;;  %v360_v35 = vshrl.u32 %v8305_v53, %v354_v7  ;;  %v6058_v36 = vmul.u32.u64.low %v5982_v42, %v490_v34  ;;  %v6059_v37 = vmul.u32.u64.high %v5982_v42, %v490_v34, %v6058_v36  ;;  %v365_v54 = vshll.u32 %v8303_v57, %v5986_v45 }
  0x37   : > { %v498_v61 = vmul.u32 %v5982_v42, %v482_v32  ;;  %v369_v62 = vshrl.u32 %v8312_v2, %v354_v7  ;;  %vm372_vm7 = vcmp.lt.s32.totalorder %v5984_v44, 2  ;;  %vm373_vm8 = vcmp.lt.s32.totalorder %v5984_v44, 3 }
  0x38   : > { %v361_v50 = vor.u32 %v360_v35, %v359_v21  ;;  %vm500_vm9 = vc.u32 %v6059_v37, %v6062_v39  ;;  %v364_v63 = vor.u32 %v363_v52, %v362_v40  ;;  %vm374_vm10 = vcmp.lt.s32.totalorder %v5984_v44, 4 }
  0x39   : > { %v375_v42 = vsel %vm371_vm6, %v355_v43, %v358_v48  ;;  %v660_v22 = vand.u32 8388607, %v653_v38  ;;  %v665_v26 = vsel %vm664_vm11, %v5990_v47, 0  ;;  %v6133_v44 = vmul.f32 4.0, %v5944_v12  ;;  %v2905_v47 = vld [vmem:[%s8276_s2 + $0xd0] sm:$0xff]  ;;  %v2908_v43 = vld [vmem:[%s8276_s2 + $0xe8] sm:$0xff] }
  0x3a   : > { %2998 = vperm.xlu1 %5565, %v2896_v55   ;;  %2993 = vperm.xlu0 %5564, %v2895_v56   ;;  %v366_v55 = vshrl.u32 %v8296_v59, %v354_v7  ;;  %v368_v56 = vshll.u32 %v8296_v59, %v5986_v45  ;;  %v501_v45 = vadd.s32 1, %v6063_v41  ;;  %v379_v4 = vsel %vm371_vm6, %v358_v48, %v361_v50  ;;  %v2907_v48 = vld [vmem:[%s8276_s2 + $0xe0] sm:$0xff] }
  0x3b   : > { %v376_v6 = vsel %vm374_vm10, %v364_v63, 2102212464  ;;  %v383_v7 = vsel %vm371_vm6, %v361_v50, %v364_v63  ;;  %v667_v33 = vand.u32 31, %v665_v26  ;;  %v866_v40 = vand.u32 2139095040, %v6133_v44 }
  0x3c   : > { %v367_v0 = vor.u32 %v366_v55, %v365_v54  ;;  %v370_v1 = vor.u32 %v369_v62, %v368_v56  ;;  %v502_v5 = vsel %vm500_vm9, %v501_v45, %v6063_v41  ;;  %v377_v11 = vsel %vm373_vm8, %v361_v50, %v376_v6 }
  0x3d   : > { %v503_v10 = vadd.s32 %v502_v5, %v498_v61  ;;  %v378_v18 = vsel %vm372_vm7, %v375_v42, %v377_v11  ;;  %v661_v41 = vor.u32 8388608, %v660_v22  ;;  %v668_v52 = vsub.s32 32, %v667_v33  ;;  %v2909_v5 = vld [vmem:[%s8276_s2 + $0xf0] sm:$0xff] }
  0x3e   : > { %3008 = vperm.xlu1 %5565, %v2898_v8   ;;  %3003 = vperm.xlu0 %5564, %v2897_v9   ;;  %v2904_v8 = vld [vmem:[%s8276_s2 + $0xc8] sm:$0xff]  ;;  %v2903_v9 = vld [vmem:[%s8276_s2 + $0xc0] sm:$0xff]  ;;  %v380_v15 = vsel %vm374_vm10, %v367_v0, 920167782  ;;  %v384_v17 = vsel %vm374_vm10, %v370_v1, 1326507024  ;;  %v394_v35 = vmul.u32 %v5988_v46, %v378_v18  ;;  %v676_v1 = vshll.u32 %v8305_v53, %v667_v33 }
  0x3f   : > { %v381_v19 = vsel %vm373_vm8, %v364_v63, %v380_v15  ;;  %v385_v21 = vsel %vm373_vm8, %v367_v0, %v384_v17  ;;  %v504_v23 = vadd.s32 536870912, %v503_v10  ;;  %v6154_v56 = vshll.u32 %v661_v41, 8 }
  0x40   : > { %v382_v24 = vsel %vm372_vm7, %v379_v4, %v381_v19  ;;  %v386_v25 = vsel %vm372_vm7, %v383_v7, %v385_v21  ;;  %v6158_v62 = vshrl.u32 %v665_v26, 5  ;;  %v867_v45 = vshrl.u32 %v866_v40, 23  ;;  %v2910_v4 = vld [vmem:[%s8276_s2 + $0xf8] sm:$0xff]  ;;  %v3528_v26 = vld [vmem:[%s8278_s4] sm:$0xff] }
  0x41   : > { %v6121_v27 = vmul.u32.u64.low %v5988_v46, %v386_v25  ;;  %v6122_v28 = vmul.u32.u64.high %v5988_v46, %v386_v25, %v6121_v27  ;;  %v505_v32 = vshrl.u32 %v504_v23, 30  ;;  %v670_v0 = vshll.u32 %v8309_v49, %v667_v33  ;;  %v3529_v25 = vld [vmem:[%s8278_s4 + $0x8] sm:$0xff]  ;;  %v3531_v40 = vld [vmem:[%s8278_s4 + $0x18] sm:$0xff] }
  0x42   : > { %3018 = vperm.xlu1 %5565, %v2900_v30   ;;  %3013 = vperm.xlu0 %5564, %v2899_v31   ;;  %v6125_v29 = vmul.u32.u64.low %v5988_v46, %v382_v24  ;;  %v6126_v30 = vmul.u32.u64.high %v5988_v46, %v382_v24, %v6125_v29  ;;  %v2906_v31 = vld [vmem:[%s8276_s2 + $0xd8] sm:$0xff]  ;;  %v677_v42 = vshrl.u32 %v8303_v57, %v668_v52  ;;  %v671_v7 = vshrl.u32 %v8307_v51, %v668_v52 }
  0x43   : > { %v506_v34 = vshll.u32 %v505_v32, 30  ;;  %v529_v61 = vsub.s32 4, %v505_v32  ;;  %v499_v11 = vadd.s32 %v6062_v39, %v6059_v37  ;;  %v673_v17 = vshll.u32 %v8307_v51, %v667_v33 }
  0x44   : > { %vm396_vm12 = vc.u32 %v6122_v28, %v6125_v29  ;;  %v397_v36 = vadd.s32 1, %v6126_v30  ;;  %v674_v18 = vshrl.u32 %v8305_v53, %v668_v52  ;;  %v669_v22 = vshrl.u32 %v8309_v49, %v668_v52 }
  0x45   : > { %v6148_v50 = vsub.s32 %v503_v10, %v506_v34  ;;  %v530_v21 = vsel %vm445_vm13, %v529_v61, %v505_v32  ;;  %v6187_v23 = vadd.s32 4294967169, %v867_v45  ;;  %v678_v24 = vor.u32 %v677_v42, %v676_v1  ;;  %v3538_v10 = vld [vmem:[%s8278_s4 + $0x50] sm:$0xff] }
  0x46   : > { %3028 = vperm.xlu1 %5565, %v2902_v58   ;;  %3023 = vperm.xlu0 %5564, %v2901_v60   ;;  %v398_v46 = vsel %vm396_vm12, %v397_v36, %v6126_v30  ;;  %v863_v58 = vand.u32 2147483647, %v6133_v44  ;;  %v682_v37 = vshll.u32 %v8296_v59, %v667_v33  ;;  %v683_v39 = vshrl.u32 %v8312_v2, %v668_v52 }
  0x47   : > { %v509_v54 = vsub.s32 0, %v6148_v50  ;;  %v399_v55 = vadd.s32 %v398_v46, %v394_v35  ;;  %v672_v27 = vor.u32 %v671_v7, %v670_v0  ;;  %vm688_vm0 = vcmp.lt.s32.totalorder %v6158_v62, 4 }
  0x48   : > { %vm685_vm1 = vcmp.lt.s32.totalorder %v6158_v62, 1  ;;  %vm341_vm2 = vcmp.lt.s32.totalorder %v5947_v13, 0  ;;  %vm687_vm3 = vcmp.lt.s32.totalorder %v6158_v62, 3  ;;  %vm686_vm4 = vcmp.lt.s32.totalorder %v6158_v62, 2 }
  0x49   : > { %v5261_v60 = vmin.u32 %v509_v54, %v6148_v50  ;;  %v400_v63 = vadd.s32 536870912, %v399_v55  ;;  %v6226_v45 = vand.u32 8388607, %v863_v58  ;;  %v532_v1 = vsel %vm6174_vm14, 0, %v530_v21 }
  0x4a   : > { %3038 = vperm.xlu1 %5565, %v2904_v8   ;;  %3033 = vperm.xlu0 %5564, %v2903_v9   ;;  %v679_v8 = vshll.u32 %v8303_v57, %v667_v33  ;;  %v680_v9 = vshrl.u32 %v8296_v59, %v668_v52  ;;  %v690_v33 = vsel %vm688_vm0, %v678_v24, 2102212464  ;;  %vm6234_vm5 = vcmp.le.f32.partialorder %v339_v16, 0.7853982  ;;  %v3532_v16 = vld [vmem:[%s8278_s4 + $0x20] sm:$0xff] }
  0x4b   : > { %v511_v6 = vclz %v5261_v60  ;;  %v6180_v15 = vshrl.u32 %v400_v63, 30 }
  0x4c   : > { %v681_v30 = vor.u32 %v680_v9, %v679_v8  ;;  %v3533_v9 = vld [vmem:[%s8278_s4 + $0x28] sm:$0xff] }
  0x4d   : > { %v5262_v19 = vadd.s32 4294967294, %v511_v6  ;;  %v402_v14 = vshll.u32 %v6180_v15, 30  ;;  %v425_v6 = vsub.s32 4, %v6180_v15 }
  0x4e   : > { %3048 = vperm.xlu1 %5565, %v2906_v31   ;;  %3043 = vperm.xlu0 %5564, %v2905_v47   ;;  %v675_v47 = vor.u32 %v674_v18, %v673_v17 }
  0x4f   : > { %vm5263_vm15 = vcmp.lt.s32.totalorder %v5262_v19, 0  ;;  %v6199_v32 = vsub.s32 %v399_v55, %v402_v14  ;;  %v694_v55 = vsel %vm688_vm0, %v681_v30, 920167782 }
  0x50   : > { %v514_v31 = vsel %vm5263_vm15, 0, %v5262_v19  ;;  %v691_v54 = vsel %vm687_vm3, %v675_v47, %v690_v33  ;;  %v693_v61 = vsel %vm685_vm1, %v672_v27, %v675_v47  ;;  %v695_v42 = vsel %vm687_vm3, %v678_v24, %v694_v55 }
  0x51   : > { %v515_v34 = vsub.s32 32, %v514_v31  ;;  %v516_v35 = vshll.u32 %v6148_v50, %v514_v31  ;;  %v519_v36 = vsub.s32 4294967266, %v514_v31  ;;  %v405_v41 = vsub.s32 0, %v6199_v32  ;;  %v3530_v50 = vld [vmem:[%s8278_s4 + $0x10] sm:$0xff] }
  0x52   : > { %3058 = vperm.xlu1 %5565, %v2908_v43   ;;  %3053 = vperm.xlu0 %5564, %v2907_v48   ;;  %v684_v43 = vor.u32 %v683_v39, %v682_v37  ;;  %v689_v48 = vsel %vm685_vm1, %v669_v22, %v672_v27  ;;  %v697_v8 = vsel %vm685_vm1, %v675_v47, %v678_v24  ;;  %v536_v39 = vadd.s32 3, %v532_v1  ;;  %v3535_v47 = vld [vmem:[%s8278_s4 + $0x38] sm:$0xff] }
  0x53   : > { %v517_v46 = vshrl.u32 %v499_v11, %v515_v34  ;;  %v520_v52 = vadd.s32 127, %v519_v36  ;;  %v5257_v60 = vmin.u32 %v405_v41, %v6199_v32  ;;  %v692_v7 = vsel %vm686_vm4, %v689_v48, %v691_v54 }
  0x54   : > { %v696_v18 = vsel %vm686_vm4, %v693_v61, %v695_v42  ;;  %v698_v19 = vsel %vm688_vm0, %v684_v43, 1326507024  ;;  %v426_v33 = vsel %vm341_vm2, %v425_v6, %v6180_v15  ;;  %v708_v34 = vmul.u32 %v6154_v56, %v692_v7 }
  0x55   : > { %v518_v63 = vor.u32 %v517_v46, %v516_v35  ;;  %v521_v0 = vshll.u32 %v520_v52, 23  ;;  %v699_v22 = vsel %vm687_vm3, %v681_v30, %v698_v19  ;;  %v873_v30 = vadd.s32 1, %v6187_v23 }
  0x56   : > { %3068 = vperm.xlu1 %5565, %v2910_v4   ;;  %3063 = vperm.xlu0 %5564, %v2909_v5   ;;  %v407_v5 = vclz %v5257_v60  ;;  %v6256_v14 = vmul.u32.u64.low %v6154_v56, %v696_v18  ;;  %v6257_v24 = vmul.u32.u64.high %v6154_v56, %v696_v18, %v6256_v14  ;;  %v6281_v48 = vand.u32 3, %v532_v1 }
  0x57   : > { %v522_v11 = vor.u32 4788187, %v521_v0  ;;  %v525_v17 = vcvt.s32.f32 %v518_v63  ;;  %vm874_vm7 = vcmp.gt.s32.totalorder %v873_v30, 0  ;;  %v428_v54 = vsel %vm6234_vm5, 0, %v426_v33 }
  0x58   : > { %v5258_v21 = vadd.s32 4294967294, %v407_v5  ;;  %v711_v41 = vadd.s32 1, %v6257_v24  ;;  %v875_v60 = vsel %vm874_vm7, %v873_v30, 0  ;;  %vm1798_vm10 = vcmp.eq.s32.totalorder %v6281_v48, 2  ;;  %v3541_v30 = vld [vmem:[%s8278_s4 + $0x68] sm:$0xff] }
  0x59   : > { %v523_v37 = vand.u32 2147483647, %v522_v11  ;;  %v877_v42 = vand.u32 31, %v875_v60  ;;  %vm1795_vm12 = vcmp.eq.s32.totalorder %v6281_v48, 0  ;;  %v6317_v19 = vshrl.u32 %v875_v60, 5 }
  0x5a   : > { %3567 = vperm.xlu1 %5565, %v3529_v25   ;;  %3562 = vperm.xlu0 %5564, %v3528_v26   ;;  %v395_v25 = vadd.s32 %v6125_v29, %v6122_v28  ;;  %v700_v26 = vsel %vm686_vm4, %v697_v8, %v699_v22  ;;  %vm5259_vm6 = vcmp.lt.s32.totalorder %v5258_v21, 0  ;;  %v3534_v28 = vld [vmem:[%s8278_s4 + $0x30] sm:$0xff]  ;;  %v3539_v8 = vld [vmem:[%s8278_s4 + $0x58] sm:$0xff]  ;;  %vm535_vm15 = vweird.f32 %v5944_v12 }
  0x5b   : > { %v6265_v27 = vmul.u32.u64.low %v6154_v56, %v700_v26  ;;  %v6266_v31 = vmul.u32.u64.high %v6154_v56, %v700_v26, %v6265_v27  ;;  %v526_v29 = vmul.f32 %v525_v17, %v523_v37  ;;  %v410_v62 = vsel %vm5259_vm6, 0, %v5258_v21  ;;  %v3537_v56 = vld [vmem:[%s8278_s4 + $0x48] sm:$0xff] }
  0x5c   : > { %v411_v35 = vsub.s32 32, %v410_v62  ;;  %v412_v36 = vshll.u32 %v6199_v32, %v410_v62  ;;  %v415_v23 = vsub.s32 4294967266, %v410_v62  ;;  %v3536_v32 = vld [vmem:[%s8278_s4 + $0x40] sm:$0xff]  ;;  %v878_v11 = vsub.s32 32, %v877_v42 }
  0x5d   : > { %v527_v43 = vxor.u32 2147483648, %v526_v29  ;;  %vm710_vm8 = vc.u32 %v6266_v31, %v6256_v14  ;;  %v880_v22 = vshll.u32 %v8309_v49, %v877_v42  ;;  %v889_v37 = vshll.u32 %v8303_v57, %v877_v42 }
  0x5e   : > { %3577 = vperm.xlu1 %5565, %v3531_v40   ;;  %3572 = vperm.xlu0 %5564, %v3530_v50   ;;  %v6284_v40 = vmul.f32 2.0, %v5947_v13  ;;  %v6286_v50 = vand.u32 3, %v536_v39  ;;  %v413_v15 = vshrl.u32 %v395_v25, %v411_v35  ;;  %v416_v46 = vadd.s32 127, %v415_v23 }
  0x5f   : > { %v528_v52 = vsel %vm445_vm13, %v527_v43, %v526_v29  ;;  %v712_v55 = vsel %vm710_vm8, %v711_v41, %v6257_v24  ;;  %v883_v24 = vshll.u32 %v8307_v51, %v877_v42  ;;  %v884_v26 = vshrl.u32 %v8305_v53, %v878_v11 }
  0x60   : > { %v531_v61 = vsel %vm6174_vm14, %v5944_v12, %v528_v52  ;;  %v414_v63 = vor.u32 %v413_v15, %v412_v36  ;;  %v417_v0 = vshll.u32 %v416_v46, 23  ;;  %v713_v1 = vadd.s32 %v712_v55, %v708_v34 }
  0x61   : > { %5678 = vcosq.f32 %v531_v61  ;;  %vm542_vm9 = vcmp.eq.s32.totalorder %v6286_v50, 2  ;;  %vm539_vm11 = vcmp.eq.s32.totalorder %v6286_v50, 0  ;;  %v552_v21 = vand.u32 2139095040, %v6284_v40 }
  0x62   : > { %3587 = vperm.xlu1 %5565, %v3533_v9   ;;  %3582 = vperm.xlu0 %5564, %v3532_v16   ;;  %5680 = vsinq.f32 %v531_v61  ;;  %v418_v5 = vor.u32 4788187, %v417_v0  ;;  %v421_v6 = vcvt.s32.f32 %v414_v63  ;;  %v714_v7 = vadd.s32 536870912, %v713_v1  ;;  %v3543_v61 = vld [vmem:[%s8278_s4 + $0x78] sm:$0xff]  ;;  %v3542_v63 = vld [vmem:[%s8278_s4 + $0x70] sm:$0xff] }
  0x63   : > { %v432_v9 = vadd.s32 3, %v428_v54  ;;  %v871_v16 = vor.u32 8388608, %v6226_v45  ;;  %vm538_vm13 = vcmp.lt.s32.totalorder %v6286_v50, 2  ;;  %vm1794_vm14 = vcmp.lt.s32.totalorder %v6281_v48, 2 }
  0x64   : > { %v419_v17 = vand.u32 2147483647, %v418_v5  ;;  %v6315_v18 = vshrl.u32 %v714_v7, 30  ;;  %v881_v45 = vshrl.u32 %v8307_v51, %v878_v11  ;;  %v890_v27 = vshrl.u32 %v8296_v59, %v878_v11 }
  0x65   : > { %v887_v29 = vshrl.u32 %v8303_v57, %v878_v11  ;;  %v892_v62 = vshll.u32 %v8296_v59, %v877_v42  ;;  %v893_v33 = vshrl.u32 %v8312_v2, %v878_v11  ;;  %v6340_v35 = vand.u32 3, %v432_v9 }
  0x66   : > { %3597 = vperm.xlu1 %5565, %v3535_v47   ;;  %3592 = vperm.xlu0 %5564, %v3534_v28   ;;  %v422_v39 = vmul.f32 %v421_v6, %v419_v17  ;;  %v716_v25 = vshll.u32 %v6315_v18, 30  ;;  %v3540_v47 = vld [vmem:[%s8278_s4 + $0x60] sm:$0xff]  ;;  %v886_v28 = vshll.u32 %v8305_v53, %v877_v42  ;;  %v6342_v36 = vand.u32 3, %v428_v54 }
  0x67   : > { %v879_v41 = vshrl.u32 %v8309_v49, %v878_v11  ;;  %v882_v43 = vor.u32 %v881_v45, %v880_v22  ;;  %v6347_v15 = vshll.u32 %v871_v16, 8  ;;  %v6349_v46 = vshrl.u32 %v552_v21, 23  ;;  %v3545_v22 = vld [vmem:[%s8278_s4 + $0x88] sm:$0xff]  ;;  %v3544_v45 = vld [vmem:[%s8278_s4 + $0x80] sm:$0xff] }
  0x68   : > { %v423_v34 = vxor.u32 2147483648, %v422_v39  ;;  %v6344_v23 = vsub.s32 %v713_v1, %v716_v25  ;;  %v885_v52 = vor.u32 %v884_v26, %v883_v24  ;;  %v891_v55 = vor.u32 %v890_v27, %v889_v37 }
  0x69   : > { %v888_v0 = vor.u32 %v887_v29, %v886_v28  ;;  %v894_v1 = vor.u32 %v893_v33, %v892_v62  ;;  %vm898_vm0 = vcmp.lt.s32.totalorder %v6317_v19, 4  ;;  %vm895_vm1 = vcmp.lt.s32.totalorder %v6317_v19, 1 }
  0x6a   : > { %3607 = vperm.xlu1 %5565, %v3537_v56   ;;  %3602 = vperm.xlu0 %5564, %v3536_v32   ;;  %v424_v56 = vsel %vm341_vm2, %v423_v34, %v422_v39  ;;  %v719_v32 = vsub.s32 0, %v6344_v23  ;;  %vm897_vm2 = vcmp.lt.s32.totalorder %v6317_v19, 3  ;;  %v904_v16 = vsel %vm898_vm0, %v891_v55, 920167782 }
  0x6b   : > { %v5679_v54 = vpop.eup %5678  ;;  %v427_v60 = vsel %vm6234_vm5, %v5947_v13, %v424_v56  ;;  %v900_v7 = vsel %vm898_vm0, %v888_v0, 2102212464  ;;  %vm896_vm3 = vcmp.lt.s32.totalorder %v6317_v19, 2  ;;  %v903_v21 = vsel %vm895_vm1, %v882_v43, %v885_v52 }
  0x6c   : > { %v5681_v42 = vpop.eup %5680  ;;  %v543_v5 = vxor.u32 2147483648, %v5679_v54  ;;  %5682 = vcosq.f32 %v427_v60  ;;  %v5269_v6 = vmin.u32 %v719_v32, %v6344_v23  ;;  %vm1691_vm4 = vcmp.lt.s32.totalorder %v6342_v36, 2 }
  0x6d   : > { %v540_v4 = vxor.u32 2147483648, %v5681_v42  ;;  %5684 = vsinq.f32 %v427_v60  ;;  %v899_v25 = vsel %vm895_vm1, %v879_v41, %v882_v43  ;;  %vm431_vm5 = vweird.f32 %v5947_v13 }
  0x6e   : > { %3617 = vperm.xlu1 %5565, %v3539_v8   ;;  %3612 = vperm.xlu0 %5564, %v3538_v10   ;;  %v544_v8 = vsel %vm542_vm9, %v543_v5, %v5681_v42  ;;  %v1800_v10 = vsel %vm1798_vm10, %v543_v5, %v5681_v42  ;;  %v721_v9 = vclz %v5269_v6  ;;  %v901_v50 = vsel %vm897_vm2, %v885_v52, %v900_v7 }
  0x6f   : > { %v541_v11 = vsel %vm539_vm11, %v5679_v54, %v540_v4  ;;  %v1797_v17 = vsel %vm1795_vm12, %v5679_v54, %v540_v4  ;;  %v905_v48 = vsel %vm897_vm2, %v888_v0, %v904_v16  ;;  %v907_v28 = vsel %vm895_vm1, %v885_v52, %v888_v0 }
  0x70   : > { %v545_v24 = vsel %vm538_vm13, %v541_v11, %v544_v8  ;;  %v1801_v37 = vsel %vm1794_vm14, %v1797_v17, %v1800_v10  ;;  %v5270_v39 = vadd.s32 4294967294, %v721_v9  ;;  %v908_v62 = vsel %vm898_vm0, %v894_v1, 1326507024 }
  0x71   : > { %v546_v26 = vsel %vm535_vm15, nan, %v545_v24  ;;  %v6399_v27 = vsel %vm535_vm15, nan, %v1801_v37  ;;  %vm1692_vm7 = vcmp.eq.s32.totalorder %v6342_v36, 0  ;;  %vm1695_vm8 = vcmp.eq.s32.totalorder %v6342_v36, 2 }
  0x72   : > { %3627 = vperm.xlu1 %5565, %v3541_v30   ;;  %3622 = vperm.xlu0 %5564, %v3540_v47   ;;  %v2834_v30 = vpack.c.bf16 %v546_v26, %v5944_v12  ;;  %vm5271_vm6 = vcmp.lt.s32.totalorder %v5270_v39, 0  ;;  %v906_v47 = vsel %vm896_vm3, %v903_v21, %v905_v48  ;;  %v909_v41 = vsel %vm897_vm2, %v891_v55, %v908_v62  ;;  %v6460_v21 = vld [vmem:[%s5935_s30] sm:$0xff] }
  0x73   : > { %v724_v29 = vsel %vm5271_vm6, 0, %v5270_v39  ;;  %v6414_v33 = vmul.u32.u64.low %v6347_v15, %v906_v47  ;;  %v6415_v34 = vmul.u32.u64.high %v6347_v15, %v906_v47, %v6414_v33  ;;  %vm438_vm9 = vcmp.eq.s32.totalorder %v6340_v35, 2 }
  0x74   : > { %3207 = vmatprep.subr.bf16.mxu0 %v2834_v30  ;;  %5455 = vmatprep.subr.bf16.mxu1 %v2834_v30  ;;  %v729_v12 = vsub.s32 4294967266, %v724_v29  ;;  %v709_v43 = vadd.s32 %v6256_v14, %v6266_v31  ;;  %v910_v56 = vsel %vm896_vm3, %v907_v28, %v909_v41  ;;  %v5264_v32 = vadd.s32 4294967169, %v6349_v46 }
  0x75   : > { %v725_v54 = vsub.s32 32, %v724_v29  ;;  %v902_v60 = vsel %vm896_vm3, %v899_v25, %v901_v50  ;;  %vm435_vm10 = vcmp.eq.s32.totalorder %v6340_v35, 0  ;;  %vm434_vm11 = vcmp.lt.s32.totalorder %v6340_v35, 2 }
  0x76   : > { %3637 = vperm.xlu1 %5565, %v3543_v61   ;;  %3632 = vperm.xlu0 %5564, %v3542_v63   ;;  %v5683_v52 = vpop.eup %5682  ;;  %v6431_v61 = vmul.u32.u64.low %v6347_v15, %v910_v56  ;;  %v6432_v63 = vmul.u32.u64.high %v6347_v15, %v910_v56, %v6431_v61  ;;  %v730_v1 = vadd.s32 127, %v729_v12  ;;  %v559_v14 = vadd.s32 1, %v5264_v32 }
  0x77   : > { %v5685_v55 = vpop.eup %5684  ;;  %v439_v0 = vxor.u32 2147483648, %v5683_v52  ;;  %v921_v46 = vadd.s32 1, %v6415_v34  ;;  %v549_v42 = vand.u32 2147483647, %v6284_v40  ;;  %v726_v6 = vshll.u32 %v6344_v23, %v724_v29 }
  0x78   : > { %v436_v31 = vxor.u32 2147483648, %v5685_v55  ;;  %v918_v4 = vmul.u32 %v6347_v15, %v902_v60  ;;  %v727_v10 = vshrl.u32 %v709_v43, %v725_v54  ;;  %vm560_vm12 = vcmp.gt.s32.totalorder %v559_v14, 0 }
  0x79   : > { %v440_v19 = vsel %vm438_vm9, %v439_v0, %v5685_v55  ;;  %v1697_v5 = vsel %vm1695_vm8, %v439_v0, %v5685_v55  ;;  %v731_v35 = vshll.u32 %v730_v1, 23  ;;  %vm920_vm13 = vc.u32 %v6432_v63, %v6414_v33 }
  0x7a   : > { %3647 = vperm.xlu1 %5565, %v3545_v22   ;;  %3642 = vperm.xlu0 %5564, %v3544_v45   ;;  %v437_v7 = vsel %vm435_vm10, %v5683_v52, %v436_v31  ;;  %v1694_v8 = vsel %vm1692_vm7, %v5683_v52, %v436_v31  ;;  %v922_v15 = vsel %vm920_vm13, %v921_v46, %v6415_v34  ;;  %v556_v17 = vand.u32 8388607, %v549_v42 }
  0x7b   : > { %v441_v9 = vsel %vm434_vm11, %v437_v7, %v440_v19  ;;  %v1698_v16 = vsel %vm1691_vm4, %v1694_v8, %v1697_v5  ;;  %v923_v22 = vadd.s32 %v922_v15, %v918_v4  ;;  %v561_v45 = vsel %vm560_vm12, %v559_v14, 0 }
  0x7c   : > { %v442_v11 = vsel %vm431_vm5, nan, %v441_v9  ;;  %v6454_v23 = vsel %vm431_vm5, nan, %v1698_v16  ;;  %v563_v24 = vand.u32 31, %v561_v45  ;;  %v728_v37 = vor.u32 %v727_v10, %v726_v6 }
  0x7d   : > { %8324 = vst [vmem:[#allocation6_spill] sm:$0xff] %v6454_v23  ;;  %v2833_v36 = vpack.c.bf16 %v442_v11, %v6460_v21  ;;  %v732_v39 = vor.u32 4788187, %v731_v35  ;;  %v924_v25 = vadd.s32 536870912, %v923_v22  ;;  %v557_v13 = vor.u32 8388608, %v556_v17 }
  0x7e   : > { %v564_v26 = vsub.s32 32, %v563_v24  ;;  %vm655_vm14 = vcmp.lt.s32.totalorder %v5956_v20, 0  ;;  %v562_v48 = vshrl.u32 %v561_v45, 5  ;;  %v566_v30 = vshll.u32 %v8309_v49, %v563_v24 }
  0x7f   : > { %3208 = vmatpush1.bf16.msra.mxu0 %v2833_v36  ;;  %5462 = vmatpush1.bf16.msra.mxu1 %v2833_v36  ;;  %v6464_v50 = vshrl.u32 %v924_v25, 30  ;;  %v569_v47 = vshll.u32 %v8307_v51, %v563_v24  ;;  %v572_v62 = vshll.u32 %v8305_v53, %v563_v24  ;;  %v575_v34 = vshll.u32 %v8303_v57, %v563_v24 }
  0x80   : > { %v567_v28 = vshrl.u32 %v8307_v51, %v564_v26  ;;  %v570_v29 = vshrl.u32 %v8305_v53, %v564_v26  ;;  %v733_v12 = vand.u32 2147483647, %v732_v39  ;;  %v735_v41 = vcvt.s32.f32 %v728_v37 }
  0x81   : > { %v926_v43 = vshll.u32 %v6464_v50, 30  ;;  %v573_v56 = vshrl.u32 %v8303_v57, %v564_v26  ;;  %v739_v32 = vsub.s32 4, %v6315_v18  ;;  %v576_v52 = vshrl.u32 %v8296_v59, %v564_v26 }
  0x82   : > { %v578_v54 = vshll.u32 %v8296_v59, %v563_v24  ;;  %v6478_v60 = vmul.f32 4.0, %v6460_v21  ;;  %v568_v55 = vor.u32 %v567_v28, %v566_v30  ;;  %v571_v0 = vor.u32 %v570_v29, %v569_v47 }
  0x83   : > { %v6480_v61 = vsub.s32 %v923_v22, %v926_v43  ;;  %v6482_v1 = vshll.u32 %v557_v13, 8  ;;  %vm6486_vm15 = vcmp.le.f32.partialorder %v653_v38, 0.7853982  ;;  %v574_v31 = vor.u32 %v573_v56, %v572_v62 }
  0x84   : > { %v577_v46 = vor.u32 %v576_v52, %v575_v34  ;;  %v579_v19 = vshrl.u32 %v8312_v2, %v564_v26  ;;  %vm581_vm0 = vcmp.lt.s32.totalorder %v562_v48, 1  ;;  %v736_v5 = vmul.f32 %v735_v41, %v733_v12 }
  0x85   : > { %vm865_vm1 = vcmp.lt.s32.totalorder %v6133_v44, 0  ;;  %v929_v6 = vsub.s32 0, %v6480_v61  ;;  %v565_v4 = vshrl.u32 %v8309_v49, %v564_v26  ;;  %vm583_vm2 = vcmp.lt.s32.totalorder %v562_v48, 3 }
  0x86   : > { %v580_v7 = vor.u32 %v579_v19, %v578_v54  ;;  %vm582_vm3 = vcmp.lt.s32.totalorder %v562_v48, 2  ;;  %vm584_vm4 = vcmp.lt.s32.totalorder %v562_v48, 4  ;;  %v762_v38 = vand.u32 2139095040, %v6478_v60 }
  0x87   : > { %v5277_v8 = vmin.u32 %v929_v6, %v6480_v61  ;;  %v586_v10 = vsel %vm584_vm4, %v574_v31, 2102212464  ;;  %v589_v9 = vsel %vm581_vm0, %v568_v55, %v571_v0  ;;  %v590_v16 = vsel %vm584_vm4, %v577_v46, 920167782 }
  0x88   : > { %v740_v35 = vsel %vm655_vm14, %v739_v32, %v6315_v18  ;;  %v591_v11 = vsel %vm583_vm2, %v574_v31, %v590_v16  ;;  %v593_v15 = vsel %vm581_vm0, %v571_v0, %v574_v31  ;;  %v594_v17 = vsel %vm584_vm4, %v580_v7, 1326507024 }
  0x89   : > { %v737_v36 = vxor.u32 2147483648, %v736_v5  ;;  %v931_v22 = vclz %v5277_v8  ;;  %v585_v45 = vsel %vm581_vm0, %v565_v4, %v568_v55  ;;  %v587_v24 = vsel %vm583_vm2, %v571_v0, %v586_v10 }
  0x8a   : > { %v949_v37 = vsub.s32 4, %v6464_v50  ;;  %v592_v39 = vsel %vm582_vm3, %v589_v9, %v591_v11  ;;  %v595_v25 = vsel %vm583_vm2, %v577_v46, %v594_v17  ;;  %v763_v13 = vshrl.u32 %v762_v38, 23 }
  0x8b   : > { %v5278_v26 = vadd.s32 4294967294, %v931_v22  ;;  %v596_v18 = vsel %vm582_vm3, %v593_v15, %v595_v25  ;;  %v6509_v30 = vmul.u32.u64.low %v6482_v1, %v592_v39  ;;  %v6510_v47 = vmul.u32.u64.high %v6482_v1, %v592_v39, %v6509_v30 }
  0x8c   : > { %v588_v28 = vsel %vm582_vm3, %v585_v45, %v587_v24  ;;  %v6515_v29 = vmul.u32.u64.low %v6482_v1, %v596_v18  ;;  %v6516_v62 = vmul.u32.u64.high %v6482_v1, %v596_v18, %v6515_v29  ;;  %v5272_v34 = vadd.s32 4294967169, %v763_v13 }
  0x8d   : > { %v738_v12 = vsel %vm655_vm14, %v737_v36, %v736_v5  ;;  %v6522_v41 = vsel %vm6486_vm15, 0, %v740_v35  ;;  %v919_v43 = vadd.s32 %v6414_v33, %v6432_v63  ;;  %vm5279_vm5 = vcmp.lt.s32.totalorder %v5278_v26, 0  ;;  %v6557_v36 = vld [vmem:[%s5935_s30 + $0x8] sm:$0xff] }
  0x8e   : > { %v934_v56 = vsel %vm5279_vm5, 0, %v5278_v26  ;;  %v950_v48 = vsel %vm865_vm1, %v949_v37, %v6464_v50  ;;  %v759_v32 = vand.u32 2147483647, %v6478_v60  ;;  %v769_v52 = vadd.s32 1, %v5272_v34 }
  0x8f   : > { %v935_v54 = vsub.s32 32, %v934_v56  ;;  %v936_v55 = vshll.u32 %v6480_v61, %v934_v56  ;;  %v939_v0 = vsub.s32 4294967266, %v934_v56  ;;  %v604_v31 = vmul.u32 %v6482_v1, %v588_v28 }
  0x90   : > { %v741_v46 = vsel %vm6486_vm15, %v5956_v20, %v738_v12  ;;  %v746_v33 = vadd.s32 3, %v6522_v41  ;;  %vm606_vm6 = vc.u32 %v6516_v62, %v6509_v30  ;;  %v607_v63 = vadd.s32 1, %v6510_v47 }
  0x91   : > { %vm6541_vm7 = vcmp.le.f32.partialorder %v863_v58, 0.7853982  ;;  %v937_v61 = vshrl.u32 %v919_v43, %v935_v54  ;;  %v940_v19 = vadd.s32 127, %v939_v0  ;;  %vm770_vm8 = vcmp.gt.s32.totalorder %v769_v52, 0 }
  0x92   : > { %v6547_v1 = vsel %vm6541_vm7, 0, %v950_v48  ;;  %v608_v14 = vsel %vm606_vm6, %v607_v63, %v6510_v47  ;;  %v766_v5 = vand.u32 8388607, %v759_v32  ;;  %v771_v6 = vsel %vm770_vm8, %v769_v52, 0 }
  0x93   : > { %5686 = vcosq.f32 %v741_v46  ;;  %v938_v4 = vor.u32 %v937_v61, %v936_v55  ;;  %v941_v58 = vshll.u32 %v940_v19, 23  ;;  %v609_v7 = vadd.s32 %v608_v14, %v604_v31 }
  0x94   : > { %5688 = vsinq.f32 %v741_v46  ;;  %v6552_v38 = vand.u32 3, %v746_v33  ;;  %v773_v8 = vand.u32 31, %v771_v6  ;;  %v956_v16 = vadd.s32 3, %v6547_v1 }
  0x95   : > { %v942_v10 = vor.u32 4788187, %v941_v58  ;;  %v945_v9 = vcvt.s32.f32 %v938_v4  ;;  %v610_v35 = vadd.s32 536870912, %v609_v7  ;;  %v767_v11 = vor.u32 8388608, %v766_v5 }
  0x96   : > { %v774_v15 = vsub.s32 32, %v773_v8  ;;  %v776_v17 = vshll.u32 %v8309_v49, %v773_v8  ;;  %v6560_v22 = vmul.f32 8.0, %v6557_v36  ;;  %v779_v37 = vshll.u32 %v8307_v51, %v773_v8 }
  0x97   : > { %v943_v45 = vand.u32 2147483647, %v942_v10  ;;  %v6562_v24 = vshrl.u32 %v610_v35, 30  ;;  %v782_v39 = vshll.u32 %v8305_v53, %v773_v8  ;;  %v785_v18 = vshll.u32 %v8303_v57, %v773_v8 }
  0x98   : > { %8329 = vst [vmem:[#allocation7_spill] sm:$0xff] %v6560_v22  ;;  %v777_v25 = vshrl.u32 %v8307_v51, %v774_v15  ;;  %v780_v13 = vshrl.u32 %v8305_v53, %v774_v15  ;;  %v783_v26 = vshrl.u32 %v8303_v57, %v774_v15  ;;  %v772_v29 = vshrl.u32 %v771_v6, 5 }
  0x99   : > { %v946_v47 = vmul.f32 %v945_v9, %v943_v45  ;;  %v612_v28 = vshll.u32 %v6562_v24, 30  ;;  %v786_v34 = vshrl.u32 %v8296_v59, %v774_v15  ;;  %v6572_v12 = vand.u32 3, %v956_v16 }
  0x9a   : > { %v788_v43 = vshll.u32 %v8296_v59, %v773_v8  ;;  %v789_v56 = vshrl.u32 %v8312_v2, %v774_v15  ;;  %v6576_v48 = vshll.u32 %v767_v11, 8  ;;  %vm749_vm9 = vcmp.eq.s32.totalorder %v6552_v38, 0 }
  0x9b   : > { %v947_v52 = vxor.u32 2147483648, %v946_v47  ;;  %v6579_v54 = vsub.s32 %v609_v7, %v612_v28  ;;  %v775_v55 = vshrl.u32 %v8309_v49, %v774_v15  ;;  %v1076_v0 = vand.u32 2139095040, %v6560_v22 }
  0x9c   : > { %v778_v31 = vor.u32 %v777_v25, %v776_v17  ;;  %v781_v46 = vor.u32 %v780_v13, %v779_v37  ;;  %v784_v33 = vor.u32 %v783_v26, %v782_v39  ;;  %v787_v63 = vor.u32 %v786_v34, %v785_v18 }
  0x9d   : > { %v6583_v61 = vpop.eup %5686  ;;  %v948_v19 = vsel %vm865_vm1, %v947_v52, %v946_v47  ;;  %v615_v14 = vsub.s32 0, %v6579_v54  ;;  %vm791_vm10 = vcmp.lt.s32.totalorder %v772_v29, 1  ;;  %vm794_vm11 = vcmp.lt.s32.totalorder %v772_v29, 4 }
  0x9e   : > { %v6588_v5 = vpop.eup %5688  ;;  %vm748_vm12 = vcmp.lt.s32.totalorder %v6552_v38, 2  ;;  %v951_v6 = vsel %vm6541_vm7, %v6133_v44, %v948_v19  ;;  %v790_v4 = vor.u32 %v789_v56, %v788_v43  ;;  %vm793_vm13 = vcmp.lt.s32.totalorder %v772_v29, 3 }
  0x9f   : > { %v796_v58 = vsel %vm794_vm11, %v784_v33, 2102212464  ;;  %5690 = vcosq.f32 %v951_v6  ;;  %v5265_v7 = vmin.u32 %v615_v14, %v6579_v54  ;;  %v795_v8 = vsel %vm791_vm10, %v775_v55, %v778_v31 }
  0xa0   : > { %v797_v10 = vsel %vm793_vm13, %v781_v46, %v796_v58  ;;  %5692 = vsinq.f32 %v951_v6  ;;  %vm792_vm14 = vcmp.lt.s32.totalorder %v772_v29, 2  ;;  %v799_v9 = vsel %vm791_vm10, %v778_v31, %v781_v46 }
  0xa1   : > { %v800_v16 = vsel %vm794_vm11, %v787_v63, 920167782  ;;  %vm745_vm15 = vweird.f32 %v5956_v20  ;;  %vm752_vm0 = vcmp.eq.s32.totalorder %v6552_v38, 2  ;;  %v8292_v50 = vxor.u32 2147483648, %v6583_v61 }
  0xa2   : > { %v617_v35 = vclz %v5265_v7  ;;  %v803_v11 = vsel %vm791_vm10, %v781_v46, %v784_v33  ;;  %v8293_v15 = vxor.u32 2147483648, %v6588_v5  ;;  %v798_v17 = vsel %vm792_vm14, %v795_v8, %v797_v10 }
  0xa3   : > { %v801_v45 = vsel %vm793_vm13, %v784_v33, %v800_v16  ;;  %v804_v37 = vsel %vm794_vm11, %v790_v4, 1326507024  ;;  %vm958_vm1 = vcmp.lt.s32.totalorder %v6572_v12, 2  ;;  %v1077_v26 = vshrl.u32 %v1076_v0, 23 }
  0xa4   : > { %v5266_v39 = vadd.s32 4294967294, %v617_v35  ;;  %v802_v25 = vsel %vm792_vm14, %v799_v9, %v801_v45  ;;  %v805_v13 = vsel %vm793_vm13, %v787_v63, %v804_v37  ;;  %vm955_vm2 = vweird.f32 %v6133_v44 }
  0xa5   : > { %v605_v18 = vadd.s32 %v6509_v30, %v6516_v62  ;;  %v806_v47 = vsel %vm792_vm14, %v803_v11, %v805_v13  ;;  %v6616_v28 = vmul.u32.u64.low %v6576_v48, %v802_v25  ;;  %v6617_v34 = vmul.u32.u64.high %v6576_v48, %v802_v25, %v6616_v28 }
  0xa6   : > { %vm5267_vm3 = vcmp.lt.s32.totalorder %v5266_v39, 0  ;;  %v6621_v43 = vmul.u32.u64.low %v6576_v48, %v806_v47  ;;  %v6622_v56 = vmul.u32.u64.high %v6576_v48, %v806_v47, %v6621_v43  ;;  %v5284_v52 = vadd.s32 4294967169, %v1077_v26 }
  0xa7   : > { %v751_v55 = vsel %vm749_vm9, %v6583_v61, %v8293_v15  ;;  %v754_v30 = vsel %vm752_vm0, %v8292_v50, %v6588_v5  ;;  %v620_v62 = vsel %vm5267_vm3, 0, %v5266_v39  ;;  %v814_v29 = vmul.u32 %v6576_v48, %v798_v17 }
  0xa8   : > { %v621_v0 = vsub.s32 32, %v620_v62  ;;  %v622_v31 = vshll.u32 %v6579_v54, %v620_v62  ;;  %v625_v46 = vsub.s32 4294967266, %v620_v62  ;;  %v1083_v33 = vadd.s32 1, %v5284_v52 }
  0xa9   : > { %vm959_vm4 = vcmp.eq.s32.totalorder %v6572_v12, 0  ;;  %vm962_vm5 = vcmp.eq.s32.totalorder %v6572_v12, 2  ;;  %v817_v63 = vadd.s32 1, %v6617_v34  ;;  %v1073_v19 = vand.u32 2147483647, %v6560_v22  ;;  %v6640_v14 = vpop.eup %5690 }
  0xaa   : > { %v755_v6 = vsel %vm748_vm12, %v751_v55, %v754_v30  ;;  %v623_v4 = vshrl.u32 %v605_v18, %v621_v0  ;;  %v626_v48 = vadd.s32 127, %v625_v46  ;;  %vm816_vm6 = vc.u32 %v6622_v56, %v6616_v28  ;;  %v6646_v54 = vpop.eup %5692 }
  0xab   : > { %v8290_v58 = vxor.u32 2147483648, %v6640_v14  ;;  %v635_v7 = vsub.s32 4, %v6562_v24  ;;  %v818_v8 = vsel %vm816_vm6, %v817_v63, %v6617_v34  ;;  %vm1084_vm7 = vcmp.gt.s32.totalorder %v1083_v33, 0 }
  0xac   : > { %v8291_v10 = vxor.u32 2147483648, %v6646_v54  ;;  %v624_v9 = vor.u32 %v623_v4, %v622_v31  ;;  %v627_v16 = vshll.u32 %v626_v48, 23  ;;  %v819_v38 = vadd.s32 %v818_v8, %v814_v29 }
  0xad   : > { %v756_v35 = vsel %vm745_vm15, nan, %v755_v6  ;;  %v964_v11 = vsel %vm962_vm5, %v8290_v58, %v6646_v54  ;;  %v1080_v17 = vand.u32 8388607, %v1073_v19  ;;  %v1085_v45 = vsel %vm1084_vm7, %v1083_v33, 0 }
  0xae   : > { %v961_v37 = vsel %vm959_vm4, %v6640_v14, %v8291_v10  ;;  %v628_v39 = vor.u32 4788187, %v627_v16  ;;  %v631_v25 = vcvt.s32.f32 %v624_v9  ;;  %v820_v13 = vadd.s32 536870912, %v819_v38 }
  0xaf   : > { %v965_v26 = vsel %vm958_vm1, %v961_v37, %v964_v11  ;;  %vm6670_vm8 = vcmp.le.f32.partialorder %v549_v42, 0.7853982  ;;  %vm551_vm9 = vcmp.lt.s32.totalorder %v6284_v40, 0  ;;  %v1087_v47 = vand.u32 31, %v1085_v45 }
  0xb0   : > { %v966_v34 = vsel %vm955_vm2, nan, %v965_v26  ;;  %v629_v43 = vand.u32 2147483647, %v628_v39  ;;  %v636_v52 = vsel %vm551_vm9, %v635_v7, %v6562_v24  ;;  %v821_v55 = vshrl.u32 %v820_v13, 30 }
  0xb1   : > { %v2836_v12 = vpack.c.bf16 %v966_v34, %v756_v35  ;;  %v1081_v30 = vor.u32 8388608, %v1080_v17  ;;  %v1088_v62 = vsub.s32 32, %v1087_v47  ;;  %v6681_v42 = vmul.f32 16.0, %v6557_v36 }
  0xb2   : > { %v632_v29 = vmul.f32 %v631_v25, %v629_v43  ;;  %vm761_vm10 = vcmp.lt.s32.totalorder %v6478_v60, 0  ;;  %v822_v0 = vshll.u32 %v821_v55, 30  ;;  %v1090_v31 = vshll.u32 %v8309_v49, %v1087_v47 }
  0xb3   : > { %3209 = vmatprep.subr.bf16.mxu0 %v2836_v12  ;;  %5456 = vmatprep.subr.bf16.mxu1 %v2836_v12  ;;  %v6687_v46 = vsel %vm6670_vm8, 0, %v636_v52  ;;  %v1091_v24 = vshrl.u32 %v8307_v51, %v1088_v62  ;;  %v1093_v33 = vshll.u32 %v8307_v51, %v1087_v47  ;;  %v1094_v63 = vshrl.u32 %v8305_v53, %v1088_v62 }
  0xb4   : > { %v6692_v6 = vsub.s32 %v819_v38, %v822_v0  ;;  %v1086_v4 = vshrl.u32 %v1085_v45, 5  ;;  %v1096_v48 = vshll.u32 %v8305_v53, %v1087_v47  ;;  %v1097_v7 = vshrl.u32 %v8303_v57, %v1088_v62 }
  0xb5   : > { %v845_v8 = vsub.s32 4, %v821_v55  ;;  %v1099_v9 = vshll.u32 %v8303_v57, %v1087_v47  ;;  %v6697_v16 = vshll.u32 %v1081_v30, 8  ;;  %v1286_v35 = vand.u32 2139095040, %v6681_v42 }
  0xb6   : > { %v633_v11 = vxor.u32 2147483648, %v632_v29  ;;  %v825_v17 = vsub.s32 0, %v6692_v6  ;;  %v1089_v37 = vshrl.u32 %v8309_v49, %v1088_v62  ;;  %v1092_v39 = vor.u32 %v1091_v24, %v1090_v31 }
  0xb7   : > { %v1095_v38 = vor.u32 %v1094_v63, %v1093_v33  ;;  %v1100_v45 = vshrl.u32 %v8296_v59, %v1088_v62  ;;  %v1102_v25 = vshll.u32 %v8296_v59, %v1087_v47  ;;  %v1103_v13 = vshrl.u32 %v8312_v2, %v1088_v62 }
  0xb8   : > { %vm6707_vm11 = vcmp.le.f32.partialorder %v759_v32, 0.7853982  ;;  %v5273_v34 = vmin.u32 %v825_v17, %v6692_v6  ;;  %v1098_v43 = vor.u32 %v1097_v7, %v1096_v48  ;;  %vm1105_vm12 = vcmp.lt.s32.totalorder %v1086_v4, 1 }
  0xb9   : > { %v1283_v52 = vand.u32 2147483647, %v6681_v42  ;;  %v815_v12 = vadd.s32 %v6616_v28, %v6622_v56  ;;  %v1101_v30 = vor.u32 %v1100_v45, %v1099_v9  ;;  %v1104_v0 = vor.u32 %v1103_v13, %v1102_v25 }
  0xba   : > { %v1287_v47 = vshrl.u32 %v1286_v35, 23  ;;  %v634_v62 = vsel %vm551_vm9, %v633_v11, %v632_v29  ;;  %v827_v31 = vclz %v5273_v34  ;;  %v846_v32 = vsel %vm761_vm10, %v845_v8, %v821_v55 }
  0xbb   : > { %vm1107_vm13 = vcmp.lt.s32.totalorder %v1086_v4, 3  ;;  %vm1106_vm14 = vcmp.lt.s32.totalorder %v1086_v4, 2  ;;  %vm1108_vm0 = vcmp.lt.s32.totalorder %v1086_v4, 4  ;;  %v1109_v24 = vsel %vm1105_vm12, %v1089_v37, %v1092_v39 }
  0xbc   : > { %v1113_v33 = vsel %vm1105_vm12, %v1092_v39, %v1095_v38  ;;  %v5274_v63 = vadd.s32 4294967294, %v827_v31  ;;  %v1110_v48 = vsel %vm1108_vm0, %v1098_v43, 2102212464  ;;  %v1114_v28 = vsel %vm1108_vm0, %v1101_v30, 920167782 }
  0xbd   : > { %v1117_v56 = vsel %vm1105_vm12, %v1095_v38, %v1098_v43  ;;  %v1111_v7 = vsel %vm1107_vm13, %v1095_v38, %v1110_v48  ;;  %v1115_v29 = vsel %vm1107_vm13, %v1098_v43, %v1114_v28  ;;  %v1118_v9 = vsel %vm1108_vm0, %v1104_v0, 1326507024 }
  0xbe   : > { %v5292_v35 = vadd.s32 4294967169, %v1287_v47  ;;  %v637_v55 = vsel %vm6670_vm8, %v6284_v40, %v634_v62  ;;  %vm5275_vm1 = vcmp.lt.s32.totalorder %v5274_v63, 0  ;;  %v1116_v8 = vsel %vm1106_vm14, %v1113_v33, %v1115_v29 }
  0xbf   : > { %v1119_v11 = vsel %vm1107_vm13, %v1101_v30, %v1118_v9  ;;  %v830_v17 = vsel %vm5275_vm1, 0, %v5274_v63  ;;  %v6731_v39 = vmul.u32.u64.low %v6697_v16, %v1116_v8  ;;  %v6732_v45 = vmul.u32.u64.high %v6697_v16, %v1116_v8, %v6731_v39 }
  0xc0   : > { %v1120_v37 = vsel %vm1106_vm14, %v1117_v56, %v1119_v11  ;;  %v831_v38 = vsub.s32 32, %v830_v17  ;;  %v832_v25 = vshll.u32 %v6692_v6, %v830_v17  ;;  %v835_v13 = vsub.s32 4294967266, %v830_v17  ;;  %v3547_v11 = vld [vmem:[%s8278_s4 + $0x98] sm:$0xff] }
  0xc1   : > { %v1112_v18 = vsel %vm1106_vm14, %v1109_v24, %v1111_v7  ;;  %v6739_v34 = vsel %vm6707_vm11, 0, %v846_v32  ;;  %v6742_v43 = vmul.u32.u64.low %v6697_v16, %v1120_v37  ;;  %v6743_v30 = vmul.u32.u64.high %v6697_v16, %v1120_v37, %v6742_v43  ;;  %3657 = vperm.xlu1 %5565, %v3547_v11  }
  0xc2   : > { %v1293_v0 = vadd.s32 1, %v5292_v35  ;;  %v642_v47 = vadd.s32 3, %v6687_v46  ;;  %v833_v62 = vshrl.u32 %v815_v12, %v831_v38  ;;  %v836_v31 = vadd.s32 127, %v835_v13 }
  0xc3   : > { %v1290_v33 = vand.u32 8388607, %v1283_v52  ;;  %5694 = vcosq.f32 %v637_v55  ;;  %v1128_v6 = vmul.u32 %v6697_v16, %v1112_v18  ;;  %v1131_v4 = vadd.s32 1, %v6732_v45 }
  0xc4   : > { %vm1294_vm3 = vcmp.gt.s32.totalorder %v1293_v0, 0  ;;  %v834_v32 = vor.u32 %v833_v62, %v832_v25  ;;  %v837_v24 = vshll.u32 %v836_v31, 23  ;;  %v852_v63 = vadd.s32 3, %v6739_v34 }
  0xc5   : > { %v1295_v48 = vsel %vm1294_vm3, %v1293_v0, 0  ;;  %5696 = vsinq.f32 %v637_v55  ;;  %vm1130_vm4 = vc.u32 %v6743_v30, %v6731_v39  ;;  %v6753_v12 = vand.u32 3, %v642_v47 }
  0xc6   : > { %v838_v28 = vor.u32 4788187, %v837_v24  ;;  %v841_v56 = vcvt.s32.f32 %v834_v32  ;;  %v1132_v7 = vsel %vm1130_vm4, %v1131_v4, %v6732_v45  ;;  %v1297_v16 = vand.u32 31, %v1295_v48  ;;  %v3546_v45 = vld [vmem:[%s8278_s4 + $0x90] sm:$0xff] }
  0xc7   : > { %v1133_v29 = vadd.s32 %v1132_v7, %v1128_v6  ;;  %v6756_v35 = vand.u32 3, %v852_v63  ;;  %v1291_v8 = vor.u32 8388608, %v1290_v33  ;;  %v6761_v17 = vshrl.u32 %v1295_v48, 5  ;;  %3652 = vperm.xlu0 %5564, %v3546_v45  }
  0xc8   : > { %v839_v9 = vand.u32 2147483647, %v838_v28  ;;  %v1298_v37 = vsub.s32 32, %v1297_v16  ;;  %v1300_v38 = vshll.u32 %v8309_v49, %v1297_v16  ;;  %vm648_vm5 = vcmp.eq.s32.totalorder %v6753_v12, 2 }
  0xc9   : > { %v1134_v55 = vadd.s32 536870912, %v1133_v29  ;;  %v1303_v13 = vshll.u32 %v8307_v51, %v1297_v16  ;;  %v1306_v18 = vshll.u32 %v8305_v53, %v1297_v16  ;;  %v1309_v43 = vshll.u32 %v8303_v57, %v1297_v16 }
  0xca   : > { %v842_v25 = vmul.f32 %v841_v56, %v839_v9  ;;  %vm645_vm6 = vcmp.eq.s32.totalorder %v6753_v12, 0  ;;  %v1301_v47 = vshrl.u32 %v8307_v51, %v1298_v37  ;;  %v1304_v62 = vshrl.u32 %v8305_v53, %v1298_v37 }
  0xcb   : > { %v6772_v0 = vshrl.u32 %v1134_v55, 30  ;;  %v1312_v31 = vshll.u32 %v8296_v59, %v1297_v16  ;;  %v1307_v6 = vshrl.u32 %v8303_v57, %v1298_v37  ;;  %v1310_v4 = vshrl.u32 %v8296_v59, %v1298_v37 }
  0xcc   : > { %v843_v33 = vxor.u32 2147483648, %v842_v25  ;;  %v1313_v32 = vshrl.u32 %v8312_v2, %v1298_v37  ;;  %v1302_v48 = vor.u32 %v1301_v47, %v1300_v38  ;;  %vm1315_vm7 = vcmp.lt.s32.totalorder %v6761_v17, 1 }
  0xcd   : > { %v6780_v24 = vpop.eup %5694  ;;  %v1136_v63 = vshll.u32 %v6772_v0, 30  ;;  %v6784_v28 = vshll.u32 %v1291_v8, 8  ;;  %v1305_v7 = vor.u32 %v1304_v62, %v1303_v13  ;;  %v1308_v16 = vor.u32 %v1307_v6, %v1306_v18 }
  0xce   : > { %v844_v56 = vsel %vm761_vm10, %v843_v33, %v842_v25  ;;  %v1311_v9 = vor.u32 %v1310_v4, %v1309_v43  ;;  %v1314_v3 = vor.u32 %v1313_v32, %v1312_v31  ;;  %vm1318_vm8 = vcmp.lt.s32.totalorder %v6761_v17, 4 }
  0xcf   : > { %v6788_v11 = vpop.eup %5696  ;;  %v847_v55 = vsel %vm6707_vm11, %v6478_v60, %v844_v56  ;;  %v6793_v45 = vsub.s32 %v1133_v29, %v1136_v63  ;;  %v8288_v8 = vxor.u32 2147483648, %v6780_v24  ;;  %v1299_v38 = vshrl.u32 %v8309_v49, %v1298_v37 }
  0xd0   : > { %5698 = vcosq.f32 %v847_v55  ;;  %vm1317_vm9 = vcmp.lt.s32.totalorder %v6761_v17, 3  ;;  %vm1316_vm10 = vcmp.lt.s32.totalorder %v6761_v17, 2  ;;  %v1320_v26 = vsel %vm1318_vm8, %v1308_v16, 2102212464 }
  0xd1   : > { %5700 = vsinq.f32 %v847_v55  ;;  %v1139_v25 = vsub.s32 0, %v6793_v45  ;;  %v8289_v29 = vxor.u32 2147483648, %v6788_v11  ;;  %v1323_v13 = vsel %vm1315_vm7, %v1302_v48, %v1305_v7 }
  0xd2   : > { %v1324_v18 = vsel %vm1318_vm8, %v1311_v9, 920167782  ;;  %v6809_v37 = vmul.f32 8.0, %v6460_v21  ;;  %vm641_vm11 = vweird.f32 %v6284_v40  ;;  %v1327_v62 = vsel %vm1315_vm7, %v1305_v7, %v1308_v16  ;;  %v4835_v40 = vld [vmem:[%s8281_s7 + $0xc8] sm:$0xff] }
  0xd3   : > { %v5285_v43 = vmin.u32 %v1139_v25, %v6793_v45  ;;  %v1325_v47 = vsel %vm1317_vm9, %v1308_v16, %v1324_v18  ;;  %v1328_v31 = vsel %vm1318_vm8, %v1314_v3, 1326507024  ;;  %v1319_v33 = vsel %vm1315_vm7, %v1299_v38, %v1302_v48 }
  0xd4   : > { %v1321_v6 = vsel %vm1317_vm9, %v1305_v7, %v1320_v26  ;;  %v1326_v4 = vsel %vm1316_vm10, %v1323_v13, %v1325_v47  ;;  %v1329_v32 = vsel %vm1317_vm9, %v1311_v9, %v1328_v31  ;;  %vm644_vm12 = vcmp.lt.s32.totalorder %v6753_v12, 2 }
  0xd5   : > { %v650_v3 = vsel %vm648_vm5, %v8288_v8, %v6788_v11  ;;  %vm851_vm13 = vweird.f32 %v6478_v60  ;;  %vm854_vm14 = vcmp.lt.s32.totalorder %v6756_v35, 2  ;;  %v1141_v63 = vclz %v5285_v43 }
  0xd6   : > { %v647_v48 = vsel %vm645_vm6, %v6780_v24, %v8289_v29  ;;  %vm1075_vm0 = vcmp.lt.s32.totalorder %v6560_v22, 0  ;;  %v1330_v56 = vsel %vm1316_vm10, %v1327_v62, %v1329_v32  ;;  %v1322_v55 = vsel %vm1316_vm10, %v1319_v33, %v1321_v6 }
  0xd7   : > { %v6844_v7 = vmul.u32.u64.low %v6784_v28, %v1326_v4  ;;  %v6845_v16 = vmul.u32.u64.high %v6784_v28, %v1326_v4, %v6844_v7  ;;  %v5286_v9 = vadd.s32 4294967294, %v1141_v63  ;;  %vm855_vm1 = vcmp.eq.s32.totalorder %v6756_v35, 0 }
  0xd8   : > { %v6851_v38 = vmul.u32.u64.low %v6784_v28, %v1330_v56  ;;  %v6852_v25 = vmul.u32.u64.high %v6784_v28, %v1330_v56, %v6851_v38  ;;  %vm858_vm3 = vcmp.eq.s32.totalorder %v6756_v35, 2  ;;  %v972_v26 = vand.u32 2139095040, %v6809_v37 }
  0xd9   : > { %v6858_v13 = vmul.f32 16.0, %v6460_v21  ;;  %v651_v18 = vsel %vm644_vm12, %v647_v48, %v650_v3  ;;  %v1129_v17 = vadd.s32 %v6731_v39, %v6743_v30  ;;  %vm5287_vm4 = vcmp.lt.s32.totalorder %v5286_v9, 0 }
  0xda   : > { %v1159_v43 = vsub.s32 4, %v6772_v0  ;;  %v6865_v47 = vpop.eup %5698  ;;  %v1144_v62 = vsel %vm5287_vm4, 0, %v5286_v9  ;;  %v1338_v31 = vmul.u32 %v6784_v28, %v1322_v55  ;;  %v1341_v33 = vadd.s32 1, %v6845_v16 }
  0xdb   : > { %v973_v6 = vshrl.u32 %v972_v26, 23  ;;  %v6869_v4 = vpop.eup %5700  ;;  %v8286_v21 = vxor.u32 2147483648, %v6865_v47  ;;  %v1145_v12 = vsub.s32 32, %v1144_v62  ;;  %v1146_v32 = vshll.u32 %v6793_v45, %v1144_v62 }
  0xdc   : > { %v1149_v3 = vsub.s32 4294967266, %v1144_v62  ;;  %v8287_v39 = vxor.u32 2147483648, %v6869_v4  ;;  %vm1340_vm5 = vc.u32 %v6852_v25, %v6844_v7  ;;  %v8294_v30 = vand.u32 2147483647, %v6809_v37 }
  0xdd   : > { %v5280_v63 = vadd.s32 4294967169, %v973_v6  ;;  %v860_v28 = vsel %vm858_vm3, %v8286_v21, %v6869_v4  ;;  %v1147_v48 = vshrl.u32 %v1129_v17, %v1145_v12  ;;  %v1342_v9 = vsel %vm1340_vm5, %v1341_v33, %v6845_v16 }
  0xde   : > { %v1150_v56 = vadd.s32 127, %v1149_v3  ;;  %v652_v45 = vsel %vm641_vm11, nan, %v651_v18  ;;  %v857_v55 = vsel %vm855_vm1, %v6865_v47, %v8287_v39  ;;  %v1343_v38 = vadd.s32 %v1342_v9, %v1338_v31 }
  0xdf   : > { %v979_v26 = vadd.s32 1, %v5280_v63  ;;  %v861_v62 = vsel %vm854_vm14, %v857_v55, %v860_v28  ;;  %v1148_v6 = vor.u32 %v1147_v48, %v1146_v32  ;;  %v1160_v16 = vsel %vm1075_vm0, %v1159_v43, %v6772_v0 }
  0xe0   : > { %v1151_v21 = vshll.u32 %v1150_v56, 23  ;;  %v862_v18 = vsel %vm851_vm13, nan, %v861_v62  ;;  %v1344_v17 = vadd.s32 536870912, %v1343_v38  ;;  %v976_v33 = vand.u32 8388607, %v8294_v30 }
  0xe1   : > { %vm980_vm6 = vcmp.gt.s32.totalorder %v979_v26, 0  ;;  %v2835_v12 = vpack.c.bf16 %v862_v18, %v652_v45  ;;  %v1155_v3 = vcvt.s32.f32 %v1148_v6  ;;  %vm6903_vm7 = vcmp.le.f32.partialorder %v1073_v19, 0.7853982 }
  0xe2   : > { %v1152_v31 = vor.u32 4788187, %v1151_v21  ;;  %v981_v63 = vsel %vm980_vm6, %v979_v26, 0  ;;  %v6899_v35 = vshrl.u32 %v1344_v17, 30  ;;  %v6909_v28 = vsel %vm6903_vm7, 0, %v1160_v16 }
  0xe3   : > { %v983_v32 = vand.u32 31, %v981_v63  ;;  %3210 = vmatpush1.bf16.msra.mxu0 %v2835_v12  ;;  %5463 = vmatpush1.bf16.msra.mxu1 %v2835_v12  ;;  %v1182_v56 = vand.u32 2139095040, %v6858_v13  ;;  %v977_v45 = vor.u32 8388608, %v976_v33  ;;  %v982_v55 = vshrl.u32 %v981_v63, 5 }
  0xe4   : > { %v1153_v43 = vand.u32 2147483647, %v1152_v31  ;;  %v1346_v21 = vshll.u32 %v6899_v35, 30  ;;  %vm1285_vm8 = vcmp.lt.s32.totalorder %v6681_v42, 0  ;;  %v1369_v0 = vsub.s32 4, %v6899_v35 }
  0xe5   : > { %v984_v48 = vsub.s32 32, %v983_v32  ;;  %v986_v26 = vshll.u32 %v8309_v49, %v983_v32  ;;  %v989_v6 = vshll.u32 %v8307_v51, %v983_v32  ;;  %v992_v18 = vshll.u32 %v8305_v53, %v983_v32 }
  0xe6   : > { %v1156_v9 = vmul.f32 %v1155_v3, %v1153_v43  ;;  %v6914_v62 = vsub.s32 %v1343_v38, %v1346_v21  ;;  %v995_v31 = vshll.u32 %v8303_v57, %v983_v32  ;;  %v8295_v38 = vand.u32 2147483647, %v6858_v13 }
  0xe7   : > { %v987_v19 = vshrl.u32 %v8307_v51, %v984_v48  ;;  %v990_v17 = vshrl.u32 %v8305_v53, %v984_v48  ;;  %v993_v12 = vshrl.u32 %v8303_v57, %v984_v48  ;;  %v996_v3 = vshrl.u32 %v8296_v59, %v984_v48 }
  0xe8   : > { %v1157_v16 = vxor.u32 2147483648, %v1156_v9  ;;  %v1349_v33 = vsub.s32 0, %v6914_v62  ;;  %v1183_v63 = vshrl.u32 %v1182_v56, 23  ;;  %v1339_v21 = vadd.s32 %v6844_v7, %v6852_v25 }
  0xe9   : > { %v998_v39 = vshll.u32 %v8296_v59, %v983_v32  ;;  %v6930_v8 = vshll.u32 %v977_v45, 8  ;;  %v985_v58 = vshrl.u32 %v8309_v49, %v984_v48  ;;  %v988_v10 = vor.u32 %v987_v19, %v986_v26 }
  0xea   : > { %v1158_v43 = vsel %vm1075_vm0, %v1157_v16, %v1156_v9  ;;  %v5293_v29 = vmin.u32 %v1349_v33, %v6914_v62  ;;  %v991_v50 = vor.u32 %v990_v17, %v989_v6  ;;  %v994_v15 = vor.u32 %v993_v12, %v992_v18 }
  0xeb   : > { %v997_v56 = vor.u32 %v996_v3, %v995_v31  ;;  %v999_v30 = vshrl.u32 %v8312_v2, %v984_v48  ;;  %vm1001_vm9 = vcmp.lt.s32.totalorder %v982_v55, 1  ;;  %v1161_v7 = vsel %vm6903_vm7, %v6560_v22, %v1158_v43 }
  0xec   : > { %v1351_v25 = vclz %v5293_v29  ;;  %v5288_v32 = vadd.s32 4294967169, %v1183_v63  ;;  %v1186_v9 = vand.u32 8388607, %v8295_v38  ;;  %vm1002_vm10 = vcmp.lt.s32.totalorder %v982_v55, 2 }
  0xed   : > { %v1000_v45 = vor.u32 %v999_v30, %v998_v39  ;;  %vm1003_vm12 = vcmp.lt.s32.totalorder %v982_v55, 3  ;;  %vm1004_vm14 = vcmp.lt.s32.totalorder %v982_v55, 4  ;;  %v1005_v19 = vsel %vm1001_vm9, %v985_v58, %v988_v10 }
  0xee   : > { %v5294_v26 = vadd.s32 4294967294, %v1351_v25  ;;  %v1006_v6 = vsel %vm1004_vm14, %v994_v15, 2102212464  ;;  %v1009_v18 = vsel %vm1001_vm9, %v988_v10, %v991_v50  ;;  %v1010_v48 = vsel %vm1004_vm14, %v997_v56, 920167782 }
  0xef   : > { %v1007_v16 = vsel %vm1003_vm12, %v991_v50, %v1006_v6  ;;  %v1013_v17 = vsel %vm1001_vm9, %v991_v50, %v994_v15  ;;  %v1014_v12 = vsel %vm1004_vm14, %v1000_v45, 1326507024  ;;  %v1011_v29 = vsel %vm1003_vm12, %v994_v15, %v1010_v48 }
  0xf0   : > { %vm5295_vm0 = vcmp.lt.s32.totalorder %v5294_v26, 0  ;;  %v1015_v31 = vsel %vm1003_vm12, %v997_v56, %v1014_v12  ;;  %5702 = vcosq.f32 %v1161_v7  ;;  %v1012_v39 = vsel %vm1002_vm10, %v1009_v18, %v1011_v29 }
  0xf1   : > { %v1354_v33 = vsel %vm5295_vm0, 0, %v5294_v26  ;;  %v1016_v30 = vsel %vm1002_vm10, %v1013_v17, %v1015_v31  ;;  %v1008_v10 = vsel %vm1002_vm10, %v1005_v19, %v1007_v16  ;;  %v1370_v26 = vsel %vm1285_vm8, %v1369_v0, %v6899_v35 }
  0xf2   : > { %v1355_v3 = vsub.s32 32, %v1354_v33  ;;  %v1356_v58 = vshll.u32 %v6914_v62, %v1354_v33  ;;  %v1359_v63 = vsub.s32 4294967266, %v1354_v33  ;;  %v1189_v6 = vadd.s32 1, %v5288_v32 }
  0xf3   : > { %v6947_v50 = vmul.u32.u64.low %v6930_v8, %v1016_v30  ;;  %v6948_v43 = vmul.u32.u64.high %v6930_v8, %v1016_v30, %v6947_v50  ;;  %v6951_v25 = vmul.u32.u64.low %v6930_v8, %v1012_v39  ;;  %v6952_v15 = vmul.u32.u64.high %v6930_v8, %v1012_v39, %v6951_v25 }
  0xf4   : > { %v1357_v56 = vshrl.u32 %v1339_v21, %v1355_v3  ;;  %v1360_v45 = vadd.s32 127, %v1359_v63  ;;  %5704 = vsinq.f32 %v1161_v7  ;;  %v1166_v55 = vadd.s32 3, %v6909_v28 }
  0xf5   : > { %vm6961_vm1 = vcmp.le.f32.partialorder %v1283_v52, 0.7853982  ;;  %v1024_v16 = vmul.u32 %v6930_v8, %v1008_v10  ;;  %vm1190_vm3 = vcmp.gt.s32.totalorder %v1189_v6, 0  ;;  %vm1026_vm4 = vc.u32 %v6948_v43, %v6951_v25 }
  0xf6   : > { %v1358_v19 = vor.u32 %v1357_v56, %v1356_v58  ;;  %v1361_v18 = vshll.u32 %v1360_v45, 23  ;;  %v6968_v21 = vsel %vm6961_vm1, 0, %v1370_v26  ;;  %v1027_v35 = vadd.s32 1, %v6952_v15 }
  0xf7   : > { %v1187_v7 = vor.u32 8388608, %v1186_v9  ;;  %v1191_v48 = vsel %vm1190_vm3, %v1189_v6, 0  ;;  %v6973_v17 = vand.u32 3, %v1166_v55  ;;  %v6977_v29 = vadd.s32 3, %v6968_v21 }
  0xf8   : > { %v1362_v32 = vor.u32 4788187, %v1361_v18  ;;  %v1365_v52 = vcvt.s32.f32 %v1358_v19  ;;  %v1028_v12 = vsel %vm1026_vm4, %v1027_v35, %v6952_v15  ;;  %v1193_v0 = vand.u32 31, %v1191_v48 }
  0xf9   : > { %v1029_v31 = vadd.s32 %v1028_v12, %v1024_v16  ;;  %v6980_v33 = vmul.f32 32.0, %v6557_v36  ;;  %v6984_v30 = vshrl.u32 %v1191_v48, 5  ;;  %v6987_v58 = vshll.u32 %v1187_v7, 8 }
  0xfa   : > { %v1363_v8 = vand.u32 2147483647, %v1362_v32  ;;  %v6982_v39 = vpop.eup %5702  ;;  %v1194_v9 = vsub.s32 32, %v1193_v0  ;;  %v1196_v3 = vshll.u32 %v8309_v49, %v1193_v0  ;;  %v1199_v50 = vshll.u32 %v8307_v51, %v1193_v0 }
  0xfb   : > { %v1030_v10 = vadd.s32 536870912, %v1029_v31  ;;  %v1202_v15 = vshll.u32 %v8305_v53, %v1193_v0  ;;  %vm1169_vm5 = vcmp.eq.s32.totalorder %v6973_v17, 0  ;;  %vm1172_vm6 = vcmp.eq.s32.totalorder %v6973_v17, 2 }
  0xfc   : > { %v1366_v63 = vmul.f32 %v1365_v52, %v1363_v8  ;;  %v1197_v36 = vshrl.u32 %v8307_v51, %v1194_v9  ;;  %v1200_v56 = vshrl.u32 %v8305_v53, %v1194_v9  ;;  %v1203_v45 = vshrl.u32 %v8303_v57, %v1194_v9 }
  0xfd   : > { %v1205_v26 = vshll.u32 %v8303_v57, %v1193_v0  ;;  %v6997_v55 = vshrl.u32 %v1030_v10, 30  ;;  %v1206_v19 = vshrl.u32 %v8296_v59, %v1194_v9  ;;  %v1208_v18 = vshll.u32 %v8296_v59, %v1193_v0 }
  0xfe   : > { %v1367_v6 = vxor.u32 2147483648, %v1366_v63  ;;  %v7001_v16 = vpop.eup %5704  ;;  %v8298_v35 = vxor.u32 2147483648, %v6982_v39  ;;  %v1195_v7 = vshrl.u32 %v8309_v49, %v1194_v9  ;;  %v1209_v32 = vshrl.u32 %v8312_v2, %v1194_v9  ;;  %v3549_v9 = vld [vmem:[%s8278_s4 + $0xa8] sm:$0xff] }
  0xff   : > { %v1496_v52 = vand.u32 2139095040, %v6980_v33  ;;  %v1032_v12 = vshll.u32 %v6997_v55, 30  ;;  %v1198_v8 = vor.u32 %v1197_v36, %v1196_v3  ;;  %v1201_v10 = vor.u32 %v1200_v56, %v1199_v50  ;;  %3667 = vperm.xlu1 %5565, %v3549_v9  }
 0x100   : > { %v1368_v48 = vsel %vm1285_vm8, %v1367_v6, %v1366_v63  ;;  %v1207_v38 = vor.u32 %v1206_v19, %v1205_v26  ;;  %v1210_v59 = vor.u32 %v1209_v32, %v1208_v18  ;;  %vm1211_vm7 = vcmp.lt.s32.totalorder %v6984_v30, 1  ;;  %v3548_v63 = vld [vmem:[%s8278_s4 + $0xa0] sm:$0xff]  ;;  %v3551_v18 = vld [vmem:[%s8278_s4 + $0xb8] sm:$0xff]  ;;  %v3550_v32 = vld [vmem:[%s8278_s4 + $0xb0] sm:$0xff] }
 0x101   : > { %v1371_v0 = vsel %vm6961_vm1, %v6681_v42, %v1368_v48  ;;  %v8299_v6 = vxor.u32 2147483648, %v7001_v16  ;;  %v7021_v3 = vsub.s32 %v1029_v31, %v1032_v12  ;;  %v1204_v50 = vor.u32 %v1203_v45, %v1202_v15  ;;  %3662 = vperm.xlu0 %5564, %v3548_v63  }
 0x102   : > { %5706 = vcosq.f32 %v1371_v0  ;;  %vm1213_vm8 = vcmp.lt.s32.totalorder %v6984_v30, 3  ;;  %vm1214_vm9 = vcmp.lt.s32.totalorder %v6984_v30, 4  ;;  %v1497_v62 = vshrl.u32 %v1496_v52, 23 }
 0x103   : > { %5708 = vsinq.f32 %v1371_v0  ;;  %vm8317_vm10 = vweird.f32 %v6560_v22  ;;  %v1035_v36 = vsub.s32 0, %v7021_v3  ;;  %vm1212_vm12 = vcmp.lt.s32.totalorder %v6984_v30, 2  ;;  %3677 = vperm.xlu1 %5565, %v3551_v18  }
 0x104   : > { %v1216_v56 = vsel %vm1214_vm9, %v1204_v50, 2102212464  ;;  %v1219_v31 = vsel %vm1211_vm7, %v1198_v8, %v1201_v10  ;;  %v1215_v15 = vsel %vm1211_vm7, %v1195_v7, %v1198_v8  ;;  %v1220_v26 = vsel %vm1214_vm9, %v1207_v38, 920167782 }
 0x105   : > { %v1217_v45 = vsel %vm1213_vm8, %v1201_v10, %v1216_v56  ;;  %v1224_v19 = vsel %vm1214_vm9, %v1210_v59, 1326507024  ;;  %vm1168_vm14 = vcmp.lt.s32.totalorder %v6973_v17, 2  ;;  %v5281_v52 = vmin.u32 %v1035_v36, %v7021_v3  ;;  %3672 = vperm.xlu0 %5564, %v3550_v32   ;;  %v3553_v56 = vld [vmem:[%s8278_s4 + $0xc8] sm:$0xff] }
 0x106   : > { %v1221_v7 = vsel %vm1213_vm8, %v1204_v50, %v1220_v26  ;;  %v1223_v48 = vsel %vm1211_vm7, %v1201_v10, %v1204_v50  ;;  %v1377_v59 = vand.u32 3, %v6977_v29  ;;  %v1225_v8 = vsel %vm1213_vm8, %v1207_v38, %v1224_v19 }
 0x107   : > { %v1222_v12 = vsel %vm1212_vm12, %v1219_v31, %v1221_v7  ;;  %v5300_v0 = vadd.s32 4294967169, %v1497_v62  ;;  %v1171_v9 = vsel %vm1169_vm5, %v6982_v39, %v8299_v6  ;;  %v1174_v10 = vsel %vm1172_vm6, %v8298_v35, %v7001_v16  ;;  %v3552_v31 = vld [vmem:[%s8278_s4 + $0xc0] sm:$0xff]  ;;  %3687 = vperm.xlu1 %5565, %v3553_v56  }
 0x108   : > { %v1037_v29 = vclz %v5281_v52  ;;  %v8302_v63 = vand.u32 2147483647, %v6980_v33  ;;  %v1218_v50 = vsel %vm1212_vm12, %v1215_v15, %v1217_v45  ;;  %v1226_v38 = vsel %vm1212_vm12, %v1223_v48, %v1225_v8 }
 0x109   : > { %v7067_v62 = vmul.u32.u64.low %v6987_v58, %v1222_v12  ;;  %v7068_v36 = vmul.u32.u64.high %v6987_v58, %v1222_v12, %v7067_v62  ;;  %v7078_v19 = vmul.u32.u64.low %v6987_v58, %v1226_v38  ;;  %v7079_v15 = vmul.u32.u64.high %v6987_v58, %v1226_v38, %v7078_v19  ;;  %3682 = vperm.xlu0 %5564, %v3552_v31  }
 0x10a   : > { %v5282_v26 = vadd.s32 4294967294, %v1037_v29  ;;  %v1503_v30 = vadd.s32 1, %v5300_v0  ;;  %vm1378_vm0 = vcmp.lt.s32.totalorder %v1377_v59, 2  ;;  %vm1379_vm1 = vcmp.eq.s32.totalorder %v1377_v59, 0  ;;  %v3556_v19 = vld [vmem:[%s8278_s4 + $0xe0] sm:$0xff] }
 0x10b   : > { %vm1382_vm3 = vcmp.eq.s32.totalorder %v1377_v59, 2  ;;  %v1025_v45 = vadd.s32 %v6951_v25, %v6948_v43  ;;  %v1175_v32 = vsel %vm1168_vm14, %v1171_v9, %v1174_v10  ;;  %v1234_v52 = vmul.u32 %v6987_v58, %v1218_v50  ;;  %v3555_v43 = vld [vmem:[%s8278_s4 + $0xd8] sm:$0xff]  ;;  %v3554_v25 = vld [vmem:[%s8278_s4 + $0xd0] sm:$0xff] }
 0x10c   : > { %v7083_v18 = vpop.eup %5706  ;;  %vm5283_vm4 = vcmp.lt.s32.totalorder %v5282_v26, 0  ;;  %vm1504_vm5 = vcmp.gt.s32.totalorder %v1503_v30, 0  ;;  %v1237_v8 = vadd.s32 1, %v7068_v36  ;;  %3697 = vperm.xlu1 %5565, %v3555_v43   ;;  %v1176_v29 = vsel %vm8317_vm10, nan, %v1175_v32  ;;  %v3559_v59 = vld [vmem:[%s8278_s4 + $0xf8] sm:$0xff] }
 0x10d   : > { %v7088_v7 = vpop.eup %5708  ;;  %v8300_v48 = vxor.u32 2147483648, %v7083_v18  ;;  %v1040_v12 = vsel %vm5283_vm4, 0, %v5282_v26  ;;  %v1505_v0 = vsel %vm1504_vm5, %v1503_v30, 0  ;;  %3692 = vperm.xlu0 %5564, %v3554_v25   ;;  %vm1375_vm6 = vweird.f32 %v6681_v42  ;;  %v3557_v26 = vld [vmem:[%s8278_s4 + $0xe8] sm:$0xff]  ;;  %v4813_v42 = vld [vmem:[%s8281_s7 + $0x18] sm:$0xff] }
 0x10e   : > { %v8301_v17 = vxor.u32 2147483648, %v7088_v7  ;;  %v1041_v58 = vsub.s32 32, %v1040_v12  ;;  %v1042_v9 = vshll.u32 %v7021_v3, %v1040_v12  ;;  %v1045_v10 = vsub.s32 4294967266, %v1040_v12 }
 0x10f   : > { %v1384_v50 = vsel %vm1382_vm3, %v8300_v48, %v7088_v7  ;;  %vm1236_vm7 = vc.u32 %v7079_v15, %v7067_v62  ;;  %v1507_v12 = vand.u32 31, %v1505_v0  ;;  %vm971_vm9 = vcmp.lt.s32.totalorder %v6809_v37, 0 }
 0x110   : > { %v1381_v3 = vsel %vm1379_vm1, %v7083_v18, %v8301_v17  ;;  %v1043_v38 = vshrl.u32 %v1025_v45, %v1041_v58  ;;  %v1046_v56 = vadd.s32 127, %v1045_v10  ;;  %v1238_v31 = vsel %vm1236_vm7, %v1237_v8, %v7068_v36  ;;  %3707 = vperm.xlu1 %5565, %v3557_v26  }
 0x111   : > { %v1385_v30 = vsel %vm1378_vm0, %v1381_v3, %v1384_v50  ;;  %v1239_v32 = vadd.s32 %v1238_v31, %v1234_v52  ;;  %v1500_v36 = vand.u32 8388607, %v8302_v63  ;;  %3702 = vperm.xlu0 %5564, %v3556_v19   ;;  %v7125_v10 = vshrl.u32 %v1505_v0, 5  ;;  %v3558_v52 = vld [vmem:[%s8278_s4 + $0xf0] sm:$0xff] }
 0x112   : > { %v1386_v43 = vsel %vm1375_vm6, nan, %v1385_v30  ;;  %v1044_v25 = vor.u32 %v1043_v38, %v1042_v9  ;;  %v1047_v45 = vshll.u32 %v1046_v56, 23  ;;  %v1508_v35 = vsub.s32 32, %v1507_v12 }
 0x113   : > { %v2838_v8 = vpack.c.bf16 %v1386_v43, %v1176_v29  ;;  %v1240_v58 = vadd.s32 536870912, %v1239_v32  ;;  %v1510_v3 = vshll.u32 %v8309_v49, %v1507_v12  ;;  %v1513_v38 = vshll.u32 %v8307_v51, %v1507_v12  ;;  %v4207_v29 = vld [vmem:[%s8280_s6 + $0x30] sm:$0xff] }
 0x114   : > { %v1048_v9 = vor.u32 4788187, %v1047_v45  ;;  %v1051_v50 = vcvt.s32.f32 %v1044_v25  ;;  %v8338_v0 = vand.u32 2147483647, %v6809_v37  ;;  %v1511_v31 = vshrl.u32 %v8307_v51, %v1508_v35  ;;  %3717 = vperm.xlu1 %5565, %v3559_v59   ;;  %v4201_v59 = vld [vmem:[%s8280_s6] sm:$0xff] }
 0x115   : > { %3211 = vmatprep.subr.bf16.mxu0 %v2838_v8  ;;  %5457 = vmatprep.subr.bf16.mxu1 %v2838_v8  ;;  %v7141_v56 = vshrl.u32 %v1240_v58, 30  ;;  %v1514_v26 = vshrl.u32 %v8305_v53, %v1508_v35  ;;  %v1516_v19 = vshll.u32 %v8305_v53, %v1507_v12  ;;  %v1517_v43 = vshrl.u32 %v8303_v57, %v1508_v35 }
 0x116   : > { %vm7137_vm8 = vcmp.le.f32.partialorder %v8338_v0, 0.7853982  ;;  %v1049_v30 = vand.u32 2147483647, %v1048_v9  ;;  %v1519_v25 = vshll.u32 %v8303_v57, %v1507_v12  ;;  %v8341_v45 = vmov 920167782   ;;  %3712 = vperm.xlu0 %5564, %v3558_v52  }
 0x117   : > { %v1520_v8 = vshrl.u32 %v8341_v45, %v1508_v35  ;;  %v1242_v58 = vshll.u32 %v7141_v56, 30  ;;  %v1501_v0 = vor.u32 8388608, %v1500_v36  ;;  %v1509_v6 = vshrl.u32 %v8309_v49, %v1508_v35  ;;  %v4202_v57 = vld [vmem:[%s8280_s6 + $0x8] sm:$0xff] }
 0x118   : > { %v1052_v48 = vmul.f32 %v1051_v50, %v1049_v30  ;;  %v1512_v17 = vor.u32 %v1511_v31, %v1510_v3  ;;  %v1522_v9 = vshll.u32 %v8341_v45, %v1507_v12  ;;  %v1515_v53 = vor.u32 %v1514_v26, %v1513_v38  ;;  %4240 = vperm.xlu1 %5565, %v4202_v57   ;;  %v4203_v38 = vld [vmem:[%s8280_s6 + $0x10] sm:$0xff] }
 0x119   : > { %v1521_v63 = vor.u32 %v1520_v8, %v1519_v25  ;;  %v7159_v52 = vsub.s32 %v1239_v32, %v1242_v58  ;;  %v1518_v51 = vor.u32 %v1517_v43, %v1516_v19  ;;  %v1523_v36 = vshrl.u32 %v8312_v2, %v1508_v35  ;;  %v4204_v35 = vld [vmem:[%s8280_s6 + $0x18] sm:$0xff] }
 0x11a   : > { %v1053_v49 = vxor.u32 2147483648, %v1052_v48  ;;  %v1055_v50 = vsub.s32 4, %v6997_v55  ;;  %vm1525_vm12 = vcmp.lt.s32.totalorder %v7125_v10, 1  ;;  %vm1528_vm14 = vcmp.lt.s32.totalorder %v7125_v10, 4  ;;  %4235 = vperm.xlu0 %5564, %v4201_v59  }
 0x11b   : > { %v1245_v12 = vsub.s32 0, %v7159_v52  ;;  %v1524_v3 = vor.u32 %v1523_v36, %v1522_v9  ;;  %vm1527_vm0 = vcmp.lt.s32.totalorder %v7125_v10, 3  ;;  %v1530_v32 = vsel %vm1528_vm14, %v1518_v51, 2102212464  ;;  %v4205_v36 = vld [vmem:[%s8280_s6 + $0x20] sm:$0xff] }
 0x11c   : > { %vm1526_vm1 = vcmp.lt.s32.totalorder %v7125_v10, 2  ;;  %v1529_v57 = vsel %vm1525_vm12, %v1509_v6, %v1512_v17  ;;  %v1534_v31 = vsel %vm1528_vm14, %v1521_v63, 920167782  ;;  %v1541_v26 = vshll.u32 %v1501_v0, 8  ;;  %4250 = vperm.xlu1 %5565, %v4204_v35   ;;  %v5728_v0 = vld [vmem:[%s5935_s30] sm:$0xff]  ;;  %s5176_s30 = scalar_lea.sflag [#allocation4], %s326_s23 }
 0x11d   : > { %v1054_v19 = vsel %vm971_vm9, %v1053_v49, %v1052_v48  ;;  %v5289_v30 = vmin.u32 %v1245_v12, %v7159_v52  ;;  %v1531_v43 = vsel %vm1527_vm0, %v1515_v53, %v1530_v32  ;;  %v1533_v25 = vsel %vm1525_vm12, %v1512_v17, %v1515_v53 }
 0x11e   : > { %v1535_v8 = vsel %vm1527_vm0, %v1518_v51, %v1534_v31  ;;  %v1537_v6 = vsel %vm1525_vm12, %v1515_v53, %v1518_v51  ;;  %v1538_v58 = vsel %vm1528_vm14, %v1524_v3, 1326507024  ;;  %4245 = vperm.xlu0 %5564, %v4203_v38   ;;  %v1056_v49 = vsel %vm971_vm9, %v1055_v50, %v6997_v55  ;;  %v4206_v55 = vld [vmem:[%s8280_s6 + $0x28] sm:$0xff]  ;;  %v4208_v31 = vld [vmem:[%s8280_s6 + $0x38] sm:$0xff] }
 0x11f   : > { %v1247_v48 = vclz %v5289_v30  ;;  %v7197_v9 = vmul.f32 32.0, %v5728_v0  ;;  %v1057_v17 = vsel %vm7137_vm8, %v6809_v37, %v1054_v19  ;;  %v1532_v51 = vsel %vm1526_vm1, %v1529_v57, %v1531_v43 }
 0x120   : > { %v1536_v53 = vsel %vm1526_vm1, %v1533_v25, %v1535_v8  ;;  %v1539_v59 = vsel %vm1527_vm0, %v1521_v63, %v1538_v58  ;;  %v7222_v35 = vsel %vm7137_vm8, 0, %v1056_v49  ;;  %4260 = vperm.xlu1 %5565, %v4206_v55   ;;  %5710 = vcosq.f32 %v1057_v17 }
 0x121   : > { %v5290_v50 = vadd.s32 4294967294, %v1247_v48  ;;  %v1540_v12 = vsel %vm1526_vm1, %v1537_v6, %v1539_v59  ;;  %v7216_v3 = vmul.u32.u64.low %v1541_v26, %v1536_v53  ;;  %v7217_v32 = vmul.u32.u64.high %v1541_v26, %v1536_v53, %v7216_v3  ;;  %v4209_v53 = vld [vmem:[%s8280_s6 + $0x40] sm:$0xff] }
 0x122   : > { %v7224_v63 = vmul.u32.u64.low %v1541_v26, %v1540_v12  ;;  %v7225_v38 = vmul.u32.u64.high %v1541_v26, %v1540_v12, %v7224_v63  ;;  %4255 = vperm.xlu0 %5564, %v4205_v36   ;;  %v1235_v57 = vadd.s32 %v7067_v62, %v7079_v15  ;;  %v1392_v10 = vand.u32 2139095040, %v7197_v9 }
 0x123   : > { %vm5291_vm3 = vcmp.lt.s32.totalorder %v5290_v50, 0  ;;  %5712 = vsinq.f32 %v1057_v17  ;;  %v1265_v30 = vsub.s32 4, %v7141_v56  ;;  %v1548_v43 = vmul.u32 %v1541_v26, %v1532_v51  ;;  %v4210_v51 = vld [vmem:[%s8280_s6 + $0x48] sm:$0xff] }
 0x124   : > { %v1250_v19 = vsel %vm5291_vm3, 0, %v5290_v50  ;;  %v1551_v15 = vadd.s32 1, %v7217_v32  ;;  %vm1550_vm4 = vc.u32 %v7225_v38, %v7216_v3  ;;  %v1393_v6 = vshrl.u32 %v1392_v10, 23  ;;  %4270 = vperm.xlu1 %5565, %v4208_v31   ;;  %v4212_v10 = vld [vmem:[%s8280_s6 + $0x58] sm:$0xff]  ;;  %v4211_v31 = vld [vmem:[%s8280_s6 + $0x50] sm:$0xff] }
 0x125   : > { %v1251_v25 = vsub.s32 32, %v1250_v19  ;;  %v1252_v8 = vshll.u32 %v7159_v52, %v1250_v19  ;;  %v1255_v62 = vsub.s32 4294967266, %v1250_v19  ;;  %vm1181_vm5 = vcmp.lt.s32.totalorder %v6858_v13, 0 }
 0x126   : > { %4265 = vperm.xlu0 %5564, %v4207_v29   ;;  %v1552_v48 = vsel %vm1550_vm4, %v1551_v15, %v7217_v32  ;;  %v1062_v26 = vadd.s32 3, %v7222_v35  ;;  %v1266_v52 = vsel %vm1181_vm5, %v1265_v30, %v7141_v56  ;;  %v5296_v17 = vadd.s32 4294967169, %v1393_v6 }
 0x127   : > { %v1253_v58 = vshrl.u32 %v1235_v57, %v1251_v25  ;;  %v1256_v49 = vadd.s32 127, %v1255_v62  ;;  %v1553_v0 = vadd.s32 %v1552_v48, %v1548_v43  ;;  %v8342_v36 = vand.u32 2147483647, %v6858_v13 }
 0x128   : > { %v1399_v56 = vadd.s32 1, %v5296_v17  ;;  %4280 = vperm.xlu1 %5565, %v4210_v51   ;;  %v7269_v29 = vand.u32 3, %v1062_v26  ;;  %v8311_v25 = vand.u32 2147483647, %v7197_v9  ;;  %v4214_v26 = vld [vmem:[%s8280_s6 + $0x68] sm:$0xff]  ;;  %vm1061_vm3 = vweird.f32 %v6809_v37 }
 0x129   : > { %v1254_v59 = vor.u32 %v1253_v58, %v1252_v8  ;;  %v1257_v55 = vshll.u32 %v1256_v49, 23  ;;  %vm7255_vm7 = vcmp.le.f32.partialorder %v8342_v36, 0.7853982  ;;  %v1554_v12 = vadd.s32 536870912, %v1553_v0 }
 0x12a   : > { %4275 = vperm.xlu0 %5564, %v4209_v53   ;;  %v7261_v57 = vsel %vm7255_vm7, 0, %v1266_v52  ;;  %vm1400_vm8 = vcmp.gt.s32.totalorder %v1399_v56, 0  ;;  %v7273_v30 = vpop.eup %5710  ;;  %vm1065_vm9 = vcmp.eq.s32.totalorder %v7269_v29, 0  ;;  %v4213_v52 = vld [vmem:[%s8280_s6 + $0x60] sm:$0xff]  ;;  %vm1068_vm12 = vcmp.eq.s32.totalorder %v7269_v29, 2 }
 0x12b   : > { %v1258_v32 = vor.u32 4788187, %v1257_v55  ;;  %v1261_v63 = vcvt.s32.f32 %v1254_v59  ;;  %v7271_v19 = vshrl.u32 %v1554_v12, 30  ;;  %v1401_v8 = vsel %vm1400_vm8, %v1399_v56, 0 }
 0x12c   : > { %v1272_v15 = vadd.s32 3, %v7261_v57  ;;  %4290 = vperm.xlu1 %5565, %v4212_v10   ;;  %v1403_v49 = vand.u32 31, %v1401_v8  ;;  %v7292_v51 = vand.u32 8388607, %v8311_v25  ;;  %v7301_v56 = vshrl.u32 %v1401_v8, 5 }
 0x12d   : > { %v1259_v43 = vand.u32 2147483647, %v1258_v32  ;;  %v7276_v62 = vpop.eup %5712  ;;  %v1556_v6 = vshll.u32 %v7271_v19, 30  ;;  %v8345_v32 = vmov 2475754826   ;;  %vm1064_vm14 = vcmp.lt.s32.totalorder %v7269_v29, 2 }
 0x12e   : > { %4285 = vperm.xlu0 %5564, %v4211_v31   ;;  %v1404_v53 = vsub.s32 32, %v1403_v49  ;;  %v8314_v59 = vxor.u32 2147483648, %v7276_v62  ;;  %v7296_v55 = vand.u32 3, %v1272_v15  ;;  %v8346_v10 = vmov 2131351028   ;;  %v4215_v15 = vld [vmem:[%s8280_s6 + $0x70] sm:$0xff] }
 0x12f   : > { %v1262_v58 = vmul.f32 %v1261_v63, %v1259_v43  ;;  %v7281_v48 = vsub.s32 %v1553_v0, %v1556_v6  ;;  %v8313_v0 = vxor.u32 2147483648, %v7273_v30  ;;  %v1409_v63 = vshll.u32 %v8345_v32, %v1403_v49  ;;  %v4216_v43 = vld [vmem:[%s8280_s6 + $0x78] sm:$0xff]  ;;  %v4221_v29 = vld [vmem:[%s8280_s6 + $0xa0] sm:$0xff] }
 0x130   : > { %4300 = vperm.xlu1 %5565, %v4214_v26   ;;  %v1410_v31 = vshrl.u32 %v8346_v10, %v1404_v53  ;;  %v1549_v8 = vadd.s32 %v7216_v3, %v7225_v38  ;;  %v1397_v26 = vor.u32 8388608, %v7292_v51  ;;  %v1407_v25 = vshrl.u32 %v8345_v32, %v1404_v53 }
 0x131   : > { %v1263_v17 = vxor.u32 2147483648, %v1262_v58  ;;  %v1559_v36 = vsub.s32 0, %v7281_v48  ;;  %v1067_v2 = vsel %vm1065_vm9, %v7273_v30, %v8314_v59  ;;  %v1070_v3 = vsel %vm1068_vm12, %v8313_v0, %v7276_v62 }
 0x132   : > { %4295 = vperm.xlu0 %5564, %v4213_v52   ;;  %v8347_v52 = vmov 683565275   ;;  %vm1278_vm0 = vcmp.eq.s32.totalorder %v7296_v55, 2  ;;  %v1411_v50 = vor.u32 %v1410_v31, %v1409_v63  ;;  %v1412_v51 = vshll.u32 %v8346_v10, %v1403_v49  ;;  %v4218_v63 = vld [vmem:[%s8280_s6 + $0x88] sm:$0xff]  ;;  %v4217_v10 = vld [vmem:[%s8280_s6 + $0x80] sm:$0xff] }
 0x133   : > { %v1264_v12 = vsel %vm1181_vm5, %v1263_v17, %v1262_v58  ;;  %v5301_v58 = vmin.u32 %v1559_v36, %v7281_v48  ;;  %v1406_v17 = vshll.u32 %v8347_v52, %v1403_v49  ;;  %v8348_v36 = vmov 2102212464  }
 0x134   : > { %v1267_v6 = vsel %vm7255_vm7, %v6858_v13, %v1264_v12  ;;  %4310 = vperm.xlu1 %5565, %v4216_v43   ;;  %v1413_v12 = vshrl.u32 %v8348_v36, %v1404_v53  ;;  %vm1421_vm1 = vcmp.lt.s32.totalorder %v7301_v56, 1  ;;  %vm1275_vm4 = vcmp.eq.s32.totalorder %v7296_v55, 0 }
 0x135   : > { %5714 = vcosq.f32 %v1267_v6  ;;  %v1561_v38 = vclz %v5301_v58  ;;  %v1415_v0 = vshll.u32 %v8348_v36, %v1403_v49  ;;  %v1418_v43 = vshll.u32 %v8341_v45, %v1403_v49 }
 0x136   : > { %5716 = vsinq.f32 %v1267_v6  ;;  %4305 = vperm.xlu0 %5564, %v4215_v15   ;;  %v1416_v6 = vshrl.u32 %v8341_v45, %v1404_v53  ;;  %v1408_v31 = vor.u32 %v1407_v25, %v1406_v17  ;;  %v1414_v15 = vor.u32 %v1413_v12, %v1412_v51  ;;  %v4220_v17 = vld [vmem:[%s8280_s6 + $0x98] sm:$0xff]  ;;  %v4219_v51 = vld [vmem:[%s8280_s6 + $0x90] sm:$0xff] }
 0x137   : > { %v5302_v32 = vadd.s32 4294967294, %v1561_v38  ;;  %v8349_v58 = vmov 1326507024   ;;  %vm1422_vm5 = vcmp.lt.s32.totalorder %v7301_v56, 2  ;;  %vm1271_vm7 = vweird.f32 %v6858_v13 }
 0x138   : > { %v1419_v59 = vshrl.u32 %v8349_v58, %v1404_v53  ;;  %v1405_v38 = vshrl.u32 %v8347_v52, %v1404_v53  ;;  %v1417_v45 = vor.u32 %v1416_v6, %v1415_v0  ;;  %vm1424_vm9 = vcmp.lt.s32.totalorder %v7301_v56, 4  ;;  %4320 = vperm.xlu1 %5565, %v4218_v63  }
 0x139   : > { %vm5303_vm8 = vcmp.lt.s32.totalorder %v5302_v32, 0  ;;  %vm1423_vm12 = vcmp.lt.s32.totalorder %v7301_v56, 3  ;;  %v1426_v25 = vsel %vm1424_vm9, %v1414_v15, 2102212464  ;;  %v1433_v52 = vsel %vm1421_vm1, %v1411_v50, %v1414_v15  ;;  %v4223_v56 = vld [vmem:[%s8280_s6 + $0xb0] sm:$0xff] }
 0x13a   : > { %4315 = vperm.xlu0 %5564, %v4217_v10   ;;  %v1564_v49 = vsel %vm5303_vm8, 0, %v5302_v32  ;;  %v1420_v36 = vor.u32 %v1419_v59, %v1418_v43  ;;  %v1429_v59 = vsel %vm1421_vm1, %v1408_v31, %v1411_v50  ;;  %v1430_v32 = vsel %vm1424_vm9, %v1417_v45, 920167782 }
 0x13b   : > { %v1565_v12 = vsub.s32 32, %v1564_v49  ;;  %v1566_v53 = vshll.u32 %v7281_v48, %v1564_v49  ;;  %v1569_v0 = vsub.s32 4294967266, %v1564_v49  ;;  %v1437_v43 = vshll.u32 %v1397_v26, 8 }
 0x13c   : > { %v1434_v6 = vsel %vm1424_vm9, %v1420_v36, 1326507024  ;;  %v1431_v58 = vsel %vm1423_vm12, %v1414_v15, %v1430_v32  ;;  %4330 = vperm.xlu1 %5565, %v4220_v17   ;;  %v1071_v49 = vsel %vm1064_vm14, %v1067_v2, %v1070_v3  ;;  %v1425_v23 = vsel %vm1421_vm1, %v1405_v38, %v1408_v31  ;;  %v4222_v2 = vld [vmem:[%s8280_s6 + $0xa8] sm:$0xff]  ;;  %v7411_v32 = vpop.permute.xlu1 %2923 }
 0x13d   : > { %v1567_v63 = vshrl.u32 %v1549_v8, %v1565_v12  ;;  %v1570_v10 = vadd.s32 127, %v1569_v0  ;;  %v1435_v22 = vsel %vm1423_vm12, %v1417_v45, %v1434_v6  ;;  %v1427_v8 = vsel %vm1423_vm12, %v1411_v50, %v1426_v25 }
 0x13e   : > { %4325 = vperm.xlu0 %5564, %v4219_v51   ;;  %v1436_v26 = vsel %vm1422_vm5, %v1433_v52, %v1435_v22  ;;  %v1432_v51 = vsel %vm1422_vm5, %v1429_v59, %v1431_v58  ;;  %vm1274_vm14 = vcmp.lt.s32.totalorder %v7296_v55, 2  ;;  %v1428_v12 = vsel %vm1422_vm5, %v1425_v23, %v1427_v8  ;;  %v4224_v23 = vld [vmem:[%s8280_s6 + $0xb8] sm:$0xff]  ;;  %v7422_v58 = vpop.permute.xlu0 %2913 }
 0x13f   : > { %v7367_v48 = vpop.eup %5714  ;;  %v1568_v36 = vor.u32 %v1567_v63, %v1566_v53  ;;  %v1571_v17 = vshll.u32 %v1570_v10, 23  ;;  %v7390_v3 = vmul.u32.u64.low %v1437_v43, %v1436_v26  ;;  %v7391_v50 = vmul.u32.u64.high %v1437_v43, %v1436_v26, %v7390_v3 }
 0x140   : > { %v7377_v15 = vpop.eup %5716  ;;  %v1279_v45 = vxor.u32 2147483648, %v7367_v48  ;;  %4340 = vperm.xlu1 %5565, %v4222_v2   ;;  %v1072_v53 = vsel %vm1061_vm3, nan, %v1071_v49  ;;  %v7407_v52 = vmul.u32.u64.low %v1437_v43, %v1432_v51  ;;  %v7408_v59 = vmul.u32.u64.high %v1437_v43, %v1432_v51, %v7407_v52 }
 0x141   : > { %v1276_v22 = vxor.u32 2147483648, %v7377_v15  ;;  %v1572_v38 = vor.u32 4788187, %v1571_v17  ;;  %v1575_v25 = vcvt.s32.f32 %v1568_v36  ;;  %v1579_v10 = vsub.s32 4, %v7271_v19 }
 0x142   : > { %v1280_v31 = vsel %vm1278_vm0, %v1279_v45, %v7377_v15  ;;  %4335 = vperm.xlu0 %5564, %v4221_v29   ;;  %v1444_v8 = vmul.u32 %v1437_v43, %v1428_v12  ;;  %vm1446_vm0 = vc.u32 %v7391_v50, %v7407_v52  ;;  %vm1495_vm1 = vcmp.lt.s32.totalorder %v6980_v33, 0  ;;  %v4226_v43 = vld [vmem:[%s8280_s6 + $0xc8] sm:$0xff]  ;;  %v4225_v29 = vld [vmem:[%s8280_s6 + $0xc0] sm:$0xff] }
 0x143   : > { %v1277_v0 = vsel %vm1275_vm4, %v7367_v48, %v1276_v22  ;;  %v1573_v63 = vand.u32 2147483647, %v1572_v38  ;;  %v1447_v55 = vadd.s32 1, %v7408_v59  ;;  %v8350_v17 = vand.u32 2147483647, %v6980_v33  ;;  %v7441_v38 = vpop.permute.xlu1 %2928 }
 0x144   : > { %v1281_v6 = vsel %vm1274_vm14, %v1277_v0, %v1280_v31  ;;  %4350 = vperm.xlu1 %5565, %v4224_v23   ;;  %v1580_v2 = vsel %vm1495_vm1, %v1579_v10, %v7271_v19  ;;  %v2617_v31 = vand.u32 3, %v6968_v21  ;;  %v2308_v23 = vand.u32 3, %v7222_v35  ;;  %v4227_v21 = vld [vmem:[%s8280_s6 + $0xd0] sm:$0xff] }
 0x145   : > { %v1282_v49 = vsel %vm1271_vm7, nan, %v1281_v6  ;;  %v1576_v36 = vmul.f32 %v1575_v25, %v1573_v63  ;;  %vm1494_vm4 = vcmp.le.f32.partialorder %v8350_v17, 0.7853982  ;;  %v1448_v3 = vsel %vm1446_vm0, %v1447_v55, %v7408_v59  ;;  %v4228_v59 = vld [vmem:[%s8280_s6 + $0xd8] sm:$0xff] }
 0x146   : > { %v2837_v26 = vpack.c.bf16 %v1282_v49, %v1072_v53  ;;  %4345 = vperm.xlu0 %5564, %v4223_v56   ;;  %v1449_v12 = vadd.s32 %v1448_v3, %v1444_v8  ;;  %v7443_v53 = vpop.permute.xlu0 %2918  ;;  %v7446_v0 = vsel %vm1494_vm4, 0, %v1580_v2  ;;  %vm2618_vm5 = vcmp.lt.s32.totalorder %v2617_v31, 2 }
 0x147   : > { %v1577_v51 = vxor.u32 2147483648, %v1576_v36  ;;  %vm2619_vm8 = vcmp.eq.s32.totalorder %v2617_v31, 0  ;;  %v1586_v6 = vadd.s32 3, %v7446_v0  ;;  %v8351_v10 = vxor.u32 2147483648, %v7088_v7 }
 0x148   : > { %3212 = vmatpush1.bf16.msra.mxu0 %v2837_v26  ;;  %5464 = vmatpush1.bf16.msra.mxu1 %v2837_v26  ;;  %v1450_v56 = vadd.s32 536870912, %v1449_v12  ;;  %vm2622_vm9 = vcmp.eq.s32.totalorder %v2617_v31, 2  ;;  %v8352_v49 = vxor.u32 2147483648, %v7083_v18  ;;  %vm2309_vm12 = vcmp.lt.s32.totalorder %v2308_v23, 2  ;;  %v7464_v26 = vpop.permute.xlu1 %2938 }
 0x149   : > { %v1578_v25 = vsel %vm1495_vm1, %v1577_v51, %v1576_v36  ;;  %4360 = vperm.xlu1 %5565, %v4226_v43   ;;  %v2621_v35 = vsel %vm2619_vm8, %v7083_v18, %v8351_v10  ;;  %vm2310_vm14 = vcmp.eq.s32.totalorder %v2308_v23, 0  ;;  %vm2313_vm0 = vcmp.eq.s32.totalorder %v2308_v23, 2  ;;  %v4811_v36 = vld [vmem:[%s8281_s7 + $0x8] sm:$0xff]  ;;  %v4810_v18 = vld [vmem:[%s8281_s7] sm:$0xff] }
 0x14a   : > { %4355 = vperm.xlu0 %5564, %v4225_v29   ;;  %v1581_v19 = vsel %vm1494_vm4, %v6980_v33, %v1578_v25  ;;  %v7456_v63 = vshrl.u32 %v1450_v56, 30  ;;  %v2624_v8 = vsel %vm2622_vm9, %v8352_v49, %v7088_v7  ;;  %v8353_v51 = vxor.u32 2147483648, %v7276_v62  ;;  %v7473_v43 = vpop.permute.xlu0 %2933 }
 0x14b   : > { %5718 = vcosq.f32 %v1581_v19  ;;  %v2625_v17 = vsel %vm2618_vm5, %v2621_v35, %v2624_v8  ;;  %v8354_v29 = vxor.u32 2147483648, %v7273_v30  ;;  %v2514_v31 = vand.u32 3, %v7261_v57  ;;  %v4812_v57 = vld [vmem:[%s8281_s7 + $0x10] sm:$0xff]  ;;  %v4814_v8 = vld [vmem:[%s8281_s7 + $0x20] sm:$0xff] }
 0x14c   : > { %5720 = vsinq.f32 %v1581_v19  ;;  %v1452_v55 = vshll.u32 %v7456_v63, 30  ;;  %v2312_v2 = vsel %vm2310_vm14, %v7273_v30, %v8353_v51  ;;  %v7480_v7 = vsel %vm1375_vm6, nan, %v2625_v17 }
 0x14d   : > { %4370 = vperm.xlu1 %5565, %v4228_v59   ;;  %v2315_v3 = vsel %vm2313_vm0, %v8354_v29, %v7276_v62  ;;  %v1587_v25 = vand.u32 3, %v1586_v6  ;;  %vm2515_vm1 = vcmp.lt.s32.totalorder %v2514_v31, 2  ;;  %vm2516_vm4 = vcmp.eq.s32.totalorder %v2514_v31, 0  ;;  %v7500_v62 = vpop.permute.xlu1 %2948 }
 0x14e   : > { %4365 = vperm.xlu0 %5564, %v4227_v21   ;;  %v1453_v19 = vsub.s32 %v1449_v12, %v1452_v55  ;;  %v2316_v23 = vsel %vm2309_vm12, %v2312_v2, %v2315_v3  ;;  %v2518_v30 = vsel %vm2516_vm4, %v7367_v48, %v1276_v22  ;;  %vm2519_vm6 = vcmp.eq.s32.totalorder %v2514_v31, 2  ;;  %v7504_v10 = vpop.permute.xlu0 %2943  ;;  %v4815_v48 = vld [vmem:[%s8281_s7 + $0x28] sm:$0xff] }
 0x14f   : > { %v2317_v59 = vsel %vm1061_vm3, nan, %v2316_v23  ;;  %v2521_v37 = vsel %vm2519_vm6, %v1279_v45, %v7377_v15  ;;  %vm1592_vm3 = vcmp.eq.s32.totalorder %v1587_v25, 2  ;;  %vm1589_vm5 = vcmp.eq.s32.totalorder %v1587_v25, 0 }
 0x150   : > { %v1455_v21 = vsub.s32 0, %v1453_v19  ;;  %v2522_v6 = vsel %vm2515_vm1, %v2518_v30, %v2521_v37  ;;  %vm1588_vm8 = vcmp.lt.s32.totalorder %v1587_v25, 2  ;;  %vm8316_vm9 = vweird.f32 %v6980_v33 }
 0x151   : > { %4849 = vperm.xlu1 %5565, %v4811_v36   ;;  %v2523_v49 = vsel %vm1271_vm7, nan, %v2522_v6  ;;  %v7528_v2 = vpop.permute.xlu1 %2958  ;;  %v1445_v3 = vadd.s32 %v7407_v52, %v7391_v50  ;;  %v4819_v50 = vld [vmem:[%s8281_s7 + $0x48] sm:$0xff]  ;;  %vm1391_vm12 = vcmp.lt.s32.totalorder %v7197_v9, 0 }
 0x152   : > { %4844 = vperm.xlu0 %5564, %v4810_v18   ;;  %v5297_v56 = vmin.u32 %v1455_v21, %v1453_v19  ;;  %v7523_v36 = vpack.c.bf16 %v2523_v49, %v2317_v59  ;;  %v4817_v18 = vld [vmem:[%s8281_s7 + $0x38] sm:$0xff]  ;;  %v7537_v31 = vpop.permute.xlu0 %2953  ;;  %v4816_v59 = vld [vmem:[%s8281_s7 + $0x30] sm:$0xff] }
 0x153   : > { %v4821_v49 = vld [vmem:[%s8281_s7 + $0x58] sm:$0xff] }
 0x154   : > { %v1457_v45 = vclz %v5297_v56 }
 0x155   : > { %v7502_v12 = vpop.eup %5718  ;;  %4859 = vperm.xlu1 %5565, %v4813_v42   ;;  %v7546_v37 = vpop.permute.xlu1 %2968 }
 0x156   : > { %v7506_v22 = vpop.eup %5720  ;;  %v1593_v35 = vxor.u32 2147483648, %v7502_v12  ;;  %4854 = vperm.xlu0 %5564, %v4812_v57   ;;  %v5298_v17 = vadd.s32 4294967294, %v1457_v45 }
 0x157   : > { %v1590_v15 = vxor.u32 2147483648, %v7506_v22 }
 0x158   : > { %v1594_v13 = vsel %vm1592_vm3, %v1593_v35, %v7506_v22  ;;  %vm5299_vm7 = vcmp.lt.s32.totalorder %v5298_v17, 0 }
 0x159   : > { %v1591_v55 = vsel %vm1589_vm5, %v7502_v12, %v1590_v15  ;;  %4869 = vperm.xlu1 %5565, %v4815_v48   ;;  %v1460_v23 = vsel %vm5299_vm7, 0, %v5298_v17  ;;  %v1999_v17 = vand.u32 3, %v6522_v41  ;;  %vm1481_vm5 = vweird.f32 %v7197_v9 }
 0x15a   : > { %v1595_v51 = vsel %vm1588_vm8, %v1591_v55, %v1594_v13  ;;  %4864 = vperm.xlu0 %5564, %v4814_v8   ;;  %v1461_v42 = vsub.s32 32, %v1460_v23  ;;  %v1462_v21 = vshll.u32 %v1453_v19, %v1460_v23  ;;  %v1465_v30 = vsub.s32 4294967266, %v1460_v23  ;;  %v7551_v19 = vpop.permute.xlu0 %2963  ;;  %v4820_v8 = vld [vmem:[%s8281_s7 + $0x50] sm:$0xff] }
 0x15b   : > { %v1596_v29 = vsel %vm8316_vm9, nan, %v1595_v51  ;;  %v1475_v55 = vsub.s32 4, %v7456_v63  ;;  %v7561_v51 = vpop.permute.xlu1 %2978  ;;  %v8355_v23 = vand.u32 2147483647, %v7197_v9  ;;  %vm2001_vm0 = vcmp.eq.s32.totalorder %v1999_v17, 0 }
 0x15c   : > { %v2840_v25 = vpack.c.bf16 %v6399_v27, %v1596_v29  ;;  %v1463_v52 = vshrl.u32 %v1445_v3, %v1461_v42  ;;  %v1466_v57 = vadd.s32 127, %v1465_v30  ;;  %v4818_v27 = vld [vmem:[%s8281_s7 + $0x40] sm:$0xff]  ;;  %vm2004_vm1 = vcmp.eq.s32.totalorder %v1999_v17, 2  ;;  %v4825_v42 = vld [vmem:[%s8281_s7 + $0x78] sm:$0xff] }
 0x15d   : > { %4879 = vperm.xlu1 %5565, %v4817_v18   ;;  %v4823_v18 = vld [vmem:[%s8281_s7 + $0x68] sm:$0xff]  ;;  %vm1390_vm14 = vcmp.le.f32.partialorder %v8355_v23, 0.7853982  ;;  %v2205_v30 = vand.u32 3, %v6547_v1  ;;  %vm2000_vm4 = vcmp.lt.s32.totalorder %v1999_v17, 2  ;;  %v2411_v17 = vand.u32 3, %v6909_v28 }
 0x15e   : > { %3213 = vmatprep.subr.bf16.mxu0 %v2840_v25  ;;  %5458 = vmatprep.subr.bf16.mxu1 %v2840_v25  ;;  %v1464_v56 = vor.u32 %v1463_v52, %v1462_v21  ;;  %v1467_v6 = vshll.u32 %v1466_v57, 23  ;;  %v7566_v3 = vpop.permute.xlu0 %2973  ;;  %v4822_v25 = vld [vmem:[%s8281_s7 + $0x60] sm:$0xff] }
 0x15f   : > { %4874 = vperm.xlu0 %5564, %v4816_v59   ;;  %v1476_v59 = vsel %vm1391_vm12, %v1475_v55, %v7456_v63  ;;  %v7580_v57 = vpop.permute.xlu1 %2988  ;;  %v4824_v63 = vld [vmem:[%s8281_s7 + $0x70] sm:$0xff]  ;;  %vm2207_vm6 = vcmp.eq.s32.totalorder %v2205_v30, 0  ;;  %vm2210_vm3 = vcmp.eq.s32.totalorder %v2205_v30, 2  ;;  %vm2206_vm8 = vcmp.lt.s32.totalorder %v2205_v30, 2  ;;  %v4831_v30 = vld [vmem:[%s8281_s7 + $0xa8] sm:$0xff] }
 0x160   : > { %v1468_v48 = vor.u32 4788187, %v1467_v6  ;;  %v1471_v45 = vcvt.s32.f32 %v1464_v56  ;;  %v1478_v52 = vsel %vm1390_vm14, 0, %v1476_v59  ;;  %v8357_v6 = vxor.u32 2147483648, %v6583_v61 }
 0x161   : > { %4889 = vperm.xlu1 %5565, %v4819_v50   ;;  %v8360_v59 = vxor.u32 2147483648, %v6788_v11 }
 0x162   : > { %v1469_v13 = vand.u32 2147483647, %v1468_v48  ;;  %v2006_v1 = vsel %vm2004_vm1, %v8357_v6, %v6588_v5  ;;  %v4827_v48 = vld [vmem:[%s8281_s7 + $0x88] sm:$0xff] }
 0x163   : > { %4884 = vperm.xlu0 %5564, %v4818_v27   ;;  %v8356_v27 = vxor.u32 2147483648, %v6588_v5  ;;  %v4826_v5 = vld [vmem:[%s8281_s7 + $0x80] sm:$0xff] }
 0x164   : > { %v1472_v29 = vmul.f32 %v1471_v45, %v1469_v13  ;;  %v1482_v45 = vadd.s32 3, %v1478_v52  ;;  %v7598_v13 = vand.u32 3, %v7446_v0  ;;  %v8359_v0 = vxor.u32 2147483648, %v6640_v14 }
 0x165   : > { %4899 = vperm.xlu1 %5565, %v4821_v49   ;;  %v2003_v56 = vsel %vm2001_vm0, %v6583_v61, %v8356_v27  ;;  %v7591_v49 = vpop.permute.xlu0 %2983  ;;  %v2102_v61 = vand.u32 3, %v6739_v34  ;;  %v4829_v34 = vld [vmem:[%s8281_s7 + $0x98] sm:$0xff] }
 0x166   : > { %v1473_v41 = vxor.u32 2147483648, %v1472_v29  ;;  %v2007_v55 = vsel %vm2000_vm4, %v2003_v56, %v2006_v1  ;;  %v1483_v23 = vand.u32 3, %v1482_v45  ;;  %vm2825_vm0 = vcmp.eq.s32.totalorder %v7598_v13, 0 }
 0x167   : > { %4894 = vperm.xlu0 %5564, %v4820_v8   ;;  %v1896_v8 = vand.u32 3, %v6687_v46  ;;  %v2008_v28 = vsel %vm745_vm15, nan, %v2007_v55  ;;  %vm2828_vm1 = vcmp.eq.s32.totalorder %v7598_v13, 2  ;;  %vm2104_vm4 = vcmp.eq.s32.totalorder %v2102_v61, 0 }
 0x168   : > { %v1474_v21 = vsel %vm1391_vm12, %v1473_v41, %v1472_v29  ;;  %v2212_v29 = vsel %vm2210_vm3, %v8359_v0, %v6646_v54  ;;  %vm2413_vm15 = vcmp.eq.s32.totalorder %v2411_v17, 0  ;;  %vm2416_vm3 = vcmp.eq.s32.totalorder %v2411_v17, 2 }
 0x169   : > { %4909 = vperm.xlu1 %5565, %v4823_v18   ;;  %v1477_v50 = vsel %vm1390_vm14, %v7197_v9, %v1474_v21  ;;  %v8358_v18 = vxor.u32 2147483648, %v6646_v54  ;;  %vm1898_vm7 = vcmp.eq.s32.totalorder %v1896_v8, 0  ;;  %vm1901_vm12 = vcmp.eq.s32.totalorder %v1896_v8, 2  ;;  %v7619_v41 = vpop.permute.xlu0 %2993 }
 0x16a   : > { %5722 = vcosq.f32 %v1477_v50  ;;  %v2720_v54 = vand.u32 3, %v1478_v52  ;;  %vm1897_vm9 = vcmp.lt.s32.totalorder %v1896_v8, 2  ;;  %v8361_v21 = vxor.u32 2147483648, %v6780_v24 }
 0x16b   : > { %4904 = vperm.xlu0 %5564, %v4822_v25   ;;  %5724 = vsinq.f32 %v1477_v50  ;;  %v2209_v46 = vsel %vm2207_vm6, %v6640_v14, %v8358_v18  ;;  %v7612_v25 = vpop.permute.xlu1 %2998  ;;  %vm2107_vm6 = vcmp.eq.s32.totalorder %v2102_v61, 2  ;;  %v4828_v14 = vld [vmem:[%s8281_s7 + $0x90] sm:$0xff]  ;;  %vm2103_vm14 = vcmp.lt.s32.totalorder %v2102_v61, 2 }
 0x16c   : > { %v2213_v20 = vsel %vm2206_vm8, %v2209_v46, %v2212_v29  ;;  %v1903_v50 = vsel %vm1901_vm12, %v8361_v21, %v6788_v11  ;;  %vm1488_vm8 = vcmp.eq.s32.totalorder %v1483_v23, 2  ;;  %v8362_v52 = vxor.u32 2147483648, %v6869_v4  ;;  %v4833_v29 = vld [vmem:[%s8281_s7 + $0xb8] sm:$0xff]  ;;  %v8367_v21 = vld [vmem:[#allocation7_spill] sm:$0xff] }
 0x16d   : > { %4919 = vperm.xlu1 %5565, %v4825_v42   ;;  %v1900_v42 = vsel %vm1898_vm7, %v6780_v24, %v8360_v59  ;;  %v8363_v56 = vxor.u32 2147483648, %v6865_v47  ;;  %vm2412_vm7 = vcmp.lt.s32.totalorder %v2411_v17, 2  ;;  %vm1485_vm10 = vcmp.eq.s32.totalorder %v1483_v23, 0  ;;  %v7658_v18 = vpop.permute.xlu0 %3003 }
 0x16e   : > { %v2106_v27 = vsel %vm2104_vm4, %v6865_v47, %v8362_v52  ;;  %v8364_v1 = vxor.u32 2147483648, %v7001_v16  ;;  %v8365_v45 = vxor.u32 2147483648, %v6982_v39  ;;  %v4830_v47 = vld [vmem:[%s8281_s7 + $0xa0] sm:$0xff]  ;;  %vm1484_vm12 = vcmp.lt.s32.totalorder %v1483_v23, 2 }
 0x16f   : > { %4914 = vperm.xlu0 %5564, %v4824_v63   ;;  %v2109_v6 = vsel %vm2107_vm6, %v8363_v56, %v6869_v4  ;;  %vm2722_vm4 = vcmp.eq.s32.totalorder %v2720_v54, 0  ;;  %vm2725_vm6 = vcmp.eq.s32.totalorder %v2720_v54, 2  ;;  %v2827_v44 = vsel %vm2825_vm0, %v7502_v12, %v1590_v15  ;;  %v8366_v15 = vld [vmem:[#allocation6_spill] sm:$0xff] }
 0x170   : > { %v2418_v55 = vsel %vm2416_vm3, %v8365_v45, %v7001_v16  ;;  %v1904_v16 = vsel %vm1897_vm9, %v1900_v42, %v1903_v50  ;;  %v2110_v0 = vsel %vm2103_vm14, %v2106_v27, %v2109_v6  ;;  %v4834_v27 = vld [vmem:[%s8281_s7 + $0xc0] sm:$0xff]  ;;  %v4836_v6 = vld [vmem:[%s8281_s7 + $0xd0] sm:$0xff]  ;;  %vm3151_vm9 = vcmask 850944  }
 0x171   : > { %4929 = vperm.xlu1 %5565, %v4827_v48   ;;  %v2415_v48 = vsel %vm2413_vm15, %v6982_v39, %v8364_v1  ;;  %v2214_v39 = vsel %vm955_vm2, nan, %v2213_v20  ;;  %vm2721_vm15 = vcmp.lt.s32.totalorder %v2720_v54, 2  ;;  %v2111_v12 = vsel %vm851_vm13, nan, %v2110_v0  ;;  %v4837_v1 = vld [vmem:[%s8281_s7 + $0xd8] sm:$0xff] }
 0x172   : > { %v2419_v59 = vsel %vm2412_vm7, %v2415_v48, %v2418_v55  ;;  %v2842_v42 = vpack.c.bf16 %v2214_v39, %v2008_v28  ;;  %vm8368_vm2 = vweird.f32 %v8367_v21  ;;  %v7700_v28 = vpop.permute.xlu0 %3013  ;;  %vm3200_vm13 = vcmask 1043456   ;;  %v4230_v48 = vld [vmem:[%s8280_s6 + $0xe8] sm:$0xff]  ;;  %v4231_v39 = vld [vmem:[%s8280_s6 + $0xf0] sm:$0xff]  ;;  %v5574_v21 = vld [vmem:[%s8275_s1 + $0x20] sm:$0xff]  }
 0x173   : > { %4924 = vperm.xlu0 %5564, %v4826_v5   ;;  %v7653_v5 = vpop.permute.xlu1 %3008  ;;  %v2420_v50 = vsel %vm8368_vm2, nan, %v2419_v59  ;;  %v8371_v0 = vmov 0   ;;  %v5568_v59 = vld [vmem:[%s8275_s1 + $0x8] sm:$0xff]  }
 0x174   : > { %v5723_v63 = vpop.eup %5722 }
 0x175   : > { %4939 = vperm.xlu1 %5565, %v4829_v34   ;;  %v5725_v24 = vpop.eup %5724  ;;  %v1489_v11 = vxor.u32 2147483648, %v5723_v63  ;;  %v2830_v34 = vsel %vm2828_vm1, %v1593_v35, %v7506_v22  ;;  %v4832_v35 = vld [vmem:[%s8281_s7 + $0xb0] sm:$0xff]  ;;  %v1905_v22 = vsel %vm641_vm11, nan, %v1904_v16  ;;  %vm8370_vm11 = vweird.f32 %v6980_v33  ;;  %v4839_v16 = vld [vmem:[%s8281_s7 + $0xe8] sm:$0xff] }
 0x176   : > { %v1486_v4 = vxor.u32 2147483648, %v5725_v24  ;;  %v2841_v60 = vpack.c.bf16 %v2111_v12, %v1905_v22  ;;  %v7721_v9 = vpop.permute.xlu0 %3023  ;;  %v5571_v22 = vld [vmem:[%s8275_s1 + $0x50] sm:$0xff]  }
 0x177   : > { %4934 = vperm.xlu0 %5564, %v4828_v14   ;;  %v1490_v46 = vsel %vm1488_vm8, %v1489_v11, %v5725_v24  ;;  %v2727_v20 = vsel %vm2725_vm6, %v1489_v11, %v5725_v24 }
 0x178   : > { %v1487_v14 = vsel %vm1485_vm10, %v5723_v63, %v1486_v4  ;;  %v2724_v61 = vsel %vm2722_vm4, %v5723_v63, %v1486_v4  ;;  %vm8369_vm10 = vcmp.lt.s32.totalorder %v7598_v13, 2  ;;  %v2844_v13 = vpack.c.bf16 %v7480_v7, %v2420_v50  ;;  %v4229_v7 = vld [vmem:[%s8280_s6 + $0xe0] sm:$0xff] }
 0x179   : > { %4949 = vperm.xlu1 %5565, %v4831_v30   ;;  %v1491_v8 = vsel %vm1484_vm12, %v1487_v14, %v1490_v46  ;;  %v7695_v30 = vpop.permute.xlu1 %3018  ;;  %v2831_v63 = vsel %vm8369_vm10, %v2827_v44, %v2830_v34  ;;  %v2728_v52 = vsel %vm2721_vm15, %v2724_v61, %v2727_v20  ;;  %v5567_v4 = vld [vmem:[%s8275_s1 + $0x40] sm:$0xff]   ;;  %v4232_v14 = vld [vmem:[%s8280_s6 + $0xf8] sm:$0xff]  ;;  %v5569_v44 = vld [vmem:[%s8275_s1 + $0x48] sm:$0xff]  }
 0x17a   : > { %v1492_v17 = vsel %vm1481_vm5, nan, %v1491_v8  ;;  %v2832_v54 = vsel %vm8370_vm11, nan, %v2831_v63  ;;  %v2729_v56 = vsel %vm1481_vm5, nan, %v2728_v52  ;;  %v7739_v46 = vpop.permute.xlu0 %3033  ;;  %v4841_v8 = vld [vmem:[%s8281_s7 + $0xf8] sm:$0xff]  ;;  %v4840_v20 = vld [vmem:[%s8281_s7 + $0xf0] sm:$0xff]  ;;  %v5575_v50 = vld [vmem:[%s8275_s1 + $0x60] sm:$0xff]  }
 0x17b   : > { %4944 = vperm.xlu0 %5564, %v4830_v47   ;;  %v2839_v23 = vpack.c.bf16 %v8366_v15, %v1492_v17  ;;  %v2846_v11 = vpack.c.bf16 %v2832_v54, %v2832_v54  ;;  %v2845_v33 = vpack.c.bf16 %v2729_v56, %v2729_v56  ;;  %v5566_v47 = vld [vmem:[%s8275_s1] sm:$0xff]   ;;  %v5572_v15 = vld [vmem:[%s8275_s1 + $0x18] sm:$0xff]   ;;  %v5576_v63 = vld [vmem:[%s8275_s1 + $0x28] sm:$0xff]  }
 0x17c   : > { %v5140_v17 = vld [vmem:[#allocation2] sm:$0x1]  ;;  %v5577_v52 = vld [vmem:[%s8275_s1 + $0x68] sm:$0xff]  }
 0x17d   : > { %4959 = vperm.xlu1 %5565, %v4833_v29   ;;  %3214 = vmatpush1.bf16.msra.mxu0 %v2839_v23  ;;  %v7716_v24 = vpop.permute.xlu1 %3028  ;;  %v3202_v45 = vsel %vm3200_vm13, %v2845_v33, 0  ;;  %v5584_v54 = vld [vmem:[%s8277_s3 + $0x4] ss:$8 sps:$4 sm:$0xff]  }
 0x17e   : > { %5465 = vmatpush1.bf16.msra.mxu1 %v2839_v23  ;;  %3215 = vmatprep.subr.bf16.mxu0 %v2842_v42  ;;  %v7756_v34 = vpop.permute.xlu0 %3043  ;;  %v5573_v23 = vld [vmem:[%s8275_s1 + $0x58] sm:$0xff]  }
 0x17f   : > { %4954 = vperm.xlu0 %5564, %v4832_v35   ;;  %5459 = vmatprep.subr.bf16.mxu1 %v2842_v42  ;;  %v5570_v42 = vld [vmem:[%s8275_s1 + $0x10] sm:$0xff]  }
 0x181   : > { %4969 = vperm.xlu1 %5565, %v4835_v40   ;;  %3216 = vmatpush1.bf16.msra.mxu0 %v2841_v60  ;;  %v7731_v55 = vpop.permute.xlu1 %3038  ;;  %v5578_v40 = vld [vmem:[%s8275_s1 + $0x30] sm:$0xff]  }
 0x182   : > { %5466 = vmatpush1.bf16.msra.mxu1 %v2841_v60  ;;  %3217 = vmatprep.subr.bf16.mxu0 %v2844_v13  ;;  %v7777_v35 = vpop.permute.xlu0 %3053  ;;  %v5579_v60 = vld [vmem:[%s8275_s1 + $0x70] sm:$0xff]  }
 0x183   : > { %4964 = vperm.xlu0 %5564, %v4834_v27   ;;  %5460 = vmatprep.subr.bf16.mxu1 %v2844_v13  ;;  %v5580_v27 = vld [vmem:[%s8275_s1 + $0x38] sm:$0xff]  }
 0x184   : > { %v5581_v13 = vld [vmem:[%s8275_s1 + $0x78] sm:$0xff]  }
 0x185   : > { %4974 = vperm.xlu1 %5565, %v4836_v6   ;;  %3218 = vmatpush1.bf16.msra.mxu0 %v7523_v36  ;;  %v7754_v29 = vpop.permute.xlu1 %3048 }
 0x186   : > { %5467 = vmatpush1.bf16.msra.mxu1 %v7523_v36  ;;  %5368 = vmatprep.subr.msk.bf16.mxu0 %vm3200_vm13, %v2846_v11  ;;  %v4838_v36 = vld [vmem:[%s8281_s7 + $0xe0] sm:$0xff]  ;;  %v7787_v12 = vpop.permute.xlu0 %3063 }
 0x187   : > { %4375 = vperm.xlu0 %5564, %v4229_v7   ;;  %5461 = vmatprep.subr.msk.bf16.mxu1 %vm3200_vm13, %v2846_v11 }
 0x189   : > { %4979 = vperm.xlu1 %5565, %v4837_v1   ;;  %3220 = vmatpush1.bf16.msra.mxu0 %v3202_v45  ;;  %v7770_v61 = vpop.permute.xlu1 %3058 }
 0x18a   : > { %5468 = vmatpush1.bf16.msra.mxu1 %v3202_v45 }
 0x18b   : > { %4380 = vperm.xlu0 %5564, %v4230_v48  }
 0x18c   : > { %5369 = vmatmul.mubr.msk.bf16.vlgmr.msra.gmra.mrb[0].mxu0 %vm3151_vm9, %v5566_v47 }
 0x18d   : > { %4984 = vperm.xlu1 %5565, %v4838_v36   ;;  %5377 = vmatmul.mubr.msk.bf16.vlgmr.msra.gmra.mrb[0].mxu1 %vm3151_vm9, %v5567_v4 }
 0x18e   : > { %3249 = vmatprep.mubr.bf16.mxu0 %v8371_v0  ;;  %3329 = vmatprep.mubr.bf16.mxu1 %v8371_v0 }
 0x18f   : > { %4385 = vperm.xlu0 %5564, %v4231_v39  }
 0x191   : > { %4989 = vperm.xlu1 %5565, %v4839_v16  }
 0x193   : > { %4390 = vperm.xlu0 %5564, %v4232_v14  }
 0x194   : > { %5370 = vmatmul.mubr.msk.bf16.gmra.mrb[4].mxu0 %vm3151_vm9, %v5568_v59 }
 0x195   : > { %4999 = vperm.xlu1 %5565, %v4841_v8   ;;  %5378 = vmatmul.mubr.msk.bf16.gmra.mrb[4].mxu1 %vm3151_vm9, %v5569_v44 }
 0x196   : > { %3259 = vmatprep.mubr.bf16.mxu0 %v8371_v0  ;;  %3339 = vmatprep.mubr.bf16.mxu1 %v8371_v0 }
 0x197   : > { %4994 = vperm.xlu0 %5564, %v4840_v20  }
 0x19b   : > { %5143 = vperm.xlu0 %5564, %v5140_v17  }
 0x19c   : > { %5371 = vmatmul.mubr.msk.bf16.gmra.mrb[8].mxu0 %vm3151_vm9, %v5570_v42 }
 0x19d   : > { %5379 = vmatmul.mubr.msk.bf16.gmra.mrb[8].mxu1 %vm3151_vm9, %v5571_v22  ;;  %3269 = vmatprep.mubr.bf16.mxu0 %v8371_v0 }
 0x19e   : > { %3349 = vmatprep.mubr.bf16.mxu1 %v8371_v0 }
 0x1a4   : > { %5372 = vmatmul.mubr.msk.bf16.gmra.mrb[12].mxu0 %vm3151_vm9, %v5572_v15 }
 0x1a5   : > { %5380 = vmatmul.mubr.msk.bf16.gmra.mrb[12].mxu1 %vm3151_vm9, %v5573_v23  ;;  %3279 = vmatprep.mubr.bf16.mxu0 %v8371_v0 }
 0x1a6   : > { %3359 = vmatprep.mubr.bf16.mxu1 %v8371_v0 }
 0x1ac   : > { %5373 = vmatmul.mubr.msk.bf16.gmra.mrb[16].mxu0 %vm3151_vm9, %v5574_v21 }
 0x1ad   : > { %5381 = vmatmul.mubr.msk.bf16.gmra.mrb[16].mxu1 %vm3151_vm9, %v5575_v50  ;;  %3289 = vmatprep.mubr.bf16.mxu0 %v8371_v0 }
 0x1ae   : > { %3369 = vmatprep.mubr.bf16.mxu1 %v8371_v0 }
 0x1b4   : > { %5374 = vmatmul.mubr.msk.bf16.gmra.mrb[20].mxu0 %vm3151_vm9, %v5576_v63 }
 0x1b5   : > { %5382 = vmatmul.mubr.msk.bf16.gmra.mrb[20].mxu1 %vm3151_vm9, %v5577_v52  ;;  %3299 = vmatprep.mubr.bf16.mxu0 %v8371_v0 }
 0x1b6   : > { %3379 = vmatprep.mubr.bf16.mxu1 %v8371_v0 }
 0x1bc   : > { %5375 = vmatmul.mubr.msk.bf16.gmra.mrb[24].mxu0 %vm3151_vm9, %v5578_v40 }
 0x1bd   : > { %5383 = vmatmul.mubr.msk.bf16.gmra.mrb[24].mxu1 %vm3151_vm9, %v5579_v60  ;;  %3309 = vmatprep.mubr.bf16.mxu0 %v8371_v0 }
 0x1be   : > { %3389 = vmatprep.mubr.bf16.mxu1 %v8371_v0 }
 0x1c4   : > { %5376 = vmatmul.mubr.msk.bf16.gmra.mrb[28].mxu0 %vm3151_vm9, %v5580_v27 }
 0x1c5   : > { %5384 = vmatmul.mubr.msk.bf16.gmra.mrb[28].mxu1 %vm3151_vm9, %v5581_v13 }
 0x1c6   : > { %3912 = vmatprep.mubr.bf16.mxu1 %v5584_v54 }
 0x25f   : > { %v3241_v56 = vpop.f32.mrb[0].mxu0 }
 0x260   : > { %v3321_v6 = vpop.f32.mrb[0].mxu1  ;;  %v3242_v7 = vadd.f32 %v3241_v56, %v7422_v58  ;;  %v3243_v11 = vpop.f32.mrb[1].mxu0 }
 0x261   : > { %v3322_v33 = vadd.f32 %v3321_v6, %v7619_v41  ;;  %v3323_v1 = vpop.f32.mrb[1].mxu1  ;;  %v3244_v48 = vadd.f32 %v3243_v11, %v7422_v58  ;;  %v3245_v45 = vpop.f32.mrb[2].mxu0 }
 0x262   : > { %v3324_v47 = vadd.f32 %v3323_v1, %v7619_v41  ;;  %v3325_v4 = vpop.f32.mrb[2].mxu1  ;;  %v3246_v36 = vadd.f32 %v3245_v45, %v7443_v53  ;;  %v3247_v39 = vpop.f32.mrb[3].mxu0  ;;  %v3400_v20 = vmax.f32 %v3242_v7, 0.0 }
 0x263   : > { %v3432_v16 = vmax.f32 %v3322_v33, 0.0  ;;  %v3326_v0 = vadd.f32 %v3325_v4, %v7612_v25  ;;  %v3327_v14 = vpop.f32.mrb[3].mxu1  ;;  %v3248_v59 = vadd.f32 %v3247_v39, %v7443_v53  ;;  %v3401_v58 = vmax.f32 %v3244_v48, 0.0 }
 0x264   : > { %v3433_v44 = vmax.f32 %v3324_v47, 0.0  ;;  %v3328_v8 = vadd.f32 %v3327_v14, %v7612_v25  ;;  %v3402_v17 = vmax.f32 %v3246_v36, 0.0 }
 0x265   : > { %v3434_v42 = vmax.f32 %v3326_v0, 0.0  ;;  %v3403_v22 = vmax.f32 %v3248_v59, 0.0 }
 0x266   : > { %v3435_v15 = vmax.f32 %v3328_v8, 0.0  ;;  %v3496_v41 = vpack.c.bf16 %v3402_v17, %v3400_v20 }
 0x267   : > { %v7852_v23 = vpack.c.bf16 %v3434_v42, %v3432_v16  ;;  %v3497_v21 = vpack.c.bf16 %v3403_v22, %v3401_v58  ;;  %v3251_v50 = vpop.f32.mrb[4].mxu0 }
 0x268   : > { %v7854_v63 = vpack.c.bf16 %v3435_v15, %v3433_v44  ;;  %v3331_v52 = vpop.f32.mrb[4].mxu1  ;;  %v3252_v40 = vadd.f32 %v3251_v50, %v7411_v32  ;;  %v3253_v53 = vpop.f32.mrb[5].mxu0 }
 0x269   : > { %v3332_v60 = vadd.f32 %v3331_v52, %v7658_v18  ;;  %v3333_v25 = vpop.f32.mrb[5].mxu1  ;;  %v3254_v27 = vadd.f32 %v3253_v53, %v7411_v32  ;;  %v3255_v13 = vpop.f32.mrb[6].mxu0  ;;  %3880 = vmatprep.subr.bf16.mxu1 %v3497_v21 }
 0x26a   : > { %v3334_v54 = vadd.f32 %v3333_v25, %v7658_v18  ;;  %v3335_v56 = vpop.f32.mrb[6].mxu1  ;;  %v3256_v6 = vadd.f32 %v3255_v13, %v7441_v38  ;;  %v3257_v7 = vpop.f32.mrb[7].mxu0  ;;  %3881 = vmatpush1.bf16.msra.mxu1 %v3496_v41  ;;  %v3404_v4 = vmax.f32 %v3252_v40, 0.0 }
 0x26b   : > { %v3436_v11 = vmax.f32 %v3332_v60, 0.0  ;;  %v3336_v33 = vadd.f32 %v3335_v56, %v7653_v5  ;;  %v3337_v1 = vpop.f32.mrb[7].mxu1  ;;  %v3258_v48 = vadd.f32 %v3257_v7, %v7441_v38  ;;  %v3405_v39 = vmax.f32 %v3254_v27, 0.0 }
 0x26c   : > { %v3437_v45 = vmax.f32 %v3334_v54, 0.0  ;;  %v3338_v47 = vadd.f32 %v3337_v1, %v7653_v5  ;;  %v3406_v32 = vmax.f32 %v3256_v6, 0.0 }
 0x26d   : > { %v3438_v36 = vmax.f32 %v3336_v33, 0.0  ;;  %v3407_v16 = vmax.f32 %v3258_v48, 0.0 }
 0x26e   : > { %v3439_v18 = vmax.f32 %v3338_v47, 0.0  ;;  %v3498_v0 = vpack.c.bf16 %v3406_v32, %v3404_v4 }
 0x26f   : > { %v7864_v14 = vpack.c.bf16 %v3438_v36, %v3436_v11  ;;  %v3499_v59 = vpack.c.bf16 %v3407_v16, %v3405_v39  ;;  %v3261_v44 = vpop.f32.mrb[8].mxu0 }
 0x270   : > { %v7866_v8 = vpack.c.bf16 %v3439_v18, %v3437_v45  ;;  %v3341_v20 = vpop.f32.mrb[8].mxu1  ;;  %v3262_v17 = vadd.f32 %v3261_v44, %v7473_v43  ;;  %v3263_v38 = vpop.f32.mrb[9].mxu0 }
 0x271   : > { %v3342_v42 = vadd.f32 %v3341_v20, %v7700_v28  ;;  %v3343_v5 = vpop.f32.mrb[9].mxu1  ;;  %v3264_v58 = vadd.f32 %v3263_v38, %v7473_v43  ;;  %v3265_v22 = vpop.f32.mrb[10].mxu0  ;;  %3882 = vmatprep.subr.bf16.mxu1 %v3499_v59 }
 0x272   : > { %v3344_v15 = vadd.f32 %v3343_v5, %v7700_v28  ;;  %v3345_v41 = vpop.f32.mrb[10].mxu1  ;;  %v3266_v21 = vadd.f32 %v3265_v22, %v7464_v26  ;;  %v3267_v50 = vpop.f32.mrb[11].mxu0  ;;  %3883 = vmatpush1.bf16.msra.mxu1 %v3498_v0  ;;  %v3408_v13 = vmax.f32 %v3262_v17, 0.0 }
 0x273   : > { %v3440_v52 = vmax.f32 %v3342_v42, 0.0  ;;  %v3346_v40 = vadd.f32 %v3345_v41, %v7695_v30  ;;  %v3347_v53 = vpop.f32.mrb[11].mxu1  ;;  %v3268_v60 = vadd.f32 %v3267_v50, %v7464_v26  ;;  %v3409_v56 = vmax.f32 %v3264_v58, 0.0 }
 0x274   : > { %v3441_v25 = vmax.f32 %v3344_v15, 0.0  ;;  %v3348_v27 = vadd.f32 %v3347_v53, %v7695_v30  ;;  %v3410_v43 = vmax.f32 %v3266_v21, 0.0 }
 0x275   : > { %v3442_v54 = vmax.f32 %v3346_v40, 0.0  ;;  %v3411_v6 = vmax.f32 %v3268_v60, 0.0 }
 0x276   : > { %v3443_v28 = vmax.f32 %v3348_v27, 0.0  ;;  %v3500_v7 = vpack.c.bf16 %v3410_v43, %v3408_v13 }
 0x277   : > { %v7876_v11 = vpack.c.bf16 %v3442_v54, %v3440_v52  ;;  %v3501_v33 = vpack.c.bf16 %v3411_v6, %v3409_v56  ;;  %v3271_v48 = vpop.f32.mrb[12].mxu0 }
 0x278   : > { %v7878_v1 = vpack.c.bf16 %v3443_v28, %v3441_v25  ;;  %v3351_v45 = vpop.f32.mrb[12].mxu1  ;;  %v3272_v47 = vadd.f32 %v3271_v48, %v7504_v10  ;;  %v3273_v4 = vpop.f32.mrb[13].mxu0 }
 0x279   : > { %v3352_v26 = vadd.f32 %v3351_v45, %v7721_v9  ;;  %v3353_v30 = vpop.f32.mrb[13].mxu1  ;;  %v3274_v32 = vadd.f32 %v3273_v4, %v7504_v10  ;;  %v3275_v39 = vpop.f32.mrb[14].mxu0  ;;  %3884 = vmatprep.subr.bf16.mxu1 %v3501_v33 }
 0x27a   : > { %v3354_v36 = vadd.f32 %v3353_v30, %v7721_v9  ;;  %v3355_v16 = vpop.f32.mrb[14].mxu1  ;;  %v3276_v0 = vadd.f32 %v3275_v39, %v7500_v62  ;;  %v3277_v44 = vpop.f32.mrb[15].mxu0  ;;  %3885 = vmatpush1.bf16.msra.mxu1 %v3500_v7  ;;  %v3412_v5 = vmax.f32 %v3272_v47, 0.0 }
 0x27b   : > { %v3444_v18 = vmax.f32 %v3352_v26, 0.0  ;;  %v3356_v59 = vadd.f32 %v3355_v16, %v7716_v24  ;;  %v3357_v20 = vpop.f32.mrb[15].mxu1  ;;  %v3278_v38 = vadd.f32 %v3277_v44, %v7500_v62  ;;  %v3413_v9 = vmax.f32 %v3274_v32, 0.0 }
 0x27c   : > { %v3445_v17 = vmax.f32 %v3354_v36, 0.0  ;;  %v3358_v42 = vadd.f32 %v3357_v20, %v7716_v24  ;;  %v3414_v10 = vmax.f32 %v3276_v0, 0.0 }
 0x27d   : > { %v3446_v58 = vmax.f32 %v3356_v59, 0.0  ;;  %v3415_v22 = vmax.f32 %v3278_v38, 0.0 }
 0x27e   : > { %v3447_v15 = vmax.f32 %v3358_v42, 0.0  ;;  %v3502_v41 = vpack.c.bf16 %v3414_v10, %v3412_v5 }
 0x27f   : > { %v7888_v21 = vpack.c.bf16 %v3446_v58, %v3444_v18  ;;  %v3503_v50 = vpack.c.bf16 %v3415_v22, %v3413_v9  ;;  %v3281_v40 = vpop.f32.mrb[16].mxu0 }
 0x280   : > { %v7890_v52 = vpack.c.bf16 %v3447_v15, %v3445_v17  ;;  %v3361_v53 = vpop.f32.mrb[16].mxu1  ;;  %v3282_v60 = vadd.f32 %v3281_v40, %v7537_v31  ;;  %v3283_v25 = vpop.f32.mrb[17].mxu0 }
 0x281   : > { %v3362_v62 = vadd.f32 %v3361_v53, %v7739_v46  ;;  %v3363_v24 = vpop.f32.mrb[17].mxu1  ;;  %v3284_v27 = vadd.f32 %v3283_v25, %v7537_v31  ;;  %v3285_v43 = vpop.f32.mrb[18].mxu0  ;;  %3886 = vmatprep.subr.bf16.mxu1 %v3503_v50 }
 0x282   : > { %v3364_v13 = vadd.f32 %v3363_v24, %v7739_v46  ;;  %v3365_v54 = vpop.f32.mrb[18].mxu1  ;;  %v3286_v56 = vadd.f32 %v3285_v43, %v7528_v2  ;;  %v3287_v28 = vpop.f32.mrb[19].mxu0  ;;  %3887 = vmatpush1.bf16.msra.mxu1 %v3502_v41  ;;  %v3416_v45 = vmax.f32 %v3282_v60, 0.0 }
 0x283   : > { %v3366_v6 = vadd.f32 %v3365_v54, %v7731_v55  ;;  %v3367_v7 = vpop.f32.mrb[19].mxu1  ;;  %v3288_v33 = vadd.f32 %v3287_v28, %v7528_v2  ;;  %v3448_v47 = vmax.f32 %v3362_v62, 0.0  ;;  %v3417_v4 = vmax.f32 %v3284_v27, 0.0 }
 0x284   : > { %v3368_v48 = vadd.f32 %v3367_v7, %v7731_v55  ;;  %v3418_v26 = vmax.f32 %v3286_v56, 0.0  ;;  %v3449_v46 = vmax.f32 %v3364_v13, 0.0 }
 0x285   : > { %v3450_v31 = vmax.f32 %v3366_v6, 0.0  ;;  %v3419_v30 = vmax.f32 %v3288_v33, 0.0 }
 0x286   : > { %v3451_v32 = vmax.f32 %v3368_v48, 0.0  ;;  %v3504_v36 = vpack.c.bf16 %v3418_v26, %v3416_v45 }
 0x287   : > { %v7900_v39 = vpack.c.bf16 %v3450_v31, %v3448_v47  ;;  %v3505_v16 = vpack.c.bf16 %v3419_v30, %v3417_v4  ;;  %v3291_v0 = vpop.f32.mrb[20].mxu0 }
 0x288   : > { %v7902_v18 = vpack.c.bf16 %v3451_v32, %v3449_v46  ;;  %v3371_v59 = vpop.f32.mrb[20].mxu1  ;;  %v3292_v2 = vadd.f32 %v3291_v0, %v7551_v19  ;;  %v3293_v44 = vpop.f32.mrb[21].mxu0 }
 0x289   : > { %v3372_v55 = vadd.f32 %v3371_v59, %v7756_v34  ;;  %v3373_v20 = vpop.f32.mrb[21].mxu1  ;;  %v3294_v17 = vadd.f32 %v3293_v44, %v7551_v19  ;;  %v3295_v42 = vpop.f32.mrb[22].mxu0  ;;  %3888 = vmatprep.subr.bf16.mxu1 %v3505_v16 }
 0x28a   : > { %v3374_v38 = vadd.f32 %v3373_v20, %v7756_v34  ;;  %v3375_v5 = vpop.f32.mrb[22].mxu1  ;;  %v3296_v10 = vadd.f32 %v3295_v42, %v7546_v37  ;;  %v3297_v9 = vpop.f32.mrb[23].mxu0  ;;  %3889 = vmatpush1.bf16.msra.mxu1 %v3504_v36  ;;  %v3420_v50 = vmax.f32 %v3292_v2, 0.0 }
 0x28b   : > { %v3376_v58 = vadd.f32 %v3375_v5, %v7754_v29  ;;  %v3377_v22 = vpop.f32.mrb[23].mxu1  ;;  %v3298_v15 = vadd.f32 %v3297_v9, %v7546_v37  ;;  %v3452_v40 = vmax.f32 %v3372_v55, 0.0  ;;  %v3421_v60 = vmax.f32 %v3294_v17, 0.0  ;;  %v3069_v55 = vpop.permute.xlu1 %3068 }
 0x28c   : > { %v3378_v41 = vadd.f32 %v3377_v22, %v7754_v29  ;;  %v3422_v53 = vmax.f32 %v3296_v10, 0.0  ;;  %v3453_v34 = vmax.f32 %v3374_v38, 0.0 }
 0x28d   : > { %v3454_v19 = vmax.f32 %v3376_v58, 0.0  ;;  %v3423_v62 = vmax.f32 %v3298_v15, 0.0 }
 0x28e   : > { %v3455_v25 = vmax.f32 %v3378_v41, 0.0  ;;  %v3506_v24 = vpack.c.bf16 %v3422_v53, %v3420_v50 }
 0x28f   : > { %v7912_v27 = vpack.c.bf16 %v3454_v19, %v3452_v40  ;;  %v3507_v13 = vpack.c.bf16 %v3423_v62, %v3421_v60  ;;  %v3301_v54 = vpop.f32.mrb[24].mxu0 }
 0x290   : > { %v7914_v43 = vpack.c.bf16 %v3455_v25, %v3453_v34  ;;  %v3381_v56 = vpop.f32.mrb[24].mxu1  ;;  %v3302_v37 = vadd.f32 %v3301_v54, %v7566_v3  ;;  %v3303_v6 = vpop.f32.mrb[25].mxu0 }
 0x291   : > { %v3382_v29 = vadd.f32 %v3381_v56, %v7777_v35  ;;  %v3383_v28 = vpop.f32.mrb[25].mxu1  ;;  %v3304_v7 = vadd.f32 %v3303_v6, %v7566_v3  ;;  %v3305_v48 = vpop.f32.mrb[26].mxu0  ;;  %3890 = vmatprep.subr.bf16.mxu1 %v3507_v13 }
 0x292   : > { %v3384_v33 = vadd.f32 %v3383_v28, %v7777_v35  ;;  %v3385_v45 = vpop.f32.mrb[26].mxu1  ;;  %v3306_v47 = vadd.f32 %v3305_v48, %v7561_v51  ;;  %v3307_v31 = vpop.f32.mrb[27].mxu0  ;;  %3891 = vmatpush1.bf16.msra.mxu1 %v3506_v24  ;;  %v3424_v32 = vmax.f32 %v3302_v37, 0.0  ;;  %v5606_v48 = vld [vmem:[%s8277_s3 + $0x84] ss:$8 sps:$4 sm:$0xff]  }
 0x293   : > { %v3386_v26 = vadd.f32 %v3385_v45, %v7770_v61  ;;  %v3387_v4 = vpop.f32.mrb[27].mxu1  ;;  %v3308_v46 = vadd.f32 %v3307_v31, %v7561_v51  ;;  %v3456_v36 = vmax.f32 %v3382_v29, 0.0  ;;  %v3425_v0 = vmax.f32 %v3304_v7, 0.0  ;;  %v5603_v7 = vld [vmem:[%s8277_s3 + $0x74] ss:$8 sps:$4 sm:$0xff]  }
 0x294   : > { %v3388_v30 = vadd.f32 %v3387_v4, %v7770_v61  ;;  %v3426_v16 = vmax.f32 %v3306_v47, 0.0  ;;  %v3457_v35 = vmax.f32 %v3384_v33, 0.0  ;;  %v5605_v33 = vld [vmem:[%s8277_s3 + $0x70] ss:$8 sps:$4 sm:$0xff]   ;;  %v5608_v45 = vld [vmem:[%s8277_s3 + $0x80] ss:$8 sps:$4 sm:$0xff]  }
 0x295   : > { %v3458_v3 = vmax.f32 %v3386_v26, 0.0  ;;  %v3427_v59 = vmax.f32 %v3308_v46, 0.0  ;;  %v5609_v47 = vld [vmem:[%s8277_s3 + $0x94] ss:$8 sps:$4 sm:$0xff]   ;;  %v5611_v26 = vld [vmem:[%s8277_s3 + $0x90] ss:$8 sps:$4 sm:$0xff]  }
 0x296   : > { %v3459_v2 = vmax.f32 %v3388_v30, 0.0  ;;  %v3508_v44 = vpack.c.bf16 %v3426_v16, %v3424_v32  ;;  %v5612_v31 = vld [vmem:[%s8277_s3 + $0xa4] ss:$8 sps:$4 sm:$0xff]   ;;  %v5614_v4 = vld [vmem:[%s8277_s3 + $0xa0] ss:$8 sps:$4 sm:$0xff]  }
 0x297   : > { %v3524_v20 = vpack.c.bf16 %v3458_v3, %v3456_v36  ;;  %v3509_v17 = vpack.c.bf16 %v3427_v59, %v3425_v0  ;;  %v3311_v42 = vpop.f32.mrb[28].mxu0  ;;  %v5615_v46 = vld [vmem:[%s8277_s3 + $0xb4] ss:$8 sps:$4 sm:$0xff]   ;;  %v5617_v30 = vld [vmem:[%s8277_s3 + $0xb0] ss:$8 sps:$4 sm:$0xff]  }
 0x298   : > { %v3525_v38 = vpack.c.bf16 %v3459_v2, %v3457_v35  ;;  %v3391_v5 = vpop.f32.mrb[28].mxu1  ;;  %v3312_v10 = vadd.f32 %v3311_v42, %v7591_v49  ;;  %v3313_v61 = vpop.f32.mrb[29].mxu0  ;;  %v5618_v32 = vld [vmem:[%s8277_s3 + $0xc4] ss:$8 sps:$4 sm:$0xff]   ;;  %v5620_v36 = vld [vmem:[%s8277_s3 + $0xc0] ss:$8 sps:$4 sm:$0xff]  }
 0x299   : > { %v3392_v51 = vadd.f32 %v3391_v5, %v7787_v12  ;;  %v3393_v58 = vpop.f32.mrb[29].mxu1  ;;  %v3314_v9 = vadd.f32 %v3313_v61, %v7591_v49  ;;  %v3315_v15 = vpop.f32.mrb[30].mxu0  ;;  %3892 = vmatprep.subr.bf16.mxu1 %v3509_v17  ;;  %v5621_v16 = vld [vmem:[%s8277_s3 + $0xd4] ss:$8 sps:$4 sm:$0xff]   ;;  %v5623_v3 = vld [vmem:[%s8277_s3 + $0xd0] ss:$8 sps:$4 sm:$0xff]  }
 0x29a   : > { %v3394_v22 = vadd.f32 %v3393_v58, %v7787_v12  ;;  %v3395_v41 = vpop.f32.mrb[30].mxu1  ;;  %v3316_v50 = vadd.f32 %v3315_v15, %v7580_v57  ;;  %v3317_v53 = vpop.f32.mrb[31].mxu0  ;;  %3893 = vmatpush1.bf16.msra.mxu1 %v3508_v44  ;;  %v3428_v62 = vmax.f32 %v3312_v10, 0.0  ;;  %v5624_v0 = vld [vmem:[%s8277_s3 + $0xe4] ss:$8 sps:$4 sm:$0xff]  }
 0x29b   : > { %v3396_v40 = vadd.f32 %v3395_v41, %v3069_v55  ;;  %v3397_v19 = vpop.f32.mrb[31].mxu1  ;;  %v3318_v60 = vadd.f32 %v3317_v53, %v7580_v57  ;;  %v3460_v25 = vmax.f32 %v3392_v51, 0.0  ;;  %v3429_v54 = vmax.f32 %v3314_v9, 0.0  ;;  %v5582_v57 = vld [vmem:[%s8277_s3] ss:$8 sps:$4 sm:$0xff]  }
 0x29c   : > { %v3398_v34 = vadd.f32 %v3397_v19, %v3069_v55  ;;  %v3430_v24 = vmax.f32 %v3316_v50, 0.0  ;;  %v3461_v49 = vmax.f32 %v3394_v22, 0.0  ;;  %v5626_v35 = vld [vmem:[%s8277_s3 + $0xe0] ss:$8 sps:$4 sm:$0xff]   ;;  %v5627_v59 = vld [vmem:[%s8277_s3 + $0xf4] ss:$8 sps:$4 sm:$0xff]   ;;  %v3563_v55 = vpop.permute.xlu0 %3562 }
 0x29d   : > { %v3462_v13 = vmax.f32 %v3396_v40, 0.0  ;;  %v3431_v56 = vmax.f32 %v3318_v60, 0.0  ;;  %v5629_v2 = vld [vmem:[%s8277_s3 + $0xf0] ss:$8 sps:$4 sm:$0xff]   ;;  %v5632_v61 = vld [vmem:[%s8279_s5 + $0x4] ss:$8 sps:$4 sm:$0xff]  }
 0x29e   : > { %v3463_v12 = vmax.f32 %v3398_v34, 0.0  ;;  %v3510_v37 = vpack.c.bf16 %v3430_v24, %v3428_v62  ;;  %4585 = vmatprep.mubr.bf16.mxu0 %v5632_v61 }
 0x29f   : > { %v3526_v29 = vpack.c.bf16 %v3462_v13, %v3460_v25  ;;  %v3511_v6 = vpack.c.bf16 %v3431_v56, %v3429_v54 }
 0x2a0   : > { %v3527_v28 = vpack.c.bf16 %v3463_v12, %v3461_v49  ;;  %v3573_v40 = vpop.permute.xlu0 %3572 }
 0x2a1   : > { %3894 = vmatprep.subr.bf16.mxu1 %v3511_v6 }
 0x2a2   : > { %3895 = vmatpush1.bf16.msra.mxu1 %v3510_v37 }
 0x2a3   : > { %3896 = vmatprep.subr.bf16.mxu1 %v7854_v63  ;;  %v5587_v63 = vld [vmem:[%s8277_s3 + $0x10] ss:$8 sps:$4 sm:$0xff]  }
 0x2a6   : > { %3897 = vmatpush1.bf16.msra.mxu1 %v7852_v23  ;;  %v5585_v23 = vld [vmem:[%s8277_s3 + $0x14] ss:$8 sps:$4 sm:$0xff]  }
 0x2a7   : > { %3898 = vmatprep.subr.bf16.mxu1 %v7866_v8  ;;  %v5590_v8 = vld [vmem:[%s8277_s3 + $0x20] ss:$8 sps:$4 sm:$0xff]  }
 0x2aa   : > { %3899 = vmatpush1.bf16.msra.mxu1 %v7864_v14  ;;  %v5588_v14 = vld [vmem:[%s8277_s3 + $0x24] ss:$8 sps:$4 sm:$0xff]  }
 0x2ab   : > { %3900 = vmatprep.subr.bf16.mxu1 %v7878_v1  ;;  %v5593_v1 = vld [vmem:[%s8277_s3 + $0x30] ss:$8 sps:$4 sm:$0xff]  }
 0x2ae   : > { %3901 = vmatpush1.bf16.msra.mxu1 %v7876_v11  ;;  %v5591_v11 = vld [vmem:[%s8277_s3 + $0x34] ss:$8 sps:$4 sm:$0xff]  }
 0x2af   : > { %3902 = vmatprep.subr.bf16.mxu1 %v7890_v52  ;;  %v5596_v52 = vld [vmem:[%s8277_s3 + $0x40] ss:$8 sps:$4 sm:$0xff]  }
 0x2b2   : > { %3903 = vmatpush1.bf16.msra.mxu1 %v7888_v21  ;;  %v5594_v21 = vld [vmem:[%s8277_s3 + $0x44] ss:$8 sps:$4 sm:$0xff]  }
 0x2b3   : > { %3904 = vmatprep.subr.bf16.mxu1 %v7902_v18  ;;  %v5599_v18 = vld [vmem:[%s8277_s3 + $0x50] ss:$8 sps:$4 sm:$0xff]  }
 0x2b6   : > { %3905 = vmatpush1.bf16.msra.mxu1 %v7900_v39  ;;  %v5597_v39 = vld [vmem:[%s8277_s3 + $0x54] ss:$8 sps:$4 sm:$0xff]  }
 0x2b7   : > { %3906 = vmatprep.subr.bf16.mxu1 %v7914_v43  ;;  %v5602_v43 = vld [vmem:[%s8277_s3 + $0x60] ss:$8 sps:$4 sm:$0xff]  }
 0x2ba   : > { %3907 = vmatpush1.bf16.msra.mxu1 %v7912_v27  ;;  %v5600_v27 = vld [vmem:[%s8277_s3 + $0x64] ss:$8 sps:$4 sm:$0xff]  }
 0x2bb   : > { %3908 = vmatprep.subr.bf16.mxu1 %v3525_v38  ;;  %v3568_v38 = vpop.permute.xlu1 %3567 }
 0x2be   : > { %3909 = vmatpush1.bf16.msra.mxu1 %v3524_v20 }
 0x2bf   : > { %3910 = vmatprep.subr.bf16.mxu1 %v3527_v28  ;;  %v3578_v62 = vpop.permute.xlu1 %3577  ;;  %v3583_v28 = vpop.permute.xlu0 %3582 }
 0x2c2   : > { %3911 = vmatpush1.bf16.msra.mxu1 %v3526_v29 }
 0x2c5   : > { %3913 = vmatmul.mubr.bf16.vlgmr.msra.gmra.mrb[32].mxu1 %v5582_v57 }
 0x2c6   : > { %3922 = vmatprep.mubr.bf16.mxu1 %v5585_v23 }
 0x2cd   : > { %3923 = vmatmul.mubr.bf16.gmra.mrb[36].mxu1 %v5587_v63 }
 0x2ce   : > { %3932 = vmatprep.mubr.bf16.mxu1 %v5588_v14 }
 0x2d5   : > { %3933 = vmatmul.mubr.bf16.gmra.mrb[40].mxu1 %v5590_v8  ;;  %v3588_v8 = vpop.permute.xlu1 %3587 }
 0x2d6   : > { %3942 = vmatprep.mubr.bf16.mxu1 %v5591_v11 }
 0x2dd   : > { %3943 = vmatmul.mubr.bf16.gmra.mrb[44].mxu1 %v5593_v1 }
 0x2de   : > { %3952 = vmatprep.mubr.bf16.mxu1 %v5594_v21 }
 0x2e5   : > { %3953 = vmatmul.mubr.bf16.gmra.mrb[48].mxu1 %v5596_v52 }
 0x2e6   : > { %3962 = vmatprep.mubr.bf16.mxu1 %v5597_v39 }
 0x2ed   : > { %3963 = vmatmul.mubr.bf16.gmra.mrb[52].mxu1 %v5599_v18 }
 0x2ee   : > { %3972 = vmatprep.mubr.bf16.mxu1 %v5600_v27 }
 0x2f5   : > { %3973 = vmatmul.mubr.bf16.gmra.mrb[56].mxu1 %v5602_v43 }
 0x2f6   : > { %3982 = vmatprep.mubr.bf16.mxu1 %v5603_v7 }
 0x2fd   : > { %3983 = vmatmul.mubr.bf16.gmra.mrb[60].mxu1 %v5605_v33 }
 0x2fe   : > { %3992 = vmatprep.mubr.bf16.mxu1 %v5606_v48  ;;  %v3593_v48 = vpop.permute.xlu0 %3592 }
 0x305   : > { %3993 = vmatmul.mubr.bf16.gmra.mrb[64].mxu1 %v5608_v45 }
 0x306   : > { %4002 = vmatprep.mubr.bf16.mxu1 %v5609_v47 }
 0x30d   : > { %4003 = vmatmul.mubr.bf16.gmra.mrb[68].mxu1 %v5611_v26 }
 0x30e   : > { %4012 = vmatprep.mubr.bf16.mxu1 %v5612_v31 }
 0x315   : > { %4013 = vmatmul.mubr.bf16.gmra.mrb[72].mxu1 %v5614_v4  ;;  %v3598_v4 = vpop.permute.xlu1 %3597 }
 0x316   : > { %4022 = vmatprep.mubr.bf16.mxu1 %v5615_v46 }
 0x31d   : > { %4023 = vmatmul.mubr.bf16.gmra.mrb[76].mxu1 %v5617_v30 }
 0x31e   : > { %4032 = vmatprep.mubr.bf16.mxu1 %v5618_v32 }
 0x325   : > { %4033 = vmatmul.mubr.bf16.gmra.mrb[80].mxu1 %v5620_v36 }
 0x326   : > { %4042 = vmatprep.mubr.bf16.mxu1 %v5621_v16 }
 0x32d   : > { %4043 = vmatmul.mubr.bf16.gmra.mrb[84].mxu1 %v5623_v3 }
 0x32e   : > { %4052 = vmatprep.mubr.bf16.mxu1 %v5624_v0 }
 0x335   : > { %4053 = vmatmul.mubr.bf16.gmra.mrb[88].mxu1 %v5626_v35 }
 0x336   : > { %4062 = vmatprep.mubr.bf16.mxu1 %v5627_v59 }
 0x33d   : > { %4063 = vmatmul.mubr.bf16.gmra.mrb[92].mxu1 %v5629_v2 }
 0x398   : > { %v3914_v44 = vpop.f32.mrb[32].mxu1 }
 0x399   : > { %v3915_v20 = vadd.f32 %v3914_v44, %v3563_v55  ;;  %v3916_v17 = vpop.f32.mrb[33].mxu1 }
 0x39a   : > { %v3917_v42 = vadd.f32 %v3916_v17, %v3563_v55  ;;  %v3918_v5 = vpop.f32.mrb[34].mxu1  ;;  %v3603_v55 = vpop.permute.xlu0 %3602 }
 0x39b   : > { %v3919_v10 = vadd.f32 %v3918_v5, %v3568_v38  ;;  %v3920_v51 = vpop.f32.mrb[35].mxu1  ;;  %v4073_v9 = vmax.f32 %v3915_v20, 0.0 }
 0x39c   : > { %v3921_v58 = vadd.f32 %v3920_v51, %v3568_v38  ;;  %v4074_v15 = vmax.f32 %v3917_v42, 0.0  ;;  %v3608_v42 = vpop.permute.xlu1 %3607 }
 0x39d   : > { %v4075_v22 = vmax.f32 %v3919_v10, 0.0 }
 0x39e   : > { %v4076_v41 = vmax.f32 %v3921_v58, 0.0 }
 0x39f   : > { %v4169_v50 = vpack.c.bf16 %v4075_v22, %v4073_v9 }
 0x3a0   : > { %v4170_v53 = vpack.c.bf16 %v4076_v41, %v4074_v15  ;;  %v3924_v19 = vpop.f32.mrb[36].mxu1 }
 0x3a1   : > { %v3925_v60 = vadd.f32 %v3924_v19, %v3573_v40  ;;  %v3926_v34 = vpop.f32.mrb[37].mxu1 }
 0x3a2   : > { %v3927_v25 = vadd.f32 %v3926_v34, %v3573_v40  ;;  %v3928_v24 = vpop.f32.mrb[38].mxu1  ;;  %4553 = vmatprep.subr.bf16.mxu0 %v4170_v53  ;;  %v3613_v40 = vpop.permute.xlu0 %3612 }
 0x3a3   : > { %v3929_v13 = vadd.f32 %v3928_v24, %v3578_v62  ;;  %v3930_v54 = vpop.f32.mrb[39].mxu1  ;;  %4554 = vmatpush1.bf16.msra.mxu0 %v4169_v50  ;;  %v4077_v56 = vmax.f32 %v3925_v60, 0.0 }
 0x3a4   : > { %v3931_v49 = vadd.f32 %v3930_v54, %v3578_v62  ;;  %v4078_v37 = vmax.f32 %v3927_v25, 0.0  ;;  %v3618_v62 = vpop.permute.xlu1 %3617 }
 0x3a5   : > { %v4079_v12 = vmax.f32 %v3929_v13, 0.0 }
 0x3a6   : > { %v4080_v29 = vmax.f32 %v3931_v49, 0.0 }
 0x3a7   : > { %v4171_v6 = vpack.c.bf16 %v4079_v12, %v4077_v56 }
 0x3a8   : > { %v4172_v57 = vpack.c.bf16 %v4080_v29, %v4078_v37  ;;  %v3934_v23 = vpop.f32.mrb[40].mxu1 }
 0x3a9   : > { %v3935_v63 = vadd.f32 %v3934_v23, %v3583_v28  ;;  %v3936_v14 = vpop.f32.mrb[41].mxu1 }
 0x3aa   : > { %v3937_v11 = vadd.f32 %v3936_v14, %v3583_v28  ;;  %v3938_v1 = vpop.f32.mrb[42].mxu1  ;;  %4555 = vmatprep.subr.bf16.mxu0 %v4172_v57  ;;  %v3623_v28 = vpop.permute.xlu0 %3622 }
 0x3ab   : > { %v3939_v21 = vadd.f32 %v3938_v1, %v3588_v8  ;;  %v3940_v52 = vpop.f32.mrb[43].mxu1  ;;  %4556 = vmatpush1.bf16.msra.mxu0 %v4171_v6  ;;  %v4081_v18 = vmax.f32 %v3935_v63, 0.0 }
 0x3ac   : > { %v3941_v39 = vadd.f32 %v3940_v52, %v3588_v8  ;;  %v4082_v43 = vmax.f32 %v3937_v11, 0.0  ;;  %v3628_v8 = vpop.permute.xlu1 %3627 }
 0x3ad   : > { %v4083_v27 = vmax.f32 %v3939_v21, 0.0 }
 0x3ae   : > { %v4084_v7 = vmax.f32 %v3941_v39, 0.0 }
 0x3af   : > { %v4173_v33 = vpack.c.bf16 %v4083_v27, %v4081_v18 }
 0x3b0   : > { %v4174_v45 = vpack.c.bf16 %v4084_v7, %v4082_v43  ;;  %v3944_v47 = vpop.f32.mrb[44].mxu1 }
 0x3b1   : > { %v3945_v26 = vadd.f32 %v3944_v47, %v3593_v48  ;;  %v3946_v31 = vpop.f32.mrb[45].mxu1 }
 0x3b2   : > { %v3947_v46 = vadd.f32 %v3946_v31, %v3593_v48  ;;  %v3948_v30 = vpop.f32.mrb[46].mxu1  ;;  %4557 = vmatprep.subr.bf16.mxu0 %v4174_v45  ;;  %v3633_v48 = vpop.permute.xlu0 %3632 }
 0x3b3   : > { %v3949_v32 = vadd.f32 %v3948_v30, %v3598_v4  ;;  %v3950_v36 = vpop.f32.mrb[47].mxu1  ;;  %4558 = vmatpush1.bf16.msra.mxu0 %v4173_v33  ;;  %v4085_v3 = vmax.f32 %v3945_v26, 0.0 }
 0x3b4   : > { %v3951_v16 = vadd.f32 %v3950_v36, %v3598_v4  ;;  %v4086_v35 = vmax.f32 %v3947_v46, 0.0  ;;  %v3638_v4 = vpop.permute.xlu1 %3637 }
 0x3b5   : > { %v4087_v0 = vmax.f32 %v3949_v32, 0.0 }
 0x3b6   : > { %v4088_v59 = vmax.f32 %v3951_v16, 0.0 }
 0x3b7   : > { %v4175_v2 = vpack.c.bf16 %v4087_v0, %v4085_v3 }
 0x3b8   : > { %v4176_v44 = vpack.c.bf16 %v4088_v59, %v4086_v35  ;;  %v3954_v20 = vpop.f32.mrb[48].mxu1 }
 0x3b9   : > { %v3955_v17 = vadd.f32 %v3954_v20, %v3603_v55  ;;  %v3956_v38 = vpop.f32.mrb[49].mxu1 }
 0x3ba   : > { %v3957_v5 = vadd.f32 %v3956_v38, %v3603_v55  ;;  %v3958_v10 = vpop.f32.mrb[50].mxu1  ;;  %4559 = vmatprep.subr.bf16.mxu0 %v4176_v44  ;;  %v3643_v55 = vpop.permute.xlu0 %3642 }
 0x3bb   : > { %v3959_v51 = vadd.f32 %v3958_v10, %v3608_v42  ;;  %v3960_v61 = vpop.f32.mrb[51].mxu1  ;;  %4560 = vmatpush1.bf16.msra.mxu0 %v4175_v2  ;;  %v4089_v9 = vmax.f32 %v3955_v17, 0.0 }
 0x3bc   : > { %v3961_v58 = vadd.f32 %v3960_v61, %v3608_v42  ;;  %v4090_v15 = vmax.f32 %v3957_v5, 0.0  ;;  %v3648_v42 = vpop.permute.xlu1 %3647 }
 0x3bd   : > { %v4091_v22 = vmax.f32 %v3959_v51, 0.0 }
 0x3be   : > { %v4092_v41 = vmax.f32 %v3961_v58, 0.0 }
 0x3bf   : > { %v4177_v50 = vpack.c.bf16 %v4091_v22, %v4089_v9 }
 0x3c0   : > { %v4178_v53 = vpack.c.bf16 %v4092_v41, %v4090_v15  ;;  %v3964_v19 = vpop.f32.mrb[52].mxu1 }
 0x3c1   : > { %v3965_v60 = vadd.f32 %v3964_v19, %v3613_v40  ;;  %v3966_v34 = vpop.f32.mrb[53].mxu1 }
 0x3c2   : > { %v3967_v25 = vadd.f32 %v3966_v34, %v3613_v40  ;;  %v3968_v24 = vpop.f32.mrb[54].mxu1  ;;  %4561 = vmatprep.subr.bf16.mxu0 %v4178_v53  ;;  %v3653_v40 = vpop.permute.xlu0 %3652 }
 0x3c3   : > { %v3969_v13 = vadd.f32 %v3968_v24, %v3618_v62  ;;  %v3970_v54 = vpop.f32.mrb[55].mxu1  ;;  %4562 = vmatpush1.bf16.msra.mxu0 %v4177_v50  ;;  %v4093_v56 = vmax.f32 %v3965_v60, 0.0 }
 0x3c4   : > { %v3971_v49 = vadd.f32 %v3970_v54, %v3618_v62  ;;  %v4094_v37 = vmax.f32 %v3967_v25, 0.0  ;;  %v3658_v62 = vpop.permute.xlu1 %3657 }
 0x3c5   : > { %v4095_v12 = vmax.f32 %v3969_v13, 0.0 }
 0x3c6   : > { %v4096_v29 = vmax.f32 %v3971_v49, 0.0 }
 0x3c7   : > { %v4179_v6 = vpack.c.bf16 %v4095_v12, %v4093_v56 }
 0x3c8   : > { %v4180_v57 = vpack.c.bf16 %v4096_v29, %v4094_v37  ;;  %v3974_v23 = vpop.f32.mrb[56].mxu1 }
 0x3c9   : > { %v3975_v63 = vadd.f32 %v3974_v23, %v3623_v28  ;;  %v3976_v14 = vpop.f32.mrb[57].mxu1 }
 0x3ca   : > { %v3977_v11 = vadd.f32 %v3976_v14, %v3623_v28  ;;  %v3978_v1 = vpop.f32.mrb[58].mxu1  ;;  %4563 = vmatprep.subr.bf16.mxu0 %v4180_v57  ;;  %v3663_v28 = vpop.permute.xlu0 %3662 }
 0x3cb   : > { %v3979_v21 = vadd.f32 %v3978_v1, %v3628_v8  ;;  %v3980_v52 = vpop.f32.mrb[59].mxu1  ;;  %4564 = vmatpush1.bf16.msra.mxu0 %v4179_v6  ;;  %v4097_v18 = vmax.f32 %v3975_v63, 0.0 }
 0x3cc   : > { %v3981_v39 = vadd.f32 %v3980_v52, %v3628_v8  ;;  %v4098_v43 = vmax.f32 %v3977_v11, 0.0  ;;  %v3668_v8 = vpop.permute.xlu1 %3667 }
 0x3cd   : > { %v4099_v27 = vmax.f32 %v3979_v21, 0.0 }
 0x3ce   : > { %v4100_v7 = vmax.f32 %v3981_v39, 0.0 }
 0x3cf   : > { %v4181_v33 = vpack.c.bf16 %v4099_v27, %v4097_v18 }
 0x3d0   : > { %v4182_v45 = vpack.c.bf16 %v4100_v7, %v4098_v43  ;;  %v3984_v47 = vpop.f32.mrb[60].mxu1 }
 0x3d1   : > { %v3985_v26 = vadd.f32 %v3984_v47, %v3633_v48  ;;  %v3986_v31 = vpop.f32.mrb[61].mxu1 }
 0x3d2   : > { %v3987_v46 = vadd.f32 %v3986_v31, %v3633_v48  ;;  %v3988_v30 = vpop.f32.mrb[62].mxu1  ;;  %4565 = vmatprep.subr.bf16.mxu0 %v4182_v45  ;;  %v3673_v48 = vpop.permute.xlu0 %3672 }
 0x3d3   : > { %v3989_v32 = vadd.f32 %v3988_v30, %v3638_v4  ;;  %v3990_v36 = vpop.f32.mrb[63].mxu1  ;;  %4566 = vmatpush1.bf16.msra.mxu0 %v4181_v33  ;;  %v4101_v3 = vmax.f32 %v3985_v26, 0.0 }
 0x3d4   : > { %v3991_v16 = vadd.f32 %v3990_v36, %v3638_v4  ;;  %v4102_v35 = vmax.f32 %v3987_v46, 0.0  ;;  %v3678_v4 = vpop.permute.xlu1 %3677 }
 0x3d5   : > { %v4103_v0 = vmax.f32 %v3989_v32, 0.0 }
 0x3d6   : > { %v4104_v59 = vmax.f32 %v3991_v16, 0.0 }
 0x3d7   : > { %v4183_v2 = vpack.c.bf16 %v4103_v0, %v4101_v3 }
 0x3d8   : > { %v4184_v44 = vpack.c.bf16 %v4104_v59, %v4102_v35  ;;  %v3994_v20 = vpop.f32.mrb[64].mxu1 }
 0x3d9   : > { %v3995_v17 = vadd.f32 %v3994_v20, %v3643_v55  ;;  %v3996_v38 = vpop.f32.mrb[65].mxu1 }
 0x3da   : > { %v3997_v5 = vadd.f32 %v3996_v38, %v3643_v55  ;;  %v3998_v10 = vpop.f32.mrb[66].mxu1  ;;  %4567 = vmatprep.subr.bf16.mxu0 %v4184_v44  ;;  %v3683_v55 = vpop.permute.xlu0 %3682 }
 0x3db   : > { %v3999_v51 = vadd.f32 %v3998_v10, %v3648_v42  ;;  %v4000_v61 = vpop.f32.mrb[67].mxu1  ;;  %4568 = vmatpush1.bf16.msra.mxu0 %v4183_v2  ;;  %v4105_v9 = vmax.f32 %v3995_v17, 0.0 }
 0x3dc   : > { %v4001_v58 = vadd.f32 %v4000_v61, %v3648_v42  ;;  %v4106_v15 = vmax.f32 %v3997_v5, 0.0  ;;  %v3688_v42 = vpop.permute.xlu1 %3687 }
 0x3dd   : > { %v4107_v22 = vmax.f32 %v3999_v51, 0.0 }
 0x3de   : > { %v4108_v41 = vmax.f32 %v4001_v58, 0.0 }
 0x3df   : > { %v4185_v50 = vpack.c.bf16 %v4107_v22, %v4105_v9 }
 0x3e0   : > { %v4186_v53 = vpack.c.bf16 %v4108_v41, %v4106_v15  ;;  %v4004_v19 = vpop.f32.mrb[68].mxu1 }
 0x3e1   : > { %v4005_v60 = vadd.f32 %v4004_v19, %v3653_v40  ;;  %v4006_v34 = vpop.f32.mrb[69].mxu1 }
 0x3e2   : > { %v4007_v25 = vadd.f32 %v4006_v34, %v3653_v40  ;;  %v4008_v24 = vpop.f32.mrb[70].mxu1  ;;  %4569 = vmatprep.subr.bf16.mxu0 %v4186_v53  ;;  %v3693_v40 = vpop.permute.xlu0 %3692 }
 0x3e3   : > { %v4009_v13 = vadd.f32 %v4008_v24, %v3658_v62  ;;  %v4010_v54 = vpop.f32.mrb[71].mxu1  ;;  %4570 = vmatpush1.bf16.msra.mxu0 %v4185_v50  ;;  %v4109_v56 = vmax.f32 %v4005_v60, 0.0 }
 0x3e4   : > { %v4011_v49 = vadd.f32 %v4010_v54, %v3658_v62  ;;  %v4110_v37 = vmax.f32 %v4007_v25, 0.0  ;;  %v3698_v62 = vpop.permute.xlu1 %3697 }
 0x3e5   : > { %v4111_v12 = vmax.f32 %v4009_v13, 0.0 }
 0x3e6   : > { %v4112_v29 = vmax.f32 %v4011_v49, 0.0 }
 0x3e7   : > { %v4187_v6 = vpack.c.bf16 %v4111_v12, %v4109_v56 }
 0x3e8   : > { %v4188_v57 = vpack.c.bf16 %v4112_v29, %v4110_v37  ;;  %v4014_v23 = vpop.f32.mrb[72].mxu1 }
 0x3e9   : > { %v4015_v63 = vadd.f32 %v4014_v23, %v3663_v28  ;;  %v4016_v14 = vpop.f32.mrb[73].mxu1 }
 0x3ea   : > { %v4017_v11 = vadd.f32 %v4016_v14, %v3663_v28  ;;  %v4018_v1 = vpop.f32.mrb[74].mxu1  ;;  %4571 = vmatprep.subr.bf16.mxu0 %v4188_v57  ;;  %v3703_v28 = vpop.permute.xlu0 %3702 }
 0x3eb   : > { %v4019_v21 = vadd.f32 %v4018_v1, %v3668_v8  ;;  %v4020_v52 = vpop.f32.mrb[75].mxu1  ;;  %4572 = vmatpush1.bf16.msra.mxu0 %v4187_v6  ;;  %v4113_v18 = vmax.f32 %v4015_v63, 0.0 }
 0x3ec   : > { %v4021_v39 = vadd.f32 %v4020_v52, %v3668_v8  ;;  %v4114_v43 = vmax.f32 %v4017_v11, 0.0  ;;  %v3708_v8 = vpop.permute.xlu1 %3707 }
 0x3ed   : > { %v4115_v27 = vmax.f32 %v4019_v21, 0.0 }
 0x3ee   : > { %v4116_v7 = vmax.f32 %v4021_v39, 0.0 }
 0x3ef   : > { %v4189_v33 = vpack.c.bf16 %v4115_v27, %v4113_v18 }
 0x3f0   : > { %v4190_v45 = vpack.c.bf16 %v4116_v7, %v4114_v43  ;;  %v4024_v47 = vpop.f32.mrb[76].mxu1 }
 0x3f1   : > { %v4025_v26 = vadd.f32 %v4024_v47, %v3673_v48  ;;  %v4026_v31 = vpop.f32.mrb[77].mxu1 }
 0x3f2   : > { %v4027_v46 = vadd.f32 %v4026_v31, %v3673_v48  ;;  %v4028_v30 = vpop.f32.mrb[78].mxu1  ;;  %4573 = vmatprep.subr.bf16.mxu0 %v4190_v45  ;;  %v3713_v48 = vpop.permute.xlu0 %3712 }
 0x3f3   : > { %v4029_v32 = vadd.f32 %v4028_v30, %v3678_v4  ;;  %v4030_v36 = vpop.f32.mrb[79].mxu1  ;;  %4574 = vmatpush1.bf16.msra.mxu0 %v4189_v33  ;;  %v4117_v3 = vmax.f32 %v4025_v26, 0.0 }
 0x3f4   : > { %v4031_v16 = vadd.f32 %v4030_v36, %v3678_v4  ;;  %v4118_v35 = vmax.f32 %v4027_v46, 0.0  ;;  %v3718_v4 = vpop.permute.xlu1 %3717 }
 0x3f5   : > { %v4119_v0 = vmax.f32 %v4029_v32, 0.0 }
 0x3f6   : > { %v4120_v59 = vmax.f32 %v4031_v16, 0.0 }
 0x3f7   : > { %v4191_v2 = vpack.c.bf16 %v4119_v0, %v4117_v3 }
 0x3f8   : > { %v4192_v44 = vpack.c.bf16 %v4120_v59, %v4118_v35  ;;  %v4034_v20 = vpop.f32.mrb[80].mxu1 }
 0x3f9   : > { %v4035_v17 = vadd.f32 %v4034_v20, %v3683_v55  ;;  %v4036_v38 = vpop.f32.mrb[81].mxu1  ;;  %v5633_v20 = vld [vmem:[%s8279_s5 + $0x14] ss:$8 sps:$4 sm:$0xff]  }
 0x3fa   : > { %v4037_v5 = vadd.f32 %v4036_v38, %v3683_v55  ;;  %v4038_v10 = vpop.f32.mrb[82].mxu1  ;;  %4575 = vmatprep.subr.bf16.mxu0 %v4192_v44  ;;  %v5630_v44 = vld [vmem:[%s8279_s5] ss:$8 sps:$4 sm:$0xff]   ;;  %v5636_v38 = vld [vmem:[%s8279_s5 + $0x24] ss:$8 sps:$4 sm:$0xff]  }
 0x3fb   : > { %v4039_v51 = vadd.f32 %v4038_v10, %v3688_v42  ;;  %v4040_v61 = vpop.f32.mrb[83].mxu1  ;;  %4576 = vmatpush1.bf16.msra.mxu0 %v4191_v2  ;;  %v4121_v9 = vmax.f32 %v4035_v17, 0.0  ;;  %v5635_v17 = vld [vmem:[%s8279_s5 + $0x10] ss:$8 sps:$4 sm:$0xff]  }
 0x3fc   : > { %v4041_v58 = vadd.f32 %v4040_v61, %v3688_v42  ;;  %v4122_v15 = vmax.f32 %v4037_v5, 0.0  ;;  %v5638_v42 = vld [vmem:[%s8279_s5 + $0x20] ss:$8 sps:$4 sm:$0xff]   ;;  %v5639_v5 = vld [vmem:[%s8279_s5 + $0x34] ss:$8 sps:$4 sm:$0xff]  }
 0x3fd   : > { %v4123_v22 = vmax.f32 %v4039_v51, 0.0  ;;  %v5641_v10 = vld [vmem:[%s8279_s5 + $0x30] ss:$8 sps:$4 sm:$0xff]   ;;  %v5642_v51 = vld [vmem:[%s8279_s5 + $0x44] ss:$8 sps:$4 sm:$0xff]  }
 0x3fe   : > { %v4124_v41 = vmax.f32 %v4041_v58, 0.0  ;;  %v5644_v61 = vld [vmem:[%s8279_s5 + $0x40] ss:$8 sps:$4 sm:$0xff]   ;;  %v5645_v58 = vld [vmem:[%s8279_s5 + $0x54] ss:$8 sps:$4 sm:$0xff]  }
 0x3ff   : > { %v4193_v50 = vpack.c.bf16 %v4123_v22, %v4121_v9  ;;  %v5647_v9 = vld [vmem:[%s8279_s5 + $0x50] ss:$8 sps:$4 sm:$0xff]   ;;  %v5648_v22 = vld [vmem:[%s8279_s5 + $0x64] ss:$8 sps:$4 sm:$0xff]  }
 0x400   : > { %v4194_v53 = vpack.c.bf16 %v4124_v41, %v4122_v15  ;;  %v4044_v19 = vpop.f32.mrb[84].mxu1  ;;  %v5650_v15 = vld [vmem:[%s8279_s5 + $0x60] ss:$8 sps:$4 sm:$0xff]   ;;  %v5651_v41 = vld [vmem:[%s8279_s5 + $0x74] ss:$8 sps:$4 sm:$0xff]  }
 0x401   : > { %v4045_v60 = vadd.f32 %v4044_v19, %v3693_v40  ;;  %v4046_v34 = vpop.f32.mrb[85].mxu1  ;;  %v5657_v19 = vld [vmem:[%s8279_s5 + $0x94] ss:$8 sps:$4 sm:$0xff]  }
 0x402   : > { %v4047_v25 = vadd.f32 %v4046_v34, %v3693_v40  ;;  %v4048_v24 = vpop.f32.mrb[86].mxu1  ;;  %4577 = vmatprep.subr.bf16.mxu0 %v4194_v53  ;;  %v5654_v40 = vld [vmem:[%s8279_s5 + $0x84] ss:$8 sps:$4 sm:$0xff]   ;;  %v5656_v53 = vld [vmem:[%s8279_s5 + $0x80] ss:$8 sps:$4 sm:$0xff]  }
 0x403   : > { %v4049_v13 = vadd.f32 %v4048_v24, %v3698_v62  ;;  %v4050_v54 = vpop.f32.mrb[87].mxu1  ;;  %4578 = vmatpush1.bf16.msra.mxu0 %v4193_v50  ;;  %v4125_v56 = vmax.f32 %v4045_v60, 0.0  ;;  %v5653_v50 = vld [vmem:[%s8279_s5 + $0x70] ss:$8 sps:$4 sm:$0xff]   ;;  %v5660_v34 = vld [vmem:[%s8279_s5 + $0xa4] ss:$8 sps:$4 sm:$0xff]  }
 0x404   : > { %v4051_v49 = vadd.f32 %v4050_v54, %v3698_v62  ;;  %v4126_v37 = vmax.f32 %v4047_v25, 0.0  ;;  %v5659_v60 = vld [vmem:[%s8279_s5 + $0x90] ss:$8 sps:$4 sm:$0xff]   ;;  %v5662_v62 = vld [vmem:[%s8279_s5 + $0xa0] ss:$8 sps:$4 sm:$0xff]  }
 0x405   : > { %v4127_v12 = vmax.f32 %v4049_v13, 0.0  ;;  %v5663_v25 = vld [vmem:[%s8279_s5 + $0xb4] ss:$8 sps:$4 sm:$0xff]   ;;  %v5665_v24 = vld [vmem:[%s8279_s5 + $0xb0] ss:$8 sps:$4 sm:$0xff]  }
 0x406   : > { %v4128_v29 = vmax.f32 %v4051_v49, 0.0  ;;  %v5666_v13 = vld [vmem:[%s8279_s5 + $0xc4] ss:$8 sps:$4 sm:$0xff]   ;;  %v5668_v54 = vld [vmem:[%s8279_s5 + $0xc0] ss:$8 sps:$4 sm:$0xff]  }
 0x407   : > { %v4195_v6 = vpack.c.bf16 %v4127_v12, %v4125_v56  ;;  %v5669_v49 = vld [vmem:[%s8279_s5 + $0xd4] ss:$8 sps:$4 sm:$0xff]   ;;  %v5671_v56 = vld [vmem:[%s8279_s5 + $0xd0] ss:$8 sps:$4 sm:$0xff]   ;;  %v5672_v12 = vld [vmem:[%s8279_s5 + $0xe4] ss:$8 sps:$4 sm:$0xff]  }
 0x408   : > { %v4196_v57 = vpack.c.bf16 %v4128_v29, %v4126_v37  ;;  %v4054_v23 = vpop.f32.mrb[88].mxu1  ;;  %v5674_v37 = vld [vmem:[%s8279_s5 + $0xe0] ss:$8 sps:$4 sm:$0xff]   ;;  %v5675_v29 = vld [vmem:[%s8279_s5 + $0xf4] ss:$8 sps:$4 sm:$0xff]  }
 0x409   : > { %v4055_v63 = vadd.f32 %v4054_v23, %v3703_v28  ;;  %v4056_v14 = vpop.f32.mrb[89].mxu1 }
 0x40a   : > { %v4057_v11 = vadd.f32 %v4056_v14, %v3703_v28  ;;  %v4058_v1 = vpop.f32.mrb[90].mxu1  ;;  %4579 = vmatprep.subr.bf16.mxu0 %v4196_v57  ;;  %v4241_v28 = vpop.permute.xlu1 %4240 }
 0x40b   : > { %v4059_v21 = vadd.f32 %v4058_v1, %v3708_v8  ;;  %v4060_v52 = vpop.f32.mrb[91].mxu1  ;;  %4580 = vmatpush1.bf16.msra.mxu0 %v4195_v6  ;;  %v4129_v18 = vmax.f32 %v4055_v63, 0.0  ;;  %v5677_v6 = vld [vmem:[%s8279_s5 + $0xf0] ss:$8 sps:$4 sm:$0xff]   ;;  %v4236_v57 = vpop.permute.xlu0 %4235 }
 0x40c   : > { %v4061_v39 = vadd.f32 %v4060_v52, %v3708_v8  ;;  %v4130_v43 = vmax.f32 %v4057_v11, 0.0 }
 0x40d   : > { %v4131_v27 = vmax.f32 %v4059_v21, 0.0 }
 0x40e   : > { %v4132_v7 = vmax.f32 %v4061_v39, 0.0  ;;  %v4251_v23 = vpop.permute.xlu1 %4250 }
 0x40f   : > { %v4197_v33 = vpack.c.bf16 %v4131_v27, %v4129_v18  ;;  %v4246_v63 = vpop.permute.xlu0 %4245 }
 0x410   : > { %v4198_v45 = vpack.c.bf16 %v4132_v7, %v4130_v43  ;;  %v4064_v47 = vpop.f32.mrb[92].mxu1 }
 0x411   : > { %v4065_v26 = vadd.f32 %v4064_v47, %v3713_v48  ;;  %v4066_v31 = vpop.f32.mrb[93].mxu1 }
 0x412   : > { %v4067_v46 = vadd.f32 %v4066_v31, %v3713_v48  ;;  %v4068_v30 = vpop.f32.mrb[94].mxu1  ;;  %4581 = vmatprep.subr.bf16.mxu0 %v4198_v45  ;;  %v8131_v14 = vpop.permute.xlu1 %4260 }
 0x413   : > { %v4069_v32 = vadd.f32 %v4068_v30, %v3718_v4  ;;  %v4070_v36 = vpop.f32.mrb[95].mxu1  ;;  %4582 = vmatpush1.bf16.msra.mxu0 %v4197_v33  ;;  %v4133_v3 = vmax.f32 %v4065_v26, 0.0  ;;  %v8133_v8 = vpop.permute.xlu0 %4255 }
 0x414   : > { %v4071_v16 = vadd.f32 %v4070_v36, %v3718_v4  ;;  %v4134_v35 = vmax.f32 %v4067_v46, 0.0 }
 0x415   : > { %v4135_v0 = vmax.f32 %v4069_v32, 0.0 }
 0x416   : > { %v4136_v59 = vmax.f32 %v4071_v16, 0.0  ;;  %v8135_v11 = vpop.permute.xlu1 %4270 }
 0x417   : > { %v4199_v2 = vpack.c.bf16 %v4135_v0, %v4133_v3  ;;  %v8137_v1 = vpop.permute.xlu0 %4265 }
 0x418   : > { %v4200_v55 = vpack.c.bf16 %v4136_v59, %v4134_v35 }
 0x41a   : > { %4583 = vmatprep.subr.bf16.mxu0 %v4200_v55  ;;  %v8139_v21 = vpop.permute.xlu1 %4280 }
 0x41b   : > { %4584 = vmatpush1.bf16.msra.mxu0 %v4199_v2  ;;  %v8141_v52 = vpop.permute.xlu0 %4275 }
 0x41e   : > { %4586 = vmatmul.mubr.bf16.vlgmr.msra.gmra.mrb[32].mxu0 %v5630_v44  ;;  %v8143_v39 = vpop.permute.xlu1 %4290 }
 0x41f   : > { %4595 = vmatprep.mubr.bf16.mxu0 %v5633_v20  ;;  %v8145_v18 = vpop.permute.xlu0 %4285 }
 0x422   : > { %v8147_v27 = vpop.permute.xlu1 %4300 }
 0x423   : > { %v8149_v43 = vpop.permute.xlu0 %4295 }
 0x426   : > { %4596 = vmatmul.mubr.bf16.gmra.mrb[36].mxu0 %v5635_v17  ;;  %v8151_v7 = vpop.permute.xlu1 %4310 }
 0x427   : > { %4605 = vmatprep.mubr.bf16.mxu0 %v5636_v38  ;;  %v8153_v33 = vpop.permute.xlu0 %4305 }
 0x42a   : > { %v8155_v48 = vpop.permute.xlu1 %4320 }
 0x42b   : > { %v8157_v45 = vpop.permute.xlu0 %4315 }
 0x42e   : > { %4606 = vmatmul.mubr.bf16.gmra.mrb[40].mxu0 %v5638_v42  ;;  %v8159_v47 = vpop.permute.xlu1 %4330 }
 0x42f   : > { %4615 = vmatprep.mubr.bf16.mxu0 %v5639_v5  ;;  %v8161_v26 = vpop.permute.xlu0 %4325 }
 0x432   : > { %v8163_v31 = vpop.permute.xlu1 %4340 }
 0x433   : > { %v8165_v4 = vpop.permute.xlu0 %4335 }
 0x436   : > { %4616 = vmatmul.mubr.bf16.gmra.mrb[44].mxu0 %v5641_v10  ;;  %v8167_v46 = vpop.permute.xlu1 %4350 }
 0x437   : > { %4625 = vmatprep.mubr.bf16.mxu0 %v5642_v51  ;;  %v8169_v30 = vpop.permute.xlu0 %4345 }
 0x43a   : > { %v8171_v32 = vpop.permute.xlu1 %4360 }
 0x43b   : > { %v8173_v36 = vpop.permute.xlu0 %4355 }
 0x43e   : > { %4626 = vmatmul.mubr.bf16.gmra.mrb[48].mxu0 %v5644_v61  ;;  %v8175_v16 = vpop.permute.xlu1 %4370 }
 0x43f   : > { %4635 = vmatprep.mubr.bf16.mxu0 %v5645_v58  ;;  %v8177_v3 = vpop.permute.xlu0 %4365 }
 0x442   : > { %v4850_v10 = vpop.permute.xlu1 %4849 }
 0x443   : > { %v4845_v51 = vpop.permute.xlu0 %4844 }
 0x446   : > { %4636 = vmatmul.mubr.bf16.gmra.mrb[52].mxu0 %v5647_v9 }
 0x447   : > { %4645 = vmatprep.mubr.bf16.mxu0 %v5648_v22 }
 0x44e   : > { %4646 = vmatmul.mubr.bf16.gmra.mrb[56].mxu0 %v5650_v15 }
 0x44f   : > { %4655 = vmatprep.mubr.bf16.mxu0 %v5651_v41 }
 0x456   : > { %4656 = vmatmul.mubr.bf16.gmra.mrb[60].mxu0 %v5653_v50 }
 0x457   : > { %4665 = vmatprep.mubr.bf16.mxu0 %v5654_v40 }
 0x45e   : > { %4666 = vmatmul.mubr.bf16.gmra.mrb[64].mxu0 %v5656_v53 }
 0x45f   : > { %4675 = vmatprep.mubr.bf16.mxu0 %v5657_v19 }
 0x466   : > { %4676 = vmatmul.mubr.bf16.gmra.mrb[68].mxu0 %v5659_v60 }
 0x467   : > { %4685 = vmatprep.mubr.bf16.mxu0 %v5660_v34 }
 0x46e   : > { %4686 = vmatmul.mubr.bf16.gmra.mrb[72].mxu0 %v5662_v62 }
 0x46f   : > { %4695 = vmatprep.mubr.bf16.mxu0 %v5663_v25 }
 0x476   : > { %4696 = vmatmul.mubr.bf16.gmra.mrb[76].mxu0 %v5665_v24 }
 0x477   : > { %4705 = vmatprep.mubr.bf16.mxu0 %v5666_v13  ;;  %v4855_v13 = vpop.permute.xlu0 %4854 }
 0x47e   : > { %4706 = vmatmul.mubr.bf16.gmra.mrb[80].mxu0 %v5668_v54 }
 0x47f   : > { %4715 = vmatprep.mubr.bf16.mxu0 %v5669_v49 }
 0x486   : > { %4716 = vmatmul.mubr.bf16.gmra.mrb[84].mxu0 %v5671_v56 }
 0x487   : > { %4725 = vmatprep.mubr.bf16.mxu0 %v5672_v12 }
 0x48e   : > { %4726 = vmatmul.mubr.bf16.gmra.mrb[88].mxu0 %v5674_v37  ;;  %v4860_v37 = vpop.permute.xlu1 %4859 }
 0x48f   : > { %4735 = vmatprep.mubr.bf16.mxu0 %v5675_v29 }
 0x496   : > { %4736 = vmatmul.mubr.bf16.gmra.mrb[92].mxu0 %v5677_v6 }
 0x4f1   : > { %v4587_v0 = vpop.f32.mrb[32].mxu0 }
 0x4f2   : > { %v4588_v35 = vadd.f32 %v4587_v0, %v4236_v57  ;;  %v4589_v59 = vpop.f32.mrb[33].mxu0 }
 0x4f3   : > { %v4590_v2 = vadd.f32 %v4589_v59, %v4236_v57  ;;  %v4591_v55 = vpop.f32.mrb[34].mxu0 }
 0x4f4   : > { %v4746_v44 = vmax.f32 %v4588_v35, 0.0  ;;  %v4592_v20 = vadd.f32 %v4591_v55, %v4241_v28  ;;  %v4593_v17 = vpop.f32.mrb[35].mxu0 }
 0x4f5   : > { %v4747_v38 = vmax.f32 %v4590_v2, 0.0  ;;  %v4594_v42 = vadd.f32 %v4593_v17, %v4241_v28 }
 0x4f6   : > { %v4748_v5 = vmax.f32 %v4592_v20, 0.0  ;;  %v5002_v58 = vmul.f32 %v4845_v51, %v4746_v44 }
 0x4f7   : > { %v4749_v61 = vmax.f32 %v4594_v42, 0.0  ;;  %v5003_v22 = vmul.f32 %v4845_v51, %v4747_v38 }
 0x4f8   : > { %v5004_v9 = vmul.f32 %v4850_v10, %v4748_v5  ;;  %v4865_v5 = vpop.permute.xlu0 %4864 }
 0x4f9   : > { %v5005_v15 = vmul.f32 %v4850_v10, %v4749_v61  ;;  %v4597_v41 = vpop.f32.mrb[36].mxu0 }
 0x4fa   : > { %v5066_v50 = vadd.f32 %v5004_v9, %v5002_v58  ;;  %v4598_v40 = vadd.f32 %v4597_v41, %v4246_v63  ;;  %v4599_v53 = vpop.f32.mrb[37].mxu0  ;;  %v4870_v9 = vpop.permute.xlu1 %4869 }
 0x4fb   : > { %v5103_v19 = vadd.f32 %v5005_v15, %v5003_v22  ;;  %v4600_v60 = vadd.f32 %v4599_v53, %v4246_v63  ;;  %v4601_v34 = vpop.f32.mrb[38].mxu0 }
 0x4fc   : > { %v4750_v62 = vmax.f32 %v4598_v40, 0.0  ;;  %v4602_v25 = vadd.f32 %v4601_v34, %v4251_v23  ;;  %v4603_v24 = vpop.f32.mrb[39].mxu0 }
 0x4fd   : > { %v4751_v54 = vmax.f32 %v4600_v60, 0.0  ;;  %v4604_v49 = vadd.f32 %v4603_v24, %v4251_v23 }
 0x4fe   : > { %v5006_v56 = vmul.f32 %v4855_v13, %v4750_v62  ;;  %v4752_v12 = vmax.f32 %v4602_v25, 0.0 }
 0x4ff   : > { %v5007_v29 = vmul.f32 %v4855_v13, %v4751_v54  ;;  %v4753_v6 = vmax.f32 %v4604_v49, 0.0  ;;  %v4875_v49 = vpop.permute.xlu0 %4874 }
 0x500   : > { %v5067_v28 = vadd.f32 %v5066_v50, %v5006_v56  ;;  %v5008_v57 = vmul.f32 %v4860_v37, %v4752_v12 }
 0x501   : > { %v5104_v0 = vadd.f32 %v5103_v19, %v5007_v29  ;;  %v5009_v35 = vmul.f32 %v4860_v37, %v4753_v6  ;;  %v4607_v59 = vpop.f32.mrb[40].mxu0  ;;  %v4880_v6 = vpop.permute.xlu1 %4879 }
 0x502   : > { %v5068_v2 = vadd.f32 %v5067_v28, %v5008_v57  ;;  %v4608_v63 = vadd.f32 %v4607_v59, %v8133_v8  ;;  %v4609_v55 = vpop.f32.mrb[41].mxu0 }
 0x503   : > { %v5105_v44 = vadd.f32 %v5104_v0, %v5009_v35  ;;  %v4610_v20 = vadd.f32 %v4609_v55, %v8133_v8  ;;  %v4611_v17 = vpop.f32.mrb[42].mxu0 }
 0x504   : > { %v4754_v38 = vmax.f32 %v4608_v63, 0.0  ;;  %v4612_v23 = vadd.f32 %v4611_v17, %v8131_v14  ;;  %v4613_v42 = vpop.f32.mrb[43].mxu0 }
 0x505   : > { %v4755_v10 = vmax.f32 %v4610_v20, 0.0  ;;  %v4614_v51 = vadd.f32 %v4613_v42, %v8131_v14 }
 0x506   : > { %v5010_v61 = vmul.f32 %v4865_v5, %v4754_v38  ;;  %v4756_v58 = vmax.f32 %v4612_v23, 0.0 }
 0x507   : > { %v5011_v22 = vmul.f32 %v4865_v5, %v4755_v10  ;;  %v4757_v15 = vmax.f32 %v4614_v51, 0.0  ;;  %v4885_v5 = vpop.permute.xlu0 %4884 }
 0x508   : > { %v5069_v41 = vadd.f32 %v5068_v2, %v5010_v61  ;;  %v5012_v50 = vmul.f32 %v4870_v9, %v4756_v58 }
 0x509   : > { %v5106_v40 = vadd.f32 %v5105_v44, %v5011_v22  ;;  %v5013_v53 = vmul.f32 %v4870_v9, %v4757_v15  ;;  %v4617_v19 = vpop.f32.mrb[44].mxu0  ;;  %v4890_v9 = vpop.permute.xlu1 %4889 }
 0x50a   : > { %v5070_v8 = vadd.f32 %v5069_v41, %v5012_v50  ;;  %v4618_v60 = vadd.f32 %v4617_v19, %v8137_v1  ;;  %v4619_v34 = vpop.f32.mrb[45].mxu0 }
 0x50b   : > { %v5107_v62 = vadd.f32 %v5106_v40, %v5013_v53  ;;  %v4620_v25 = vadd.f32 %v4619_v34, %v8137_v1  ;;  %v4621_v24 = vpop.f32.mrb[46].mxu0 }
 0x50c   : > { %v4758_v13 = vmax.f32 %v4618_v60, 0.0  ;;  %v4622_v14 = vadd.f32 %v4621_v24, %v8135_v11  ;;  %v4623_v54 = vpop.f32.mrb[47].mxu0 }
 0x50d   : > { %v4759_v56 = vmax.f32 %v4620_v25, 0.0  ;;  %v4624_v12 = vadd.f32 %v4623_v54, %v8135_v11 }
 0x50e   : > { %v5014_v37 = vmul.f32 %v4875_v49, %v4758_v13  ;;  %v4760_v29 = vmax.f32 %v4622_v14, 0.0  ;;  %v4895_v14 = vpop.permute.xlu0 %4894 }
 0x50f   : > { %v5015_v28 = vmul.f32 %v4875_v49, %v4759_v56  ;;  %v4761_v57 = vmax.f32 %v4624_v12, 0.0 }
 0x510   : > { %v5071_v0 = vadd.f32 %v5070_v8, %v5014_v37  ;;  %v5016_v35 = vmul.f32 %v4880_v6, %v4760_v29  ;;  %v4900_v37 = vpop.permute.xlu1 %4899 }
 0x511   : > { %v5108_v59 = vadd.f32 %v5107_v62, %v5015_v28  ;;  %v5017_v2 = vmul.f32 %v4880_v6, %v4761_v57  ;;  %v4627_v63 = vpop.f32.mrb[48].mxu0 }
 0x512   : > { %v5072_v1 = vadd.f32 %v5071_v0, %v5016_v35  ;;  %v4628_v55 = vadd.f32 %v4627_v63, %v8141_v52  ;;  %v4629_v44 = vpop.f32.mrb[49].mxu0 }
 0x513   : > { %v5109_v20 = vadd.f32 %v5108_v59, %v5017_v2  ;;  %v4630_v17 = vadd.f32 %v4629_v44, %v8141_v52  ;;  %v4631_v38 = vpop.f32.mrb[50].mxu0 }
 0x514   : > { %v4762_v23 = vmax.f32 %v4628_v55, 0.0  ;;  %v4632_v11 = vadd.f32 %v4631_v38, %v8139_v21  ;;  %v4633_v42 = vpop.f32.mrb[51].mxu0  ;;  %v4905_v38 = vpop.permute.xlu0 %4904 }
 0x515   : > { %v4763_v10 = vmax.f32 %v4630_v17, 0.0  ;;  %v4634_v51 = vadd.f32 %v4633_v42, %v8139_v21 }
 0x516   : > { %v5018_v61 = vmul.f32 %v4885_v5, %v4762_v23  ;;  %v4764_v58 = vmax.f32 %v4632_v11, 0.0 }
 0x517   : > { %v5019_v22 = vmul.f32 %v4885_v5, %v4763_v10  ;;  %v4765_v15 = vmax.f32 %v4634_v51, 0.0  ;;  %v4910_v10 = vpop.permute.xlu1 %4909 }
 0x518   : > { %v5073_v41 = vadd.f32 %v5072_v1, %v5018_v61  ;;  %v5020_v50 = vmul.f32 %v4890_v9, %v4764_v58 }
 0x519   : > { %v5110_v40 = vadd.f32 %v5109_v20, %v5019_v22  ;;  %v5021_v53 = vmul.f32 %v4890_v9, %v4765_v15  ;;  %v4637_v19 = vpop.f32.mrb[52].mxu0 }
 0x51a   : > { %v5074_v52 = vadd.f32 %v5073_v41, %v5020_v50  ;;  %v4638_v8 = vadd.f32 %v4637_v19, %v8145_v18  ;;  %v4639_v60 = vpop.f32.mrb[53].mxu0 }
 0x51b   : > { %v5111_v34 = vadd.f32 %v5110_v40, %v5021_v53  ;;  %v4640_v62 = vadd.f32 %v4639_v60, %v8145_v18  ;;  %v4641_v25 = vpop.f32.mrb[54].mxu0 }
 0x51c   : > { %v4766_v24 = vmax.f32 %v4638_v8, 0.0  ;;  %v4642_v21 = vadd.f32 %v4641_v25, %v8143_v39  ;;  %v4643_v13 = vpop.f32.mrb[55].mxu0 }
 0x51d   : > { %v4767_v54 = vmax.f32 %v4640_v62, 0.0  ;;  %v4644_v49 = vadd.f32 %v4643_v13, %v8143_v39  ;;  %v4920_v13 = vpop.permute.xlu1 %4919 }
 0x51e   : > { %v5022_v56 = vmul.f32 %v4895_v14, %v4766_v24  ;;  %v4768_v12 = vmax.f32 %v4642_v21, 0.0 }
 0x51f   : > { %v5023_v29 = vmul.f32 %v4895_v14, %v4767_v54  ;;  %v4769_v6 = vmax.f32 %v4644_v49, 0.0 }
 0x520   : > { %v5075_v28 = vadd.f32 %v5074_v52, %v5022_v56  ;;  %v5024_v57 = vmul.f32 %v4900_v37, %v4768_v12 }
 0x521   : > { %v5112_v0 = vadd.f32 %v5111_v34, %v5023_v29  ;;  %v5025_v35 = vmul.f32 %v4900_v37, %v4769_v6  ;;  %v4647_v59 = vpop.f32.mrb[56].mxu0  ;;  %v4915_v34 = vpop.permute.xlu0 %4914 }
 0x522   : > { %v5076_v18 = vadd.f32 %v5075_v28, %v5024_v57  ;;  %v4648_v2 = vadd.f32 %v4647_v59, %v8149_v43  ;;  %v4649_v63 = vpop.f32.mrb[57].mxu0 }
 0x523   : > { %v5113_v1 = vadd.f32 %v5112_v0, %v5025_v35  ;;  %v4650_v55 = vadd.f32 %v4649_v63, %v8149_v43  ;;  %v4651_v44 = vpop.f32.mrb[58].mxu0 }
 0x524   : > { %v4770_v20 = vmax.f32 %v4648_v2, 0.0  ;;  %v4652_v39 = vadd.f32 %v4651_v44, %v8147_v27  ;;  %v4653_v17 = vpop.f32.mrb[59].mxu0 }
 0x525   : > { %v4771_v23 = vmax.f32 %v4650_v55, 0.0  ;;  %v4654_v11 = vadd.f32 %v4653_v17, %v8147_v27  ;;  %v4925_v2 = vpop.permute.xlu0 %4924  ;;  %v4930_v55 = vpop.permute.xlu1 %4929 }
 0x526   : > { %v5026_v42 = vmul.f32 %v4905_v38, %v4770_v20  ;;  %v4772_v5 = vmax.f32 %v4652_v39, 0.0 }
 0x527   : > { %v5027_v51 = vmul.f32 %v4905_v38, %v4771_v23  ;;  %v4773_v61 = vmax.f32 %v4654_v11, 0.0 }
 0x528   : > { %v5077_v58 = vadd.f32 %v5076_v18, %v5026_v42  ;;  %v5028_v9 = vmul.f32 %v4910_v10, %v4772_v5 }
 0x529   : > { %v5114_v22 = vadd.f32 %v5113_v1, %v5027_v51  ;;  %v5029_v15 = vmul.f32 %v4910_v10, %v4773_v61  ;;  %v4657_v41 = vpop.f32.mrb[60].mxu0 }
 0x52a   : > { %v5078_v43 = vadd.f32 %v5077_v58, %v5028_v9  ;;  %v4658_v50 = vadd.f32 %v4657_v41, %v8153_v33  ;;  %v4659_v40 = vpop.f32.mrb[61].mxu0 }
 0x52b   : > { %v5115_v53 = vadd.f32 %v5114_v22, %v5029_v15  ;;  %v4660_v19 = vadd.f32 %v4659_v40, %v8153_v33  ;;  %v4661_v52 = vpop.f32.mrb[62].mxu0  ;;  %v4940_v22 = vpop.permute.xlu1 %4939 }
 0x52c   : > { %v4774_v8 = vmax.f32 %v4658_v50, 0.0  ;;  %v4662_v27 = vadd.f32 %v4661_v52, %v8151_v7  ;;  %v4663_v60 = vpop.f32.mrb[63].mxu0 }
 0x52d   : > { %v4775_v62 = vmax.f32 %v4660_v19, 0.0  ;;  %v4664_v25 = vadd.f32 %v4663_v60, %v8151_v7 }
 0x52e   : > { %v5030_v24 = vmul.f32 %v4915_v34, %v4774_v8  ;;  %v4776_v21 = vmax.f32 %v4662_v27, 0.0 }
 0x52f   : > { %v5031_v14 = vmul.f32 %v4915_v34, %v4775_v62  ;;  %v4777_v54 = vmax.f32 %v4664_v25, 0.0 }
 0x530   : > { %v5079_v49 = vadd.f32 %v5078_v43, %v5030_v24  ;;  %v5032_v56 = vmul.f32 %v4920_v13, %v4776_v21  ;;  %v4935_v43 = vpop.permute.xlu0 %4934 }
 0x531   : > { %v5116_v12 = vadd.f32 %v5115_v53, %v5031_v14  ;;  %v5033_v37 = vmul.f32 %v4920_v13, %v4777_v54  ;;  %v4667_v29 = vpop.f32.mrb[64].mxu0 }
 0x532   : > { %v5080_v33 = vadd.f32 %v5079_v49, %v5032_v56  ;;  %v4668_v6 = vadd.f32 %v4667_v29, %v8157_v45  ;;  %v4669_v28 = vpop.f32.mrb[65].mxu0 }
 0x533   : > { %v5117_v57 = vadd.f32 %v5116_v12, %v5033_v37  ;;  %v4670_v0 = vadd.f32 %v4669_v28, %v8157_v45  ;;  %v4671_v35 = vpop.f32.mrb[66].mxu0 }
 0x534   : > { %v4778_v59 = vmax.f32 %v4668_v6, 0.0  ;;  %v4672_v7 = vadd.f32 %v4671_v35, %v8155_v48  ;;  %v4673_v18 = vpop.f32.mrb[67].mxu0  ;;  %v4945_v14 = vpop.permute.xlu0 %4944 }
 0x535   : > { %v4779_v63 = vmax.f32 %v4670_v0, 0.0  ;;  %v4674_v1 = vadd.f32 %v4673_v18, %v8155_v48 }
 0x536   : > { %v5034_v44 = vmul.f32 %v4925_v2, %v4778_v59  ;;  %v4780_v20 = vmax.f32 %v4672_v7, 0.0 }
 0x537   : > { %v5035_v39 = vmul.f32 %v4925_v2, %v4779_v63  ;;  %v4781_v17 = vmax.f32 %v4674_v1, 0.0 }
 0x538   : > { %v5081_v38 = vadd.f32 %v5080_v33, %v5034_v44  ;;  %v5036_v23 = vmul.f32 %v4930_v55, %v4780_v20  ;;  %v4955_v18 = vpop.permute.xlu0 %4954 }
 0x539   : > { %v5118_v11 = vadd.f32 %v5117_v57, %v5035_v39  ;;  %v5037_v42 = vmul.f32 %v4930_v55, %v4781_v17  ;;  %v4677_v5 = vpop.f32.mrb[68].mxu0 }
 0x53a   : > { %v5082_v45 = vadd.f32 %v5081_v38, %v5036_v23  ;;  %v4678_v10 = vadd.f32 %v4677_v5, %v8161_v26  ;;  %v4679_v51 = vpop.f32.mrb[69].mxu0 }
 0x53b   : > { %v5119_v61 = vadd.f32 %v5118_v11, %v5037_v42  ;;  %v4680_v58 = vadd.f32 %v4679_v51, %v8161_v26  ;;  %v4681_v9 = vpop.f32.mrb[70].mxu0  ;;  %v4950_v26 = vpop.permute.xlu1 %4949 }
 0x53c   : > { %v4782_v48 = vmax.f32 %v4678_v10, 0.0  ;;  %v4682_v15 = vadd.f32 %v4681_v9, %v8159_v47  ;;  %v4683_v41 = vpop.f32.mrb[71].mxu0  ;;  %v4965_v51 = vpop.permute.xlu0 %4964 }
 0x53d   : > { %v4783_v50 = vmax.f32 %v4680_v58, 0.0  ;;  %v4684_v40 = vadd.f32 %v4683_v41, %v8159_v47 }
 0x53e   : > { %v5038_v53 = vmul.f32 %v4935_v43, %v4782_v48  ;;  %v4784_v19 = vmax.f32 %v4682_v15, 0.0 }
 0x53f   : > { %v5039_v52 = vmul.f32 %v4935_v43, %v4783_v50  ;;  %v4785_v8 = vmax.f32 %v4684_v40, 0.0  ;;  %v4960_v35 = vpop.permute.xlu1 %4959 }
 0x540   : > { %v5083_v27 = vadd.f32 %v5082_v45, %v5038_v53  ;;  %v5040_v60 = vmul.f32 %v4940_v22, %v4784_v19 }
 0x541   : > { %v5120_v34 = vadd.f32 %v5119_v61, %v5039_v52  ;;  %v5041_v62 = vmul.f32 %v4940_v22, %v4785_v8  ;;  %v4687_v25 = vpop.f32.mrb[72].mxu0 }
 0x542   : > { %v5084_v24 = vadd.f32 %v5083_v27, %v5040_v60  ;;  %v4688_v21 = vadd.f32 %v4687_v25, %v8165_v4  ;;  %v4689_v13 = vpop.f32.mrb[73].mxu0  ;;  %v4376_v60 = vpop.permute.xlu0 %4375 }
 0x543   : > { %v5121_v54 = vadd.f32 %v5120_v34, %v5041_v62  ;;  %v4690_v49 = vadd.f32 %v4689_v13, %v8165_v4  ;;  %v4691_v56 = vpop.f32.mrb[74].mxu0  ;;  %v4970_v5 = vpop.permute.xlu1 %4969 }
 0x544   : > { %v4786_v47 = vmax.f32 %v4688_v21, 0.0  ;;  %v4692_v12 = vadd.f32 %v4691_v56, %v8163_v31  ;;  %v4693_v37 = vpop.f32.mrb[75].mxu0 }
 0x545   : > { %v4787_v29 = vmax.f32 %v4690_v49, 0.0  ;;  %v4694_v33 = vadd.f32 %v4693_v37, %v8163_v31 }
 0x546   : > { %v5042_v6 = vmul.f32 %v4945_v14, %v4786_v47  ;;  %v4788_v28 = vmax.f32 %v4692_v12, 0.0 }
 0x547   : > { %v5043_v57 = vmul.f32 %v4945_v14, %v4787_v29  ;;  %v4789_v0 = vmax.f32 %v4694_v33, 0.0  ;;  %v4381_v29 = vpop.permute.xlu0 %4380 }
 0x548   : > { %v5085_v59 = vadd.f32 %v5084_v24, %v5042_v6  ;;  %v5044_v7 = vmul.f32 %v4950_v26, %v4788_v28 }
 0x549   : > { %v5122_v2 = vadd.f32 %v5121_v54, %v5043_v57  ;;  %v5045_v63 = vmul.f32 %v4950_v26, %v4789_v0  ;;  %v4697_v1 = vpop.f32.mrb[76].mxu0 }
 0x54a   : > { %v5086_v4 = vadd.f32 %v5085_v59, %v5044_v7  ;;  %v4698_v55 = vadd.f32 %v4697_v1, %v8169_v30  ;;  %v4699_v44 = vpop.f32.mrb[77].mxu0 }
 0x54b   : > { %v5123_v20 = vadd.f32 %v5122_v2, %v5045_v63  ;;  %v4700_v39 = vadd.f32 %v4699_v44, %v8169_v30  ;;  %v4701_v17 = vpop.f32.mrb[78].mxu0  ;;  %v4386_v44 = vpop.permute.xlu0 %4385 }
 0x54c   : > { %v4790_v31 = vmax.f32 %v4698_v55, 0.0  ;;  %v4702_v38 = vadd.f32 %v4701_v17, %v8167_v46  ;;  %v4703_v23 = vpop.f32.mrb[79].mxu0 }
 0x54d   : > { %v4791_v11 = vmax.f32 %v4700_v39, 0.0  ;;  %v4704_v42 = vadd.f32 %v4703_v23, %v8167_v46  ;;  %v4975_v46 = vpop.permute.xlu1 %4974 }
 0x54e   : > { %v5046_v45 = vmul.f32 %v4955_v18, %v4790_v31  ;;  %v4792_v10 = vmax.f32 %v4702_v38, 0.0 }
 0x54f   : > { %v5047_v61 = vmul.f32 %v4955_v18, %v4791_v11  ;;  %v4793_v58 = vmax.f32 %v4704_v42, 0.0 }
 0x550   : > { %v5087_v9 = vadd.f32 %v5086_v4, %v5046_v45  ;;  %v5048_v22 = vmul.f32 %v4960_v35, %v4792_v10 }
 0x551   : > { %v5124_v48 = vadd.f32 %v5123_v20, %v5047_v61  ;;  %v5049_v15 = vmul.f32 %v4960_v35, %v4793_v58  ;;  %v4707_v41 = vpop.f32.mrb[80].mxu0 }
 0x552   : > { %v5088_v30 = vadd.f32 %v5087_v9, %v5048_v22  ;;  %v4708_v43 = vadd.f32 %v4707_v41, %v8173_v36  ;;  %v4709_v50 = vpop.f32.mrb[81].mxu0  ;;  %v4391_v22 = vpop.permute.xlu0 %4390 }
 0x553   : > { %v5125_v40 = vadd.f32 %v5124_v48, %v5049_v15  ;;  %v4710_v53 = vadd.f32 %v4709_v50, %v8173_v36  ;;  %v4711_v19 = vpop.f32.mrb[82].mxu0  ;;  %v4980_v36 = vpop.permute.xlu1 %4979 }
 0x554   : > { %v4794_v52 = vmax.f32 %v4708_v43, 0.0  ;;  %v4712_v8 = vadd.f32 %v4711_v19, %v8171_v32  ;;  %v4713_v27 = vpop.f32.mrb[83].mxu0 }
 0x555   : > { %v4795_v34 = vmax.f32 %v4710_v53, 0.0  ;;  %v4714_v62 = vadd.f32 %v4713_v27, %v8171_v32 }
 0x556   : > { %v5050_v25 = vmul.f32 %v4965_v51, %v4794_v52  ;;  %v4796_v26 = vmax.f32 %v4712_v8, 0.0 }
 0x557   : > { %v5051_v24 = vmul.f32 %v4965_v51, %v4795_v34  ;;  %v4797_v21 = vmax.f32 %v4714_v62, 0.0  ;;  %v4985_v1 = vpop.permute.xlu1 %4984 }
 0x558   : > { %v5089_v13 = vadd.f32 %v5088_v30, %v5050_v25  ;;  %v5052_v14 = vmul.f32 %v4970_v5, %v4796_v26  ;;  %v4995_v25 = vpop.permute.xlu0 %4994 }
 0x559   : > { %v5126_v54 = vadd.f32 %v5125_v40, %v5051_v24  ;;  %v5053_v49 = vmul.f32 %v4970_v5, %v4797_v21  ;;  %v4717_v56 = vpop.f32.mrb[84].mxu0 }
 0x55a   : > { %v5090_v47 = vadd.f32 %v5089_v13, %v5052_v14  ;;  %v4718_v12 = vadd.f32 %v4717_v56, %v8177_v3  ;;  %v4719_v37 = vpop.f32.mrb[85].mxu0 }
 0x55b   : > { %v5127_v33 = vadd.f32 %v5126_v54, %v5053_v49  ;;  %v4720_v6 = vadd.f32 %v4719_v37, %v8177_v3  ;;  %v4721_v28 = vpop.f32.mrb[86].mxu0  ;;  %v4990_v9 = vpop.permute.xlu1 %4989  ;;  %v5146_v37 = vlaneseq }
 0x55c   : > { %v4798_v32 = vmax.f32 %v4718_v12, 0.0  ;;  %v4722_v57 = vadd.f32 %v4721_v28, %v8175_v16  ;;  %v4723_v0 = vpop.f32.mrb[87].mxu0 }
 0x55d   : > { %v4799_v35 = vmax.f32 %v4720_v6, 0.0  ;;  %v4724_v59 = vadd.f32 %v4723_v0, %v8175_v16  ;;  %vm5172_vm5 = vcmp.lt.s32.totalorder %v5146_v37, 256 }
 0x55e   : > { %v5054_v7 = vmul.f32 %v4975_v46, %v4798_v32  ;;  %v4800_v18 = vmax.f32 %v4722_v57, 0.0  ;;  %v5147_v32 = vshrl.u32 %v5146_v37, 7 }
 0x55f   : > { %v5055_v2 = vmul.f32 %v4975_v46, %v4799_v35  ;;  %v4801_v63 = vmax.f32 %v4724_v59, 0.0  ;;  %v5000_v14 = vpop.permute.xlu1 %4999  ;;  %v5800_v59 = vmov 1966171168  }
 0x560   : > { %v5091_v4 = vadd.f32 %v5090_v47, %v5054_v7  ;;  %v5056_v55 = vmul.f32 %v4980_v36, %v4800_v18  ;;  %v5156_v7 = vunpack.c.l.s4 %v5800_v59 }
 0x561   : > { %v5128_v20 = vadd.f32 %v5127_v33, %v5055_v2  ;;  %v5057_v39 = vmul.f32 %v4980_v36, %v4801_v63  ;;  %v4727_v17 = vpop.f32.mrb[88].mxu0  ;;  %v5148_v2 = vsub.s32 0, %v5147_v32 }
 0x562   : > { %v5092_v3 = vadd.f32 %v5091_v4, %v5056_v55  ;;  %v4728_v31 = vadd.f32 %v4727_v17, %v4376_v60  ;;  %v4729_v38 = vpop.f32.mrb[89].mxu0 }
 0x563   : > { %v5129_v23 = vadd.f32 %v5128_v20, %v5057_v39  ;;  %v4730_v11 = vadd.f32 %v4729_v38, %v4376_v60  ;;  %v4731_v42 = vpop.f32.mrb[90].mxu0 }
 0x564   : > { %v4802_v5 = vmax.f32 %v4728_v31, 0.0  ;;  %v4732_v45 = vadd.f32 %v4731_v42, %v4381_v29  ;;  %v4733_v16 = vpop.f32.mrb[91].mxu0 }
 0x565   : > { %v4803_v10 = vmax.f32 %v4730_v11, 0.0  ;;  %v4734_v51 = vadd.f32 %v4733_v16, %v4381_v29 }
 0x566   : > { %v5058_v61 = vmul.f32 %v4985_v1, %v4802_v5  ;;  %v4804_v58 = vmax.f32 %v4732_v45, 0.0 }
 0x567   : > { %v5059_v48 = vmul.f32 %v4985_v1, %v4803_v10  ;;  %v4805_v15 = vmax.f32 %v4734_v51, 0.0  ;;  %v5144_v1 = vpop.permute.xlu0 %5143 }
 0x568   : > { %v5093_v41 = vadd.f32 %v5092_v3, %v5058_v61  ;;  %v5060_v30 = vmul.f32 %v4990_v9, %v4804_v58  ;;  %v5149_v39 = vrot.slane %v5144_v1, %v5148_v2 }
 0x569   : > { %v5130_v43 = vadd.f32 %v5129_v23, %v5059_v48  ;;  %v5061_v50 = vmul.f32 %v4990_v9, %v4805_v15  ;;  %v4737_v40 = vpop.f32.mrb[92].mxu0 }
 0x56a   : > { %v5094_v53 = vadd.f32 %v5093_v41, %v5060_v30  ;;  %v4738_v19 = vadd.f32 %v4737_v40, %v4386_v44  ;;  %v4739_v46 = vpop.f32.mrb[93].mxu0 }
 0x56b   : > { %v5131_v52 = vadd.f32 %v5130_v43, %v5061_v50  ;;  %v4740_v8 = vadd.f32 %v4739_v46, %v4386_v44  ;;  %v4741_v27 = vpop.f32.mrb[94].mxu0  ;;  %v5157_v44 = vunpack.c.0.s8 %v5156_v7 }
 0x56c   : > { %v4806_v60 = vmax.f32 %v4738_v19, 0.0  ;;  %v4742_v34 = vadd.f32 %v4741_v27, %v4391_v22  ;;  %v4743_v62 = vpop.f32.mrb[95].mxu0 }
 0x56d   : > { %v4807_v26 = vmax.f32 %v4740_v8, 0.0  ;;  %v4744_v24 = vadd.f32 %v4743_v62, %v4391_v22  ;;  %v5160_v38 = vsub.s32 %v5157_v44, %v5147_v32 }
 0x56e   : > { %v5062_v21 = vmul.f32 %v4995_v25, %v4806_v60  ;;  %v4808_v13 = vmax.f32 %v4742_v34, 0.0 }
 0x56f   : > { %v5063_v54 = vmul.f32 %v4995_v25, %v4807_v26  ;;  %v4809_v49 = vmax.f32 %v4744_v24, 0.0 }
 0x570   : > { %v5095_v56 = vadd.f32 %v5094_v53, %v5062_v21  ;;  %v5064_v36 = vmul.f32 %v5000_v14, %v4808_v13 }
 0x571   : > { %v5132_v47 = vadd.f32 %v5131_v52, %v5063_v54  ;;  %v5065_v12 = vmul.f32 %v5000_v14, %v4809_v49 }
 0x572   : > { %v5096_v29 = vadd.f32 %v5095_v56, %v5064_v36 }
 0x573   : > { %v5133_v33 = vadd.f32 %v5132_v47, %v5065_v12 }
 0x574   : > { %v5097_v6 = vrot.slane %v5096_v29, 4 }
 0x575   : > { %v5134_v28 = vrot.slane %v5133_v33, 4 }
 0x576   : > { %v5098_v57 = vadd.f32 %v5097_v6, %v5096_v29 }
 0x577   : > { %v5135_v0 = vadd.f32 %v5134_v28, %v5133_v33 }
 0x578   : > { %v5099_v35 = vrot.slane %v5098_v57, 2 }
 0x579   : > { %v5136_v18 = vrot.slane %v5135_v0, 2 }
 0x57a   : > { %v5100_v63 = vadd.f32 %v5099_v35, %v5098_v57 }
 0x57b   : > { %v5137_v4 = vadd.f32 %v5136_v18, %v5135_v0 }
 0x57c   : > { %v5101_v55 = vrot.slane %v5100_v63, 1 }
 0x57d   : > { %v5138_v20 = vrot.slane %v5137_v4, 1 }
 0x57e   : > { %v5102_v17 = vadd.f32 %v5101_v55, %v5100_v63 }
 0x57f   : > { %v5139_v3 = vadd.f32 %v5138_v20, %v5137_v4 }
 0x580   : > { %v5150_v31 = vadd.f32 %v5149_v39, %v5102_v17 }
 0x581   : > { %v5151_v23 = vadd.f32 %v5149_v39, %v5139_v3 }
 0x583   : > { %v5154_v11 = vcombine.low %v5150_v31, %v5151_v23 }
 0x585   : > { %v5161_v42 = vrot.slane %v5154_v11, %v5160_v38 }
 0x587   : > { %v5168_v5 = vrot.slane %v5161_v42, %v5160_v38 }
 0x589   : > { %5174 = vst.msk [vmem:[%s328_s27] sm:$0x3] %vm5172_vm5, %v5168_v5 }
 0x58a   : > { %5742 = shalt.err (!%p5739_p3)
}
 0x58b   : > { %s5743_s22 = scalar_lea.hbm %s8232_s10, 32  ;;  %s5747_s25 = scalar_lea.hbm %s8283_s9, 64 }
 0x58c   : > { %p5744_p4 = scmp.ne.s32.totalorder %s8232_s10, %s5743_s22  ;;  %p5748_p9 = scmp.lt.u32.totalorder %s8232_s10, %s8283_s9 }
 0x58d   : > { %p5749_p10 = scmp.lt.u32.totalorder %s5747_s25, %s5743_s22  ;;  %p5751_p12 = scmp.lt.u32.totalorder %s5743_s22, %s8232_s10 }
 0x58e   : > { %p5745_p7 = pnand %p5744_p4, %p5893_p5 }
 0x58f   : > { %p5750_p11 = por %p5749_p10, %p5748_p9 }
 0x590   : > { %p5746_p8 = pneg %p5745_p7 }
 0x591   : > { %p5752_p13 = por %p5751_p12, %p5750_p11 }
 0x593   : > { %p5753_p0 = pnand %p5752_p13, %p5746_p8 }
 0x595   : > { %5756 = shalt.err (!%p5753_p0)
}
 0x596   : > { %5517 = dma.vmem_to_hbm [thread:$0]  (%p5893_p5), %s8234_s28, 32, %s8232_s10, %s5176_s30  }
 0x597 PF: > { %p5523_p1 = scmp.ge.s32.totalorder %s5791_s14, 2  ;;  %s5202_s26 = sand.u32 1, %s5779_s11  }
 0x598   : > { %s5203_s15 = scalar_lea.sflag [#allocation4], %s5202_s26 }
 0x599   : > { %p5520_p2 = pnand %p5523_p1, %p5897_p6 }
 0x59b   : > { %5774 = dma.done.wait (!%p5520_p2), %s5203_s15, 32  }
 0x59c   : > { %5776 = vsyncadd (!%p5520_p2), %s5203_s15, 4294967264  ;;  %p21_p3 = scmp.ge.s32.totalorder %s5880_s16, 4   ;;  %s8372_s11 = smov %s5783_s12 }
 0x59d   : > { %s8373_s12 = smov %s5787_s13  ;;  %s8374_s13 = smov %s5891_s19 }
 0x59e   : > { %s8375_s14 = smov %s5880_s16  ;;  %23 = sbr.rel (!%p21_p3) target bundleno = 6 (0x6), region = 91 }
 0x5a5   :  { %5208 = vsyncpa [#allocation4], 1 }
 0x5a6   :  { %5210 = vsyncpa [#allocation4 + $0x1], 1 }

</bundles_post_ra>
